<compile_context>
chip_gen: v7x
topology: tpu7x:2x2x1
jax: 0.10.0
libtpu: 0.0.40
codegen_flags: <defaults>
</compile_context>

<pallas_src>
import functools
import math

import jax
import jax.numpy as jnp
from jax.experimental import pallas as pl
from jax.experimental.pallas import tpu as pltpu

# ---- synthetic "base_model.config" (BERT-style) -----------------------------
VOCAB = 128
TYPE_VOCAB = 2
MAX_POS = 16
HIDDEN = 32          # hidden_size
N_LAYERS = 2         # num_hidden_layers
N_HEADS = 4          # num_attention_heads
HEAD_DIM = HIDDEN // N_HEADS
INTERMEDIATE = 64
NUM_LABELS = 3       # task.num_labels for the demo task head
LN_EPS = 1e-12

# NOTE(v6e/v7x): at real BERT sizes, cast weights / matmul inputs to bf16 (keep
# preferred_element_type=f32) and introduce a (batch-tile, layer) grid with
# vmem_limit_bytes headroom (v7x has 64 MiB VMEM, 2 TCs).  At these toy shapes
# f32 + a single un-gridded, fully VMEM-resident call is the right structure.

_VMEM = functools.partial(pl.BlockSpec, memory_space=pltpu.MemorySpace.VMEM)


def _gelu(x):
    # tanh-approx GELU (HF "gelu_new"); EUP-friendly.
    c = math.sqrt(2.0 / math.pi)
    return 0.5 * x * (1.0 + jnp.tanh(c * (x + 0.044715 * x * x * x)))


def _layer_norm(x, g, b, eps=LN_EPS):
    mu = jnp.mean(x, axis=-1, keepdims=True)
    var = jnp.mean((x - mu) ** 2, axis=-1, keepdims=True)
    return (x - mu) * jax.lax.rsqrt(var + eps) * g + b


# -----------------------------------------------------------------------------
# Single fused kernel: all encoder layers + pooler + task head.
# -----------------------------------------------------------------------------
def _fused_forward_kernel(
        x_ref,                      # [B*S, H]        embeddings (post-LN)
        mask_ref,                   # [nH*B, S]       additive attention bias
        hm_ref,                     # [L, nH*B, 1, 1] per-layer/per-head mask
        wq_ref, bq_ref, wk_ref, bk_ref, wv_ref, bv_ref,     # [L,H,H]/[L,1,H]
        wo_ref, bo_ref, g1_ref, be1_ref,                    # [L,H,H]/[L,1,H]
        w1_ref, bf1_ref, w2_ref, bf2_ref, g2_ref, be2_ref,  # FFN + LN2
        pw_ref, pb_ref, hw_ref, hb_ref,                     # pooler + task head
        h_out_ref, pooled_ref, logits_ref,                  # outputs
        *attn_refs,                                          # optional, per layer
        batch, seq, output_attentions):
    B, S = batch, seq
    scale = 1.0 / math.sqrt(HEAD_DIM)

    h2 = x_ref[...]                                    # [B*S, H], VMEM-resident
    mask = mask_ref[...]                               # [nH*B, S]

    for l in range(N_LAYERS):                          # layers fused in-kernel
        hm_l = hm_ref[l]                               # [nH*B, 1, 1]

        def proj(w_ref, b_ref):
            # flattened [B*S, H] matmul -> full sublane occupancy
            return (jnp.dot(h2, w_ref[l], preferred_element_type=jnp.float32)
                    + b_ref[l])

        q3 = proj(wq_ref, bq_ref).reshape(B, S, HIDDEN)
        k3 = proj(wk_ref, bk_ref).reshape(B, S, HIDDEN)
        v3 = proj(wv_ref, bv_ref).reshape(B, S, HIDDEN)

        def to_heads(t3):
            # regroup heads into the leading batch dim: [nH*B, S, hd], x = h*B+b
            return jnp.concatenate(
                [t3[:, :, h * HEAD_DIM:(h + 1) * HEAD_DIM]
                 for h in range(N_HEADS)], axis=0)

        q_hd, k_hd, v_hd = to_heads(q3), to_heads(k3), to_heads(v3)

        # one batched contraction for all heads/batches
        s = jnp.einsum('xqd,xkd->xqk', q_hd, k_hd,
                       preferred_element_type=jnp.float32) * scale
        s = s + mask[:, None, :]                        # extended attention mask
        s = s - jnp.max(s, axis=-1, keepdims=True)
        e = jnp.exp(s)
        p = e * pl.reciprocal(jnp.sum(e, axis=-1, keepdims=True), approx=True)

        if output_attentions:
            p = p * hm_l                                # HF returns masked probs
            attn_refs[l][...] = jnp.stack(
                [p[h * B:(h + 1) * B] for h in range(N_HEADS)], axis=1)
        else:
            # fast path: fold head mask into V  ((p*hm)@v == p@(v*hm))
            v_hd = v_hd * hm_l

        ctx = jnp.einsum('xqk,xkd->xqd', p, v_hd,
                         preferred_element_type=jnp.float32)   # [nH*B, S, hd]
        ctx2 = jnp.concatenate(
            [ctx[h * B:(h + 1) * B] for h in range(N_HEADS)], axis=-1
        ).reshape(B * S, HIDDEN)                        # back to [B*S, H]

        attn_out = (jnp.dot(ctx2, wo_ref[l], preferred_element_type=jnp.float32)
                    + bo_ref[l])
        h1 = _layer_norm(h2 + attn_out, g1_ref[l], be1_ref[l])

        ff = _gelu(jnp.dot(h1, w1_ref[l], preferred_element_type=jnp.float32)
                   + bf1_ref[l])
        ff2 = (jnp.dot(ff, w2_ref[l], preferred_element_type=jnp.float32)
               + bf2_ref[l])
        h2 = _layer_norm(h1 + ff2, g2_ref[l], be2_ref[l])

    # --- pooler (tanh(Linear(CLS))) + task head, still inside the same kernel
    h_out_ref[...] = h2.reshape(B, S, HIDDEN)
    cls = h_out_ref[:, 0, :]                            # [B, H]
    pooled = jnp.tanh(jnp.dot(cls, pw_ref[...],
                              preferred_element_type=jnp.float32) + pb_ref[...])
    pooled_ref[...] = pooled
    logits_ref[...] = (jnp.dot(pooled, hw_ref[...],
                               preferred_element_type=jnp.float32) + hb_ref[...])


# -----------------------------------------------------------------------------
# Parameter init (deterministic, synthetic) + model wrapper
# -----------------------------------------------------------------------------
def init_params(key):
    keys = iter(jax.random.split(key, 64))

    def nrm(shape, scale=0.02):
        return (scale * jax.random.normal(next(keys), shape)).astype(jnp.float32)

    def zeros(shape):
        return jnp.zeros(shape, jnp.float32)

    def ones(shape):
        return jnp.ones(shape, jnp.float32)

    L = N_LAYERS
    stacked = {                                   # per-layer weights, stacked
        'wq': nrm((L, HIDDEN, HIDDEN)), 'bq': zeros((L, 1, HIDDEN)),
        'wk': nrm((L, HIDDEN, HIDDEN)), 'bk': zeros((L, 1, HIDDEN)),
        'wv': nrm((L, HIDDEN, HIDDEN)), 'bv': zeros((L, 1, HIDDEN)),
        'wo': nrm((L, HIDDEN, HIDDEN)), 'bo': zeros((L, 1, HIDDEN)),
        'ln1_g': ones((L, 1, HIDDEN)), 'ln1_b': zeros((L, 1, HIDDEN)),
        'w1': nrm((L, HIDDEN, INTERMEDIATE)), 'bf1': zeros((L, 1, INTERMEDIATE)),
        'w2': nrm((L, INTERMEDIATE, HIDDEN)), 'bf2': zeros((L, 1, HIDDEN)),
        'ln2_g': ones((L, 1, HIDDEN)), 'ln2_b': zeros((L, 1, HIDDEN)),
    }
    return {
        'word_emb': nrm((VOCAB, HIDDEN)),
        'pos_emb': nrm((MAX_POS, HIDDEN)),
        'type_emb': nrm((TYPE_VOCAB, HIDDEN)),
        'emb_ln_g': ones((HIDDEN,)),
        'emb_ln_b': zeros((HIDDEN,)),
        'stacked': stacked,
        'pool_w': nrm((HIDDEN, HIDDEN)),
        'pool_b': zeros((1, HIDDEN)),
    }


class MultiHeadModelForMultiTasks:
    """JAX/Pallas mirror of the PyTorch module's forward path."""

    def __init__(self, key):
        self.params = init_params(key)
        self.heads = {}     # task_id -> (W [H, out_dim], b [1, out_dim])
        self.masks = {}     # task_id -> ones(n_layers, n_heads)
        # TODO(synk): criterions/metrics/step()/save()/load() are training-loop
        # glue (losses, HF metrics, torch.save) and are not kernelized here.

    def setup(self, task_id, num_labels, key):
        kw, = jax.random.split(key, 1)
        w = (0.02 * jax.random.normal(kw, (HIDDEN, num_labels))).astype(jnp.float32)
        b = jnp.zeros((1, num_labels), jnp.float32)
        self.heads[task_id] = (w, b)
        self.masks[task_id] = jnp.ones((N_LAYERS, N_HEADS), jnp.float32)

    def forward(self, input_ids, attention_mask, token_type_ids, head_mask,
                task_id, output_attentions=True):
        p = self.params
        B, S = input_ids.shape

        # --- embeddings (plain-JAX glue: gather + LN) ---
        emb = (jnp.take(p['word_emb'], input_ids, axis=0)
               + p['pos_emb'][None, :S, :]
               + jnp.take(p['type_emb'], token_type_ids, axis=0))
        h0 = _layer_norm(emb, p['emb_ln_g'], p['emb_ln_b']).astype(jnp.float32)
        h0 = h0.reshape(B * S, HIDDEN)

        # extended attention mask (additive, 0 keep / -1e4 masked), tiled so the
        # kernel's head-major batch dim x = h*B + b can use it directly.
        ext = (1.0 - attention_mask.astype(jnp.float32)) * -10000.0      # [B,S]
        mask_tiled = jnp.tile(ext, (N_HEADS, 1))                         # [nH*B,S]
        hm_e = jnp.repeat(jnp.asarray(head_mask, jnp.float32), B, axis=1
                          ).reshape(N_LAYERS, N_HEADS * B, 1, 1)

        head_w, head_b = self.heads[task_id]
        L = p['stacked']

        args = (h0, mask_tiled, hm_e,
                L['wq'], L['bq'], L['wk'], L['bk'], L['wv'], L['bv'],
                L['wo'], L['bo'], L['ln1_g'], L['ln1_b'],
                L['w1'], L['bf1'], L['w2'], L['bf2'], L['ln2_g'], L['ln2_b'],
                p['pool_w'], p['pool_b'], head_w, head_b)

        out_shapes = [jax.ShapeDtypeStruct((B, S, HIDDEN), jnp.float32),
                      jax.ShapeDtypeStruct((B, HIDDEN), jnp.float32),
                      jax.ShapeDtypeStruct((B, head_w.shape[1]), jnp.float32)]
        if output_attentions:
            out_shapes += [jax.ShapeDtypeStruct((B, N_HEADS, S, S), jnp.float32)
                           for _ in range(N_LAYERS)]

        kernel = functools.partial(_fused_forward_kernel, batch=B, seq=S,
                                   output_attentions=output_attentions)
        outs = pl.pallas_call(
            kernel,
            out_shape=tuple(out_shapes),
            in_specs=[_VMEM() for _ in args],
            out_specs=tuple(_VMEM() for _ in out_shapes),
        )(*args)

        result = {'last_hidden_state': outs[0],
                  'pooler_output': outs[1],
                  'task_logits': outs[2]}
        if output_attentions:
            result['attentions'] = tuple(outs[3:])
        return result


# -----------------------------------------------------------------------------
# Pure-JAX reference (for correctness check of the fused Pallas kernel)
# -----------------------------------------------------------------------------
def _ref_forward(params, head_w, head_b, input_ids, attention_mask,
                 token_type_ids, head_mask):
    p = params
    L = p['stacked']
    B, S = input_ids.shape
    emb = (jnp.take(p['word_emb'], input_ids, axis=0)
           + p['pos_emb'][None, :S, :]
           + jnp.take(p['type_emb'], token_type_ids, axis=0))
    h = _layer_norm(emb, p['emb_ln_g'], p['emb_ln_b'])
    ext = (1.0 - attention_mask.astype(jnp.float32)) * -10000.0
    attns = []
    for l in range(N_LAYERS):
        q = h @ L['wq'][l] + L['bq'][l]
        k = h @ L['wk'][l] + L['bk'][l]
        v = h @ L['wv'][l] + L['bv'][l]

        def split(t):
            return t.reshape(B, S, N_HEADS, HEAD_DIM).transpose(0, 2, 1, 3)

        qh, kh, vh = split(q), split(k), split(v)
        s = jnp.einsum('bnqd,bnkd->bnqk', qh, kh) / math.sqrt(HEAD_DIM)
        s = s + ext[:, None, None, :]
        pr = jax.nn.softmax(s, axis=-1)
        pr = pr * head_mask[l][None, :, None, None]
        attns.append(pr)
        ctx = jnp.einsum('bnqk,bnkd->bnqd', pr, vh).transpose(0, 2, 1, 3)
        ctx = ctx.reshape(B, S, HIDDEN)
        a = ctx @ L['wo'][l] + L['bo'][l]
        h1 = _layer_norm(h + a, L['ln1_g'][l], L['ln1_b'][l])
        ff = _gelu(h1 @ L['w1'][l] + L['bf1'][l])
        h = _layer_norm(h1 + ff @ L['w2'][l] + L['bf2'][l],
                        L['ln2_g'][l], L['ln2_b'][l])
    cls = h[:, 0, :]
    pooled = jnp.tanh(cls @ p['pool_w'] + p['pool_b'])
    logits = pooled @ head_w + head_b
    return h, pooled, logits, attns


if __name__ == "__main__":
    root = jax.random.PRNGKey(0)
    k_model, k_head, k_ids = jax.random.split(root, 3)

    model = MultiHeadModelForMultiTasks(k_model)
    model.setup('task_a', NUM_LABELS, k_head)

    B, S = 2, 8
    input_ids = jax.random.randint(k_ids, (B, S), 0, VOCAB, dtype=jnp.int32)
    token_type_ids = jnp.concatenate(
        [jnp.zeros((B, S // 2), jnp.int32), jnp.ones((B, S // 2), jnp.int32)],
        axis=1)
    attention_mask = jnp.array([[1] * S, [1] * (S - 2) + [0, 0]], dtype=jnp.int32)
    # non-trivial head mask to exercise the head-mask path (default would be
    # model.masks['task_a'], i.e. all ones)
    head_mask = model.masks['task_a'].at[0, 1].set(0.5).at[1, 2].set(0.0)

    # full path (matches HF output_attentions=True)
    out = model.forward(input_ids, attention_mask, token_type_ids, head_mask,
                        'task_a', output_attentions=True)
    jax.block_until_ready(out['task_logits'])

    ref_h, ref_pooled, ref_logits, ref_attns = _ref_forward(
        model.params, *model.heads['task_a'],
        input_ids, attention_mask, token_type_ids, head_mask)

    TOL = dict(atol=3e-3, rtol=3e-3)   # loosened for approx-reciprocal softmax
    assert jnp.allclose(out['last_hidden_state'], ref_h, **TOL)
    assert jnp.allclose(out['pooler_output'], ref_pooled, **TOL)
    assert jnp.allclose(out['task_logits'], ref_logits, **TOL)
    for l in range(N_LAYERS):
        assert jnp.allclose(out['attentions'][l], ref_attns[l], **TOL)

    # fast path: attention probs not materialized, head mask folded into V
    out2 = model.forward(input_ids, attention_mask, token_type_ids, head_mask,
                         'task_a', output_attentions=False)
    jax.block_until_ready(out2['task_logits'])
    assert 'attentions' not in out2
    assert jnp.allclose(out2['task_logits'], ref_logits, **TOL)
    assert jnp.allclose(out2['last_hidden_state'], ref_h, **TOL)

    print("KERNEL_OK")
</pallas_src>

<mosaic_0001>
module attributes {stable_mosaic.version = 11 : i64} {
  func.func @_fused_forward_kernel(%arg0: memref<16x32xf32, #tpu.memory_space<vmem>>, %arg1: memref<8x8xf32, #tpu.memory_space<vmem>>, %arg2: memref<2x8x1x1xf32, #tpu.memory_space<vmem>>, %arg3: memref<2x32x32xf32, #tpu.memory_space<vmem>>, %arg4: memref<2x1x32xf32, #tpu.memory_space<vmem>>, %arg5: memref<2x32x32xf32, #tpu.memory_space<vmem>>, %arg6: memref<2x1x32xf32, #tpu.memory_space<vmem>>, %arg7: memref<2x32x32xf32, #tpu.memory_space<vmem>>, %arg8: memref<2x1x32xf32, #tpu.memory_space<vmem>>, %arg9: memref<2x32x32xf32, #tpu.memory_space<vmem>>, %arg10: memref<2x1x32xf32, #tpu.memory_space<vmem>>, %arg11: memref<2x1x32xf32, #tpu.memory_space<vmem>>, %arg12: memref<2x1x32xf32, #tpu.memory_space<vmem>>, %arg13: memref<2x32x64xf32, #tpu.memory_space<vmem>>, %arg14: memref<2x1x64xf32, #tpu.memory_space<vmem>>, %arg15: memref<2x64x32xf32, #tpu.memory_space<vmem>>, %arg16: memref<2x1x32xf32, #tpu.memory_space<vmem>>, %arg17: memref<2x1x32xf32, #tpu.memory_space<vmem>>, %arg18: memref<2x1x32xf32, #tpu.memory_space<vmem>>, %arg19: memref<32x32xf32, #tpu.memory_space<vmem>>, %arg20: memref<1x32xf32, #tpu.memory_space<vmem>>, %arg21: memref<32x3xf32, #tpu.memory_space<vmem>>, %arg22: memref<1x3xf32, #tpu.memory_space<vmem>>, %arg23: memref<2x8x32xf32, #tpu.memory_space<vmem>>, %arg24: memref<2x32xf32, #tpu.memory_space<vmem>>, %arg25: memref<2x3xf32, #tpu.memory_space<vmem>>, %arg26: memref<2x4x8x8xf32, #tpu.memory_space<vmem>>, %arg27: memref<2x4x8x8xf32, #tpu.memory_space<vmem>>) attributes {dimension_semantics = [], scalar_prefetch = 0 : i64, scratch_operands = 0 : i64, tpu.core_type = #tpu.core_type<tc>} {
    %c0 = arith.constant 0 : index
    %c0_0 = arith.constant 0 : index
    %0 = vector.load %arg0[%c0, %c0_0] : memref<16x32xf32, #tpu.memory_space<vmem>>, vector<16x32xf32>
    %c0_1 = arith.constant 0 : index
    %c0_2 = arith.constant 0 : index
    %1 = vector.load %arg1[%c0_1, %c0_2] : memref<8x8xf32, #tpu.memory_space<vmem>>, vector<8x8xf32>
    %c0_3 = arith.constant 0 : index
    %c0_4 = arith.constant 0 : index
    %c0_5 = arith.constant 0 : index
    %c0_6 = arith.constant 0 : index
    %2 = vector.load %arg2[%c0_3, %c0_4, %c0_5, %c0_6] : memref<2x8x1x1xf32, #tpu.memory_space<vmem>>, vector<1x8x1x1xf32>
    %3 = vector.shape_cast %2 : vector<1x8x1x1xf32> to vector<8x1x1xf32>
    %c0_7 = arith.constant 0 : index
    %c0_8 = arith.constant 0 : index
    %c0_9 = arith.constant 0 : index
    %4 = vector.load %arg3[%c0_7, %c0_8, %c0_9] : memref<2x32x32xf32, #tpu.memory_space<vmem>>, vector<1x32x32xf32>
    %5 = vector.shape_cast %4 : vector<1x32x32xf32> to vector<32x32xf32>
    %cst = arith.constant dense<0.000000e+00> : vector<16x32xf32>
    %6 = tpu.matmul %0, %5, %cst {dimension_numbers = #tpu.dot_dimension_numbers<[1], [0], [0], [1], [0, 0, 1, 1], [], []>} : vector<16x32xf32>, vector<32x32xf32>, vector<16x32xf32> -> vector<16x32xf32>
    %c0_10 = arith.constant 0 : index
    %c0_11 = arith.constant 0 : index
    %c0_12 = arith.constant 0 : index
    %7 = vector.load %arg4[%c0_10, %c0_11, %c0_12] : memref<2x1x32xf32, #tpu.memory_space<vmem>>, vector<1x1x32xf32>
    %8 = vector.shape_cast %7 : vector<1x1x32xf32> to vector<1x32xf32>
    %9 = vector.broadcast %8 : vector<1x32xf32> to vector<16x32xf32>
    %10 = arith.addf %6, %9 : vector<16x32xf32>
    %11 = vector.shape_cast %10 : vector<16x32xf32> to vector<2x8x32xf32>
    %c0_13 = arith.constant 0 : index
    %c0_14 = arith.constant 0 : index
    %c0_15 = arith.constant 0 : index
    %12 = vector.load %arg5[%c0_13, %c0_14, %c0_15] : memref<2x32x32xf32, #tpu.memory_space<vmem>>, vector<1x32x32xf32>
    %13 = vector.shape_cast %12 : vector<1x32x32xf32> to vector<32x32xf32>
    %cst_16 = arith.constant dense<0.000000e+00> : vector<16x32xf32>
    %14 = tpu.matmul %0, %13, %cst_16 {dimension_numbers = #tpu.dot_dimension_numbers<[1], [0], [0], [1], [0, 0, 1, 1], [], []>} : vector<16x32xf32>, vector<32x32xf32>, vector<16x32xf32> -> vector<16x32xf32>
    %c0_17 = arith.constant 0 : index
    %c0_18 = arith.constant 0 : index
    %c0_19 = arith.constant 0 : index
    %15 = vector.load %arg6[%c0_17, %c0_18, %c0_19] : memref<2x1x32xf32, #tpu.memory_space<vmem>>, vector<1x1x32xf32>
    %16 = vector.shape_cast %15 : vector<1x1x32xf32> to vector<1x32xf32>
    %17 = vector.broadcast %16 : vector<1x32xf32> to vector<16x32xf32>
    %18 = arith.addf %14, %17 : vector<16x32xf32>
    %19 = vector.shape_cast %18 : vector<16x32xf32> to vector<2x8x32xf32>
    %c0_20 = arith.constant 0 : index
    %c0_21 = arith.constant 0 : index
    %c0_22 = arith.constant 0 : index
    %20 = vector.load %arg7[%c0_20, %c0_21, %c0_22] : memref<2x32x32xf32, #tpu.memory_space<vmem>>, vector<1x32x32xf32>
    %21 = vector.shape_cast %20 : vector<1x32x32xf32> to vector<32x32xf32>
    %cst_23 = arith.constant dense<0.000000e+00> : vector<16x32xf32>
    %22 = tpu.matmul %0, %21, %cst_23 {dimension_numbers = #tpu.dot_dimension_numbers<[1], [0], [0], [1], [0, 0, 1, 1], [], []>} : vector<16x32xf32>, vector<32x32xf32>, vector<16x32xf32> -> vector<16x32xf32>
    %c0_24 = arith.constant 0 : index
    %c0_25 = arith.constant 0 : index
    %c0_26 = arith.constant 0 : index
    %23 = vector.load %arg8[%c0_24, %c0_25, %c0_26] : memref<2x1x32xf32, #tpu.memory_space<vmem>>, vector<1x1x32xf32>
    %24 = vector.shape_cast %23 : vector<1x1x32xf32> to vector<1x32xf32>
    %25 = vector.broadcast %24 : vector<1x32xf32> to vector<16x32xf32>
    %26 = arith.addf %22, %25 : vector<16x32xf32>
    %27 = vector.shape_cast %26 : vector<16x32xf32> to vector<2x8x32xf32>
    %28 = vector.extract_strided_slice %11 {offsets = [0, 0, 0], sizes = [2, 8, 8], strides = [1, 1, 1]} : vector<2x8x32xf32> to vector<2x8x8xf32>
    %29 = vector.extract_strided_slice %11 {offsets = [0, 0, 8], sizes = [2, 8, 8], strides = [1, 1, 1]} : vector<2x8x32xf32> to vector<2x8x8xf32>
    %30 = vector.extract_strided_slice %11 {offsets = [0, 0, 16], sizes = [2, 8, 8], strides = [1, 1, 1]} : vector<2x8x32xf32> to vector<2x8x8xf32>
    %31 = vector.extract_strided_slice %11 {offsets = [0, 0, 24], sizes = [2, 8, 8], strides = [1, 1, 1]} : vector<2x8x32xf32> to vector<2x8x8xf32>
    %32 = tpu.concatenate %28, %29, %30, %31 in 0 : vector<2x8x8xf32>, vector<2x8x8xf32>, vector<2x8x8xf32>, vector<2x8x8xf32> -> vector<8x8x8xf32>
    %33 = vector.extract_strided_slice %19 {offsets = [0, 0, 0], sizes = [2, 8, 8], strides = [1, 1, 1]} : vector<2x8x32xf32> to vector<2x8x8xf32>
    %34 = vector.extract_strided_slice %19 {offsets = [0, 0, 8], sizes = [2, 8, 8], strides = [1, 1, 1]} : vector<2x8x32xf32> to vector<2x8x8xf32>
    %35 = vector.extract_strided_slice %19 {offsets = [0, 0, 16], sizes = [2, 8, 8], strides = [1, 1, 1]} : vector<2x8x32xf32> to vector<2x8x8xf32>
    %36 = vector.extract_strided_slice %19 {offsets = [0, 0, 24], sizes = [2, 8, 8], strides = [1, 1, 1]} : vector<2x8x32xf32> to vector<2x8x8xf32>
    %37 = tpu.concatenate %33, %34, %35, %36 in 0 : vector<2x8x8xf32>, vector<2x8x8xf32>, vector<2x8x8xf32>, vector<2x8x8xf32> -> vector<8x8x8xf32>
    %38 = vector.extract_strided_slice %27 {offsets = [0, 0, 0], sizes = [2, 8, 8], strides = [1, 1, 1]} : vector<2x8x32xf32> to vector<2x8x8xf32>
    %39 = vector.extract_strided_slice %27 {offsets = [0, 0, 8], sizes = [2, 8, 8], strides = [1, 1, 1]} : vector<2x8x32xf32> to vector<2x8x8xf32>
    %40 = vector.extract_strided_slice %27 {offsets = [0, 0, 16], sizes = [2, 8, 8], strides = [1, 1, 1]} : vector<2x8x32xf32> to vector<2x8x8xf32>
    %41 = vector.extract_strided_slice %27 {offsets = [0, 0, 24], sizes = [2, 8, 8], strides = [1, 1, 1]} : vector<2x8x32xf32> to vector<2x8x8xf32>
    %42 = tpu.concatenate %38, %39, %40, %41 in 0 : vector<2x8x8xf32>, vector<2x8x8xf32>, vector<2x8x8xf32>, vector<2x8x8xf32> -> vector<8x8x8xf32>
    "tpu.trace_start"() <{level = 10 : i32, message = "xqd,xkd->xqk"}> : () -> ()
    %cst_27 = arith.constant dense<0.000000e+00> : vector<8x8x8xf32>
    %43 = tpu.matmul %32, %37, %cst_27 {dimension_numbers = #tpu.dot_dimension_numbers<[2], [2], [1], [1], [0, 0, 0, 1, 1, 1], [0], [0]>} : vector<8x8x8xf32>, vector<8x8x8xf32>, vector<8x8x8xf32> -> vector<8x8x8xf32>
    "tpu.trace_stop"() : () -> ()
    %cst_28 = arith.constant 0.353553385 : f32
    %44 = vector.broadcast %cst_28 : f32 to vector<8x8x8xf32>
    %45 = arith.mulf %43, %44 : vector<8x8x8xf32>
    %46 = vector.shape_cast %1 : vector<8x8xf32> to vector<8x1x8xf32>
    %47 = vector.broadcast %46 : vector<8x1x8xf32> to vector<8x8x8xf32>
    %48 = arith.addf %45, %47 : vector<8x8x8xf32>
    %cst_29 = arith.constant dense<0xFF800000> : vector<8x8xf32>
    %49 = vector.multi_reduction <maximumf>, %48, %cst_29 [2] : vector<8x8x8xf32> to vector<8x8xf32>
    %50 = vector.shape_cast %49 : vector<8x8xf32> to vector<8x8x1xf32>
    %51 = vector.broadcast %50 : vector<8x8x1xf32> to vector<8x8x8xf32>
    %52 = arith.subf %48, %51 : vector<8x8x8xf32>
    %53 = math.exp %52 : vector<8x8x8xf32>
    %cst_30 = arith.constant dense<0.000000e+00> : vector<8x8xf32>
    %54 = vector.multi_reduction <add>, %53, %cst_30 [2] : vector<8x8x8xf32> to vector<8x8xf32>
    %55 = vector.shape_cast %54 : vector<8x8xf32> to vector<8x8x1xf32>
    %56 = tpu.reciprocal %55 {approx = true} : vector<8x8x1xf32> -> vector<8x8x1xf32>
    %57 = vector.broadcast %56 : vector<8x8x1xf32> to vector<8x8x8xf32>
    %58 = arith.mulf %53, %57 : vector<8x8x8xf32>
    %59 = vector.broadcast %3 : vector<8x1x1xf32> to vector<8x8x8xf32>
    %60 = arith.mulf %58, %59 : vector<8x8x8xf32>
    %61 = vector.extract_strided_slice %60 {offsets = [0, 0, 0], sizes = [2, 8, 8], strides = [1, 1, 1]} : vector<8x8x8xf32> to vector<2x8x8xf32>
    %62 = vector.extract_strided_slice %60 {offsets = [2, 0, 0], sizes = [2, 8, 8], strides = [1, 1, 1]} : vector<8x8x8xf32> to vector<2x8x8xf32>
    %63 = vector.extract_strided_slice %60 {offsets = [4, 0, 0], sizes = [2, 8, 8], strides = [1, 1, 1]} : vector<8x8x8xf32> to vector<2x8x8xf32>
    %64 = vector.extract_strided_slice %60 {offsets = [6, 0, 0], sizes = [2, 8, 8], strides = [1, 1, 1]} : vector<8x8x8xf32> to vector<2x8x8xf32>
    %65 = vector.shape_cast %61 : vector<2x8x8xf32> to vector<2x1x8x8xf32>
    %66 = vector.shape_cast %62 : vector<2x8x8xf32> to vector<2x1x8x8xf32>
    %67 = vector.shape_cast %63 : vector<2x8x8xf32> to vector<2x1x8x8xf32>
    %68 = vector.shape_cast %64 : vector<2x8x8xf32> to vector<2x1x8x8xf32>
    %69 = tpu.concatenate %65, %66, %67, %68 in 1 : vector<2x1x8x8xf32>, vector<2x1x8x8xf32>, vector<2x1x8x8xf32>, vector<2x1x8x8xf32> -> vector<2x4x8x8xf32>
    %c0_31 = arith.constant 0 : index
    %c0_32 = arith.constant 0 : index
    %c0_33 = arith.constant 0 : index
    %c0_34 = arith.constant 0 : index
    %70 = vector.load %arg26[%c0_31, %c0_32, %c0_33, %c0_34] : memref<2x4x8x8xf32, #tpu.memory_space<vmem>>, vector<2x4x8x8xf32>
    tpu.vector_store %arg26[%c0_31, %c0_32, %c0_33, %c0_34], %69 {strides = array<i32>} : memref<2x4x8x8xf32, #tpu.memory_space<vmem>>, vector<2x4x8x8xf32>,
    "tpu.trace_start"() <{level = 10 : i32, message = "xqk,xkd->xqd"}> : () -> ()
    %cst_35 = arith.constant dense<0.000000e+00> : vector<8x8x8xf32>
    %71 = tpu.matmul %60, %42, %cst_35 {dimension_numbers = #tpu.dot_dimension_numbers<[2], [1], [1], [2], [0, 0, 0, 1, 1, 2], [0], [0]>} : vector<8x8x8xf32>, vector<8x8x8xf32>, vector<8x8x8xf32> -> vector<8x8x8xf32>
    "tpu.trace_stop"() : () -> ()
    %72 = vector.extract_strided_slice %71 {offsets = [0, 0, 0], sizes = [2, 8, 8], strides = [1, 1, 1]} : vector<8x8x8xf32> to vector<2x8x8xf32>
    %73 = vector.extract_strided_slice %71 {offsets = [2, 0, 0], sizes = [2, 8, 8], strides = [1, 1, 1]} : vector<8x8x8xf32> to vector<2x8x8xf32>
    %74 = vector.extract_strided_slice %71 {offsets = [4, 0, 0], sizes = [2, 8, 8], strides = [1, 1, 1]} : vector<8x8x8xf32> to vector<2x8x8xf32>
    %75 = vector.extract_strided_slice %71 {offsets = [6, 0, 0], sizes = [2, 8, 8], strides = [1, 1, 1]} : vector<8x8x8xf32> to vector<2x8x8xf32>
    %76 = tpu.concatenate %72, %73, %74, %75 in 2 : vector<2x8x8xf32>, vector<2x8x8xf32>, vector<2x8x8xf32>, vector<2x8x8xf32> -> vector<2x8x32xf32>
    %77 = vector.shape_cast %76 : vector<2x8x32xf32> to vector<16x32xf32>
    %c0_36 = arith.constant 0 : index
    %c0_37 = arith.constant 0 : index
    %c0_38 = arith.constant 0 : index
    %78 = vector.load %arg9[%c0_36, %c0_37, %c0_38] : memref<2x32x32xf32, #tpu.memory_space<vmem>>, vector<1x32x32xf32>
    %79 = vector.shape_cast %78 : vector<1x32x32xf32> to vector<32x32xf32>
    %cst_39 = arith.constant dense<0.000000e+00> : vector<16x32xf32>
    %80 = tpu.matmul %77, %79, %cst_39 {dimension_numbers = #tpu.dot_dimension_numbers<[1], [0], [0], [1], [0, 0, 1, 1], [], []>} : vector<16x32xf32>, vector<32x32xf32>, vector<16x32xf32> -> vector<16x32xf32>
    %c0_40 = arith.constant 0 : index
    %c0_41 = arith.constant 0 : index
    %c0_42 = arith.constant 0 : index
    %81 = vector.load %arg10[%c0_40, %c0_41, %c0_42] : memref<2x1x32xf32, #tpu.memory_space<vmem>>, vector<1x1x32xf32>
    %82 = vector.shape_cast %81 : vector<1x1x32xf32> to vector<1x32xf32>
    %83 = vector.broadcast %82 : vector<1x32xf32> to vector<16x32xf32>
    %84 = arith.addf %80, %83 : vector<16x32xf32>
    %85 = arith.addf %0, %84 : vector<16x32xf32>
    %c0_43 = arith.constant 0 : index
    %c0_44 = arith.constant 0 : index
    %c0_45 = arith.constant 0 : index
    %86 = vector.load %arg11[%c0_43, %c0_44, %c0_45] : memref<2x1x32xf32, #tpu.memory_space<vmem>>, vector<1x1x32xf32>
    %87 = vector.shape_cast %86 : vector<1x1x32xf32> to vector<1x32xf32>
    %c0_46 = arith.constant 0 : index
    %c0_47 = arith.constant 0 : index
    %c0_48 = arith.constant 0 : index
    %88 = vector.load %arg12[%c0_46, %c0_47, %c0_48] : memref<2x1x32xf32, #tpu.memory_space<vmem>>, vector<1x1x32xf32>
    %89 = vector.shape_cast %88 : vector<1x1x32xf32> to vector<1x32xf32>
    %cst_49 = arith.constant dense<0.000000e+00> : vector<16xf32>
    %90 = vector.multi_reduction <add>, %85, %cst_49 [1] : vector<16x32xf32> to vector<16xf32>
    %91 = vector.shape_cast %90 : vector<16xf32> to vector<16x1xf32>
    %cst_50 = arith.constant 3.200000e+01 : f32
    %92 = vector.broadcast %cst_50 : f32 to vector<16x1xf32>
    %93 = arith.divf %91, %92 : vector<16x1xf32>
    %94 = vector.broadcast %93 : vector<16x1xf32> to vector<16x32xf32>
    %95 = arith.subf %85, %94 : vector<16x32xf32>
    %96 = arith.mulf %95, %95 : vector<16x32xf32>
    %cst_51 = arith.constant dense<0.000000e+00> : vector<16xf32>
    %97 = vector.multi_reduction <add>, %96, %cst_51 [1] : vector<16x32xf32> to vector<16xf32>
    %98 = vector.shape_cast %97 : vector<16xf32> to vector<16x1xf32>
    %cst_52 = arith.constant 3.200000e+01 : f32
    %99 = vector.broadcast %cst_52 : f32 to vector<16x1xf32>
    %100 = arith.divf %98, %99 : vector<16x1xf32>
    %101 = vector.broadcast %93 : vector<16x1xf32> to vector<16x32xf32>
    %102 = arith.subf %85, %101 : vector<16x32xf32>
    %cst_53 = arith.constant 9.99999996E-13 : f32
    %103 = vector.broadcast %cst_53 : f32 to vector<16x1xf32>
    %104 = arith.addf %100, %103 : vector<16x1xf32>
    %105 = math.rsqrt %104 : vector<16x1xf32>
    %106 = vector.broadcast %105 : vector<16x1xf32> to vector<16x32xf32>
    %107 = arith.mulf %102, %106 : vector<16x32xf32>
    %108 = vector.broadcast %87 : vector<1x32xf32> to vector<16x32xf32>
    %109 = arith.mulf %107, %108 : vector<16x32xf32>
    %110 = vector.broadcast %89 : vector<1x32xf32> to vector<16x32xf32>
    %111 = arith.addf %109, %110 : vector<16x32xf32>
    %c0_54 = arith.constant 0 : index
    %c0_55 = arith.constant 0 : index
    %c0_56 = arith.constant 0 : index
    %112 = vector.load %arg13[%c0_54, %c0_55, %c0_56] : memref<2x32x64xf32, #tpu.memory_space<vmem>>, vector<1x32x64xf32>
    %113 = vector.shape_cast %112 : vector<1x32x64xf32> to vector<32x64xf32>
    %cst_57 = arith.constant dense<0.000000e+00> : vector<16x64xf32>
    %114 = tpu.matmul %111, %113, %cst_57 {dimension_numbers = #tpu.dot_dimension_numbers<[1], [0], [0], [1], [0, 0, 1, 1], [], []>} : vector<16x32xf32>, vector<32x64xf32>, vector<16x64xf32> -> vector<16x64xf32>
    %c0_58 = arith.constant 0 : index
    %c0_59 = arith.constant 0 : index
    %c0_60 = arith.constant 0 : index
    %115 = vector.load %arg14[%c0_58, %c0_59, %c0_60] : memref<2x1x64xf32, #tpu.memory_space<vmem>>, vector<1x1x64xf32>
    %116 = vector.shape_cast %115 : vector<1x1x64xf32> to vector<1x64xf32>
    %117 = vector.broadcast %116 : vector<1x64xf32> to vector<16x64xf32>
    %118 = arith.addf %114, %117 : vector<16x64xf32>
    %cst_61 = arith.constant 5.000000e-01 : f32
    %119 = vector.broadcast %cst_61 : f32 to vector<16x64xf32>
    %120 = arith.mulf %119, %118 : vector<16x64xf32>
    %cst_62 = arith.constant 4.471500e-02 : f32
    %121 = vector.broadcast %cst_62 : f32 to vector<16x64xf32>
    %122 = arith.mulf %121, %118 : vector<16x64xf32>
    %123 = arith.mulf %122, %118 : vector<16x64xf32>
    %124 = arith.mulf %123, %118 : vector<16x64xf32>
    %125 = arith.addf %118, %124 : vector<16x64xf32>
    %cst_63 = arith.constant 0.797884583 : f32
    %126 = vector.broadcast %cst_63 : f32 to vector<16x64xf32>
    %127 = arith.mulf %126, %125 : vector<16x64xf32>
    %128 = math.tanh %127 : vector<16x64xf32>
    %cst_64 = arith.constant 1.000000e+00 : f32
    %129 = vector.broadcast %cst_64 : f32 to vector<16x64xf32>
    %130 = arith.addf %129, %128 : vector<16x64xf32>
    %131 = arith.mulf %120, %130 : vector<16x64xf32>
    %c0_65 = arith.constant 0 : index
    %c0_66 = arith.constant 0 : index
    %c0_67 = arith.constant 0 : index
    %132 = vector.load %arg15[%c0_65, %c0_66, %c0_67] : memref<2x64x32xf32, #tpu.memory_space<vmem>>, vector<1x64x32xf32>
    %133 = vector.shape_cast %132 : vector<1x64x32xf32> to vector<64x32xf32>
    %cst_68 = arith.constant dense<0.000000e+00> : vector<16x32xf32>
    %134 = tpu.matmul %131, %133, %cst_68 {dimension_numbers = #tpu.dot_dimension_numbers<[1], [0], [0], [1], [0, 0, 1, 1], [], []>} : vector<16x64xf32>, vector<64x32xf32>, vector<16x32xf32> -> vector<16x32xf32>
    %c0_69 = arith.constant 0 : index
    %c0_70 = arith.constant 0 : index
    %c0_71 = arith.constant 0 : index
    %135 = vector.load %arg16[%c0_69, %c0_70, %c0_71] : memref<2x1x32xf32, #tpu.memory_space<vmem>>, vector<1x1x32xf32>
    %136 = vector.shape_cast %135 : vector<1x1x32xf32> to vector<1x32xf32>
    %137 = vector.broadcast %136 : vector<1x32xf32> to vector<16x32xf32>
    %138 = arith.addf %134, %137 : vector<16x32xf32>
    %139 = arith.addf %111, %138 : vector<16x32xf32>
    %c0_72 = arith.constant 0 : index
    %c0_73 = arith.constant 0 : index
    %c0_74 = arith.constant 0 : index
    %140 = vector.load %arg17[%c0_72, %c0_73, %c0_74] : memref<2x1x32xf32, #tpu.memory_space<vmem>>, vector<1x1x32xf32>
    %141 = vector.shape_cast %140 : vector<1x1x32xf32> to vector<1x32xf32>
    %c0_75 = arith.constant 0 : index
    %c0_76 = arith.constant 0 : index
    %c0_77 = arith.constant 0 : index
    %142 = vector.load %arg18[%c0_75, %c0_76, %c0_77] : memref<2x1x32xf32, #tpu.memory_space<vmem>>, vector<1x1x32xf32>
    %143 = vector.shape_cast %142 : vector<1x1x32xf32> to vector<1x32xf32>
    %cst_78 = arith.constant dense<0.000000e+00> : vector<16xf32>
    %144 = vector.multi_reduction <add>, %139, %cst_78 [1] : vector<16x32xf32> to vector<16xf32>
    %145 = vector.shape_cast %144 : vector<16xf32> to vector<16x1xf32>
    %cst_79 = arith.constant 3.200000e+01 : f32
    %146 = vector.broadcast %cst_79 : f32 to vector<16x1xf32>
    %147 = arith.divf %145, %146 : vector<16x1xf32>
    %148 = vector.broadcast %147 : vector<16x1xf32> to vector<16x32xf32>
    %149 = arith.subf %139, %148 : vector<16x32xf32>
    %150 = arith.mulf %149, %149 : vector<16x32xf32>
    %cst_80 = arith.constant dense<0.000000e+00> : vector<16xf32>
    %151 = vector.multi_reduction <add>, %150, %cst_80 [1] : vector<16x32xf32> to vector<16xf32>
    %152 = vector.shape_cast %151 : vector<16xf32> to vector<16x1xf32>
    %cst_81 = arith.constant 3.200000e+01 : f32
    %153 = vector.broadcast %cst_81 : f32 to vector<16x1xf32>
    %154 = arith.divf %152, %153 : vector<16x1xf32>
    %155 = vector.broadcast %147 : vector<16x1xf32> to vector<16x32xf32>
    %156 = arith.subf %139, %155 : vector<16x32xf32>
    %cst_82 = arith.constant 9.99999996E-13 : f32
    %157 = vector.broadcast %cst_82 : f32 to vector<16x1xf32>
    %158 = arith.addf %154, %157 : vector<16x1xf32>
    %159 = math.rsqrt %158 : vector<16x1xf32>
    %160 = vector.broadcast %159 : vector<16x1xf32> to vector<16x32xf32>
    %161 = arith.mulf %156, %160 : vector<16x32xf32>
    %162 = vector.broadcast %141 : vector<1x32xf32> to vector<16x32xf32>
    %163 = arith.mulf %161, %162 : vector<16x32xf32>
    %164 = vector.broadcast %143 : vector<1x32xf32> to vector<16x32xf32>
    %165 = arith.addf %163, %164 : vector<16x32xf32>
    %c1 = arith.constant 1 : index
    %c0_83 = arith.constant 0 : index
    %c0_84 = arith.constant 0 : index
    %c0_85 = arith.constant 0 : index
    %166 = vector.load %arg2[%c1, %c0_83, %c0_84, %c0_85] : memref<2x8x1x1xf32, #tpu.memory_space<vmem>>, vector<1x8x1x1xf32>
    %167 = vector.shape_cast %166 : vector<1x8x1x1xf32> to vector<8x1x1xf32>
    %c1_86 = arith.constant 1 : index
    %c0_87 = arith.constant 0 : index
    %c0_88 = arith.constant 0 : index
    %168 = vector.load %arg3[%c1_86, %c0_87, %c0_88] : memref<2x32x32xf32, #tpu.memory_space<vmem>>, vector<1x32x32xf32>
    %169 = vector.shape_cast %168 : vector<1x32x32xf32> to vector<32x32xf32>
    %cst_89 = arith.constant dense<0.000000e+00> : vector<16x32xf32>
    %170 = tpu.matmul %165, %169, %cst_89 {dimension_numbers = #tpu.dot_dimension_numbers<[1], [0], [0], [1], [0, 0, 1, 1], [], []>} : vector<16x32xf32>, vector<32x32xf32>, vector<16x32xf32> -> vector<16x32xf32>
    %c1_90 = arith.constant 1 : index
    %c0_91 = arith.constant 0 : index
    %c0_92 = arith.constant 0 : index
    %171 = vector.load %arg4[%c1_90, %c0_91, %c0_92] : memref<2x1x32xf32, #tpu.memory_space<vmem>>, vector<1x1x32xf32>
    %172 = vector.shape_cast %171 : vector<1x1x32xf32> to vector<1x32xf32>
    %173 = vector.broadcast %172 : vector<1x32xf32> to vector<16x32xf32>
    %174 = arith.addf %170, %173 : vector<16x32xf32>
    %175 = vector.shape_cast %174 : vector<16x32xf32> to vector<2x8x32xf32>
    %c1_93 = arith.constant 1 : index
    %c0_94 = arith.constant 0 : index
    %c0_95 = arith.constant 0 : index
    %176 = vector.load %arg5[%c1_93, %c0_94, %c0_95] : memref<2x32x32xf32, #tpu.memory_space<vmem>>, vector<1x32x32xf32>
    %177 = vector.shape_cast %176 : vector<1x32x32xf32> to vector<32x32xf32>
    %cst_96 = arith.constant dense<0.000000e+00> : vector<16x32xf32>
    %178 = tpu.matmul %165, %177, %cst_96 {dimension_numbers = #tpu.dot_dimension_numbers<[1], [0], [0], [1], [0, 0, 1, 1], [], []>} : vector<16x32xf32>, vector<32x32xf32>, vector<16x32xf32> -> vector<16x32xf32>
    %c1_97 = arith.constant 1 : index
    %c0_98 = arith.constant 0 : index
    %c0_99 = arith.constant 0 : index
    %179 = vector.load %arg6[%c1_97, %c0_98, %c0_99] : memref<2x1x32xf32, #tpu.memory_space<vmem>>, vector<1x1x32xf32>
    %180 = vector.shape_cast %179 : vector<1x1x32xf32> to vector<1x32xf32>
    %181 = vector.broadcast %180 : vector<1x32xf32> to vector<16x32xf32>
    %182 = arith.addf %178, %181 : vector<16x32xf32>
    %183 = vector.shape_cast %182 : vector<16x32xf32> to vector<2x8x32xf32>
    %c1_100 = arith.constant 1 : index
    %c0_101 = arith.constant 0 : index
    %c0_102 = arith.constant 0 : index
    %184 = vector.load %arg7[%c1_100, %c0_101, %c0_102] : memref<2x32x32xf32, #tpu.memory_space<vmem>>, vector<1x32x32xf32>
    %185 = vector.shape_cast %184 : vector<1x32x32xf32> to vector<32x32xf32>
    %cst_103 = arith.constant dense<0.000000e+00> : vector<16x32xf32>
    %186 = tpu.matmul %165, %185, %cst_103 {dimension_numbers = #tpu.dot_dimension_numbers<[1], [0], [0], [1], [0, 0, 1, 1], [], []>} : vector<16x32xf32>, vector<32x32xf32>, vector<16x32xf32> -> vector<16x32xf32>
    %c1_104 = arith.constant 1 : index
    %c0_105 = arith.constant 0 : index
    %c0_106 = arith.constant 0 : index
    %187 = vector.load %arg8[%c1_104, %c0_105, %c0_106] : memref<2x1x32xf32, #tpu.memory_space<vmem>>, vector<1x1x32xf32>
    %188 = vector.shape_cast %187 : vector<1x1x32xf32> to vector<1x32xf32>
    %189 = vector.broadcast %188 : vector<1x32xf32> to vector<16x32xf32>
    %190 = arith.addf %186, %189 : vector<16x32xf32>
    %191 = vector.shape_cast %190 : vector<16x32xf32> to vector<2x8x32xf32>
    %192 = vector.extract_strided_slice %175 {offsets = [0, 0, 0], sizes = [2, 8, 8], strides = [1, 1, 1]} : vector<2x8x32xf32> to vector<2x8x8xf32>
    %193 = vector.extract_strided_slice %175 {offsets = [0, 0, 8], sizes = [2, 8, 8], strides = [1, 1, 1]} : vector<2x8x32xf32> to vector<2x8x8xf32>
    %194 = vector.extract_strided_slice %175 {offsets = [0, 0, 16], sizes = [2, 8, 8], strides = [1, 1, 1]} : vector<2x8x32xf32> to vector<2x8x8xf32>
    %195 = vector.extract_strided_slice %175 {offsets = [0, 0, 24], sizes = [2, 8, 8], strides = [1, 1, 1]} : vector<2x8x32xf32> to vector<2x8x8xf32>
    %196 = tpu.concatenate %192, %193, %194, %195 in 0 : vector<2x8x8xf32>, vector<2x8x8xf32>, vector<2x8x8xf32>, vector<2x8x8xf32> -> vector<8x8x8xf32>
    %197 = vector.extract_strided_slice %183 {offsets = [0, 0, 0], sizes = [2, 8, 8], strides = [1, 1, 1]} : vector<2x8x32xf32> to vector<2x8x8xf32>
    %198 = vector.extract_strided_slice %183 {offsets = [0, 0, 8], sizes = [2, 8, 8], strides = [1, 1, 1]} : vector<2x8x32xf32> to vector<2x8x8xf32>
    %199 = vector.extract_strided_slice %183 {offsets = [0, 0, 16], sizes = [2, 8, 8], strides = [1, 1, 1]} : vector<2x8x32xf32> to vector<2x8x8xf32>
    %200 = vector.extract_strided_slice %183 {offsets = [0, 0, 24], sizes = [2, 8, 8], strides = [1, 1, 1]} : vector<2x8x32xf32> to vector<2x8x8xf32>
    %201 = tpu.concatenate %197, %198, %199, %200 in 0 : vector<2x8x8xf32>, vector<2x8x8xf32>, vector<2x8x8xf32>, vector<2x8x8xf32> -> vector<8x8x8xf32>
    %202 = vector.extract_strided_slice %191 {offsets = [0, 0, 0], sizes = [2, 8, 8], strides = [1, 1, 1]} : vector<2x8x32xf32> to vector<2x8x8xf32>
    %203 = vector.extract_strided_slice %191 {offsets = [0, 0, 8], sizes = [2, 8, 8], strides = [1, 1, 1]} : vector<2x8x32xf32> to vector<2x8x8xf32>
    %204 = vector.extract_strided_slice %191 {offsets = [0, 0, 16], sizes = [2, 8, 8], strides = [1, 1, 1]} : vector<2x8x32xf32> to vector<2x8x8xf32>
    %205 = vector.extract_strided_slice %191 {offsets = [0, 0, 24], sizes = [2, 8, 8], strides = [1, 1, 1]} : vector<2x8x32xf32> to vector<2x8x8xf32>
    %206 = tpu.concatenate %202, %203, %204, %205 in 0 : vector<2x8x8xf32>, vector<2x8x8xf32>, vector<2x8x8xf32>, vector<2x8x8xf32> -> vector<8x8x8xf32>
    "tpu.trace_start"() <{level = 10 : i32, message = "xqd,xkd->xqk"}> : () -> ()
    %cst_107 = arith.constant dense<0.000000e+00> : vector<8x8x8xf32>
    %207 = tpu.matmul %196, %201, %cst_107 {dimension_numbers = #tpu.dot_dimension_numbers<[2], [2], [1], [1], [0, 0, 0, 1, 1, 1], [0], [0]>} : vector<8x8x8xf32>, vector<8x8x8xf32>, vector<8x8x8xf32> -> vector<8x8x8xf32>
    "tpu.trace_stop"() : () -> ()
    %cst_108 = arith.constant 0.353553385 : f32
    %208 = vector.broadcast %cst_108 : f32 to vector<8x8x8xf32>
    %209 = arith.mulf %207, %208 : vector<8x8x8xf32>
    %210 = vector.shape_cast %1 : vector<8x8xf32> to vector<8x1x8xf32>
    %211 = vector.broadcast %210 : vector<8x1x8xf32> to vector<8x8x8xf32>
    %212 = arith.addf %209, %211 : vector<8x8x8xf32>
    %cst_109 = arith.constant dense<0xFF800000> : vector<8x8xf32>
    %213 = vector.multi_reduction <maximumf>, %212, %cst_109 [2] : vector<8x8x8xf32> to vector<8x8xf32>
    %214 = vector.shape_cast %213 : vector<8x8xf32> to vector<8x8x1xf32>
    %215 = vector.broadcast %214 : vector<8x8x1xf32> to vector<8x8x8xf32>
    %216 = arith.subf %212, %215 : vector<8x8x8xf32>
    %217 = math.exp %216 : vector<8x8x8xf32>
    %cst_110 = arith.constant dense<0.000000e+00> : vector<8x8xf32>
    %218 = vector.multi_reduction <add>, %217, %cst_110 [2] : vector<8x8x8xf32> to vector<8x8xf32>
    %219 = vector.shape_cast %218 : vector<8x8xf32> to vector<8x8x1xf32>
    %220 = tpu.reciprocal %219 {approx = true} : vector<8x8x1xf32> -> vector<8x8x1xf32>
    %221 = vector.broadcast %220 : vector<8x8x1xf32> to vector<8x8x8xf32>
    %222 = arith.mulf %217, %221 : vector<8x8x8xf32>
    %223 = vector.broadcast %167 : vector<8x1x1xf32> to vector<8x8x8xf32>
    %224 = arith.mulf %222, %223 : vector<8x8x8xf32>
    %225 = vector.extract_strided_slice %224 {offsets = [0, 0, 0], sizes = [2, 8, 8], strides = [1, 1, 1]} : vector<8x8x8xf32> to vector<2x8x8xf32>
    %226 = vector.extract_strided_slice %224 {offsets = [2, 0, 0], sizes = [2, 8, 8], strides = [1, 1, 1]} : vector<8x8x8xf32> to vector<2x8x8xf32>
    %227 = vector.extract_strided_slice %224 {offsets = [4, 0, 0], sizes = [2, 8, 8], strides = [1, 1, 1]} : vector<8x8x8xf32> to vector<2x8x8xf32>
    %228 = vector.extract_strided_slice %224 {offsets = [6, 0, 0], sizes = [2, 8, 8], strides = [1, 1, 1]} : vector<8x8x8xf32> to vector<2x8x8xf32>
    %229 = vector.shape_cast %225 : vector<2x8x8xf32> to vector<2x1x8x8xf32>
    %230 = vector.shape_cast %226 : vector<2x8x8xf32> to vector<2x1x8x8xf32>
    %231 = vector.shape_cast %227 : vector<2x8x8xf32> to vector<2x1x8x8xf32>
    %232 = vector.shape_cast %228 : vector<2x8x8xf32> to vector<2x1x8x8xf32>
    %233 = tpu.concatenate %229, %230, %231, %232 in 1 : vector<2x1x8x8xf32>, vector<2x1x8x8xf32>, vector<2x1x8x8xf32>, vector<2x1x8x8xf32> -> vector<2x4x8x8xf32>
    %c0_111 = arith.constant 0 : index
    %c0_112 = arith.constant 0 : index
    %c0_113 = arith.constant 0 : index
    %c0_114 = arith.constant 0 : index
    %234 = vector.load %arg27[%c0_111, %c0_112, %c0_113, %c0_114] : memref<2x4x8x8xf32, #tpu.memory_space<vmem>>, vector<2x4x8x8xf32>
    tpu.vector_store %arg27[%c0_111, %c0_112, %c0_113, %c0_114], %233 {strides = array<i32>} : memref<2x4x8x8xf32, #tpu.memory_space<vmem>>, vector<2x4x8x8xf32>,
    "tpu.trace_start"() <{level = 10 : i32, message = "xqk,xkd->xqd"}> : () -> ()
    %cst_115 = arith.constant dense<0.000000e+00> : vector<8x8x8xf32>
    %235 = tpu.matmul %224, %206, %cst_115 {dimension_numbers = #tpu.dot_dimension_numbers<[2], [1], [1], [2], [0, 0, 0, 1, 1, 2], [0], [0]>} : vector<8x8x8xf32>, vector<8x8x8xf32>, vector<8x8x8xf32> -> vector<8x8x8xf32>
    "tpu.trace_stop"() : () -> ()
    %236 = vector.extract_strided_slice %235 {offsets = [0, 0, 0], sizes = [2, 8, 8], strides = [1, 1, 1]} : vector<8x8x8xf32> to vector<2x8x8xf32>
    %237 = vector.extract_strided_slice %235 {offsets = [2, 0, 0], sizes = [2, 8, 8], strides = [1, 1, 1]} : vector<8x8x8xf32> to vector<2x8x8xf32>
    %238 = vector.extract_strided_slice %235 {offsets = [4, 0, 0], sizes = [2, 8, 8], strides = [1, 1, 1]} : vector<8x8x8xf32> to vector<2x8x8xf32>
    %239 = vector.extract_strided_slice %235 {offsets = [6, 0, 0], sizes = [2, 8, 8], strides = [1, 1, 1]} : vector<8x8x8xf32> to vector<2x8x8xf32>
    %240 = tpu.concatenate %236, %237, %238, %239 in 2 : vector<2x8x8xf32>, vector<2x8x8xf32>, vector<2x8x8xf32>, vector<2x8x8xf32> -> vector<2x8x32xf32>
    %241 = vector.shape_cast %240 : vector<2x8x32xf32> to vector<16x32xf32>
    %c1_116 = arith.constant 1 : index
    %c0_117 = arith.constant 0 : index
    %c0_118 = arith.constant 0 : index
    %242 = vector.load %arg9[%c1_116, %c0_117, %c0_118] : memref<2x32x32xf32, #tpu.memory_space<vmem>>, vector<1x32x32xf32>
    %243 = vector.shape_cast %242 : vector<1x32x32xf32> to vector<32x32xf32>
    %cst_119 = arith.constant dense<0.000000e+00> : vector<16x32xf32>
    %244 = tpu.matmul %241, %243, %cst_119 {dimension_numbers = #tpu.dot_dimension_numbers<[1], [0], [0], [1], [0, 0, 1, 1], [], []>} : vector<16x32xf32>, vector<32x32xf32>, vector<16x32xf32> -> vector<16x32xf32>
    %c1_120 = arith.constant 1 : index
    %c0_121 = arith.constant 0 : index
    %c0_122 = arith.constant 0 : index
    %245 = vector.load %arg10[%c1_120, %c0_121, %c0_122] : memref<2x1x32xf32, #tpu.memory_space<vmem>>, vector<1x1x32xf32>
    %246 = vector.shape_cast %245 : vector<1x1x32xf32> to vector<1x32xf32>
    %247 = vector.broadcast %246 : vector<1x32xf32> to vector<16x32xf32>
    %248 = arith.addf %244, %247 : vector<16x32xf32>
    %249 = arith.addf %165, %248 : vector<16x32xf32>
    %c1_123 = arith.constant 1 : index
    %c0_124 = arith.constant 0 : index
    %c0_125 = arith.constant 0 : index
    %250 = vector.load %arg11[%c1_123, %c0_124, %c0_125] : memref<2x1x32xf32, #tpu.memory_space<vmem>>, vector<1x1x32xf32>
    %251 = vector.shape_cast %250 : vector<1x1x32xf32> to vector<1x32xf32>
    %c1_126 = arith.constant 1 : index
    %c0_127 = arith.constant 0 : index
    %c0_128 = arith.constant 0 : index
    %252 = vector.load %arg12[%c1_126, %c0_127, %c0_128] : memref<2x1x32xf32, #tpu.memory_space<vmem>>, vector<1x1x32xf32>
    %253 = vector.shape_cast %252 : vector<1x1x32xf32> to vector<1x32xf32>
    %cst_129 = arith.constant dense<0.000000e+00> : vector<16xf32>
    %254 = vector.multi_reduction <add>, %249, %cst_129 [1] : vector<16x32xf32> to vector<16xf32>
    %255 = vector.shape_cast %254 : vector<16xf32> to vector<16x1xf32>
    %cst_130 = arith.constant 3.200000e+01 : f32
    %256 = vector.broadcast %cst_130 : f32 to vector<16x1xf32>
    %257 = arith.divf %255, %256 : vector<16x1xf32>
    %258 = vector.broadcast %257 : vector<16x1xf32> to vector<16x32xf32>
    %259 = arith.subf %249, %258 : vector<16x32xf32>
    %260 = arith.mulf %259, %259 : vector<16x32xf32>
    %cst_131 = arith.constant dense<0.000000e+00> : vector<16xf32>
    %261 = vector.multi_reduction <add>, %260, %cst_131 [1] : vector<16x32xf32> to vector<16xf32>
    %262 = vector.shape_cast %261 : vector<16xf32> to vector<16x1xf32>
    %cst_132 = arith.constant 3.200000e+01 : f32
    %263 = vector.broadcast %cst_132 : f32 to vector<16x1xf32>
    %264 = arith.divf %262, %263 : vector<16x1xf32>
    %265 = vector.broadcast %257 : vector<16x1xf32> to vector<16x32xf32>
    %266 = arith.subf %249, %265 : vector<16x32xf32>
    %cst_133 = arith.constant 9.99999996E-13 : f32
    %267 = vector.broadcast %cst_133 : f32 to vector<16x1xf32>
    %268 = arith.addf %264, %267 : vector<16x1xf32>
    %269 = math.rsqrt %268 : vector<16x1xf32>
    %270 = vector.broadcast %269 : vector<16x1xf32> to vector<16x32xf32>
    %271 = arith.mulf %266, %270 : vector<16x32xf32>
    %272 = vector.broadcast %251 : vector<1x32xf32> to vector<16x32xf32>
    %273 = arith.mulf %271, %272 : vector<16x32xf32>
    %274 = vector.broadcast %253 : vector<1x32xf32> to vector<16x32xf32>
    %275 = arith.addf %273, %274 : vector<16x32xf32>
    %c1_134 = arith.constant 1 : index
    %c0_135 = arith.constant 0 : index
    %c0_136 = arith.constant 0 : index
    %276 = vector.load %arg13[%c1_134, %c0_135, %c0_136] : memref<2x32x64xf32, #tpu.memory_space<vmem>>, vector<1x32x64xf32>
    %277 = vector.shape_cast %276 : vector<1x32x64xf32> to vector<32x64xf32>
    %cst_137 = arith.constant dense<0.000000e+00> : vector<16x64xf32>
    %278 = tpu.matmul %275, %277, %cst_137 {dimension_numbers = #tpu.dot_dimension_numbers<[1], [0], [0], [1], [0, 0, 1, 1], [], []>} : vector<16x32xf32>, vector<32x64xf32>, vector<16x64xf32> -> vector<16x64xf32>
    %c1_138 = arith.constant 1 : index
    %c0_139 = arith.constant 0 : index
    %c0_140 = arith.constant 0 : index
    %279 = vector.load %arg14[%c1_138, %c0_139, %c0_140] : memref<2x1x64xf32, #tpu.memory_space<vmem>>, vector<1x1x64xf32>
    %280 = vector.shape_cast %279 : vector<1x1x64xf32> to vector<1x64xf32>
    %281 = vector.broadcast %280 : vector<1x64xf32> to vector<16x64xf32>
    %282 = arith.addf %278, %281 : vector<16x64xf32>
    %cst_141 = arith.constant 5.000000e-01 : f32
    %283 = vector.broadcast %cst_141 : f32 to vector<16x64xf32>
    %284 = arith.mulf %283, %282 : vector<16x64xf32>
    %cst_142 = arith.constant 4.471500e-02 : f32
    %285 = vector.broadcast %cst_142 : f32 to vector<16x64xf32>
    %286 = arith.mulf %285, %282 : vector<16x64xf32>
    %287 = arith.mulf %286, %282 : vector<16x64xf32>
    %288 = arith.mulf %287, %282 : vector<16x64xf32>
    %289 = arith.addf %282, %288 : vector<16x64xf32>
    %cst_143 = arith.constant 0.797884583 : f32
    %290 = vector.broadcast %cst_143 : f32 to vector<16x64xf32>
    %291 = arith.mulf %290, %289 : vector<16x64xf32>
    %292 = math.tanh %291 : vector<16x64xf32>
    %cst_144 = arith.constant 1.000000e+00 : f32
    %293 = vector.broadcast %cst_144 : f32 to vector<16x64xf32>
    %294 = arith.addf %293, %292 : vector<16x64xf32>
    %295 = arith.mulf %284, %294 : vector<16x64xf32>
    %c1_145 = arith.constant 1 : index
    %c0_146 = arith.constant 0 : index
    %c0_147 = arith.constant 0 : index
    %296 = vector.load %arg15[%c1_145, %c0_146, %c0_147] : memref<2x64x32xf32, #tpu.memory_space<vmem>>, vector<1x64x32xf32>
    %297 = vector.shape_cast %296 : vector<1x64x32xf32> to vector<64x32xf32>
    %cst_148 = arith.constant dense<0.000000e+00> : vector<16x32xf32>
    %298 = tpu.matmul %295, %297, %cst_148 {dimension_numbers = #tpu.dot_dimension_numbers<[1], [0], [0], [1], [0, 0, 1, 1], [], []>} : vector<16x64xf32>, vector<64x32xf32>, vector<16x32xf32> -> vector<16x32xf32>
    %c1_149 = arith.constant 1 : index
    %c0_150 = arith.constant 0 : index
    %c0_151 = arith.constant 0 : index
    %299 = vector.load %arg16[%c1_149, %c0_150, %c0_151] : memref<2x1x32xf32, #tpu.memory_space<vmem>>, vector<1x1x32xf32>
    %300 = vector.shape_cast %299 : vector<1x1x32xf32> to vector<1x32xf32>
    %301 = vector.broadcast %300 : vector<1x32xf32> to vector<16x32xf32>
    %302 = arith.addf %298, %301 : vector<16x32xf32>
    %303 = arith.addf %275, %302 : vector<16x32xf32>
    %c1_152 = arith.constant 1 : index
    %c0_153 = arith.constant 0 : index
    %c0_154 = arith.constant 0 : index
    %304 = vector.load %arg17[%c1_152, %c0_153, %c0_154] : memref<2x1x32xf32, #tpu.memory_space<vmem>>, vector<1x1x32xf32>
    %305 = vector.shape_cast %304 : vector<1x1x32xf32> to vector<1x32xf32>
    %c1_155 = arith.constant 1 : index
    %c0_156 = arith.constant 0 : index
    %c0_157 = arith.constant 0 : index
    %306 = vector.load %arg18[%c1_155, %c0_156, %c0_157] : memref<2x1x32xf32, #tpu.memory_space<vmem>>, vector<1x1x32xf32>
    %307 = vector.shape_cast %306 : vector<1x1x32xf32> to vector<1x32xf32>
    %cst_158 = arith.constant dense<0.000000e+00> : vector<16xf32>
    %308 = vector.multi_reduction <add>, %303, %cst_158 [1] : vector<16x32xf32> to vector<16xf32>
    %309 = vector.shape_cast %308 : vector<16xf32> to vector<16x1xf32>
    %cst_159 = arith.constant 3.200000e+01 : f32
    %310 = vector.broadcast %cst_159 : f32 to vector<16x1xf32>
    %311 = arith.divf %309, %310 : vector<16x1xf32>
    %312 = vector.broadcast %311 : vector<16x1xf32> to vector<16x32xf32>
    %313 = arith.subf %303, %312 : vector<16x32xf32>
    %314 = arith.mulf %313, %313 : vector<16x32xf32>
    %cst_160 = arith.constant dense<0.000000e+00> : vector<16xf32>
    %315 = vector.multi_reduction <add>, %314, %cst_160 [1] : vector<16x32xf32> to vector<16xf32>
    %316 = vector.shape_cast %315 : vector<16xf32> to vector<16x1xf32>
    %cst_161 = arith.constant 3.200000e+01 : f32
    %317 = vector.broadcast %cst_161 : f32 to vector<16x1xf32>
    %318 = arith.divf %316, %317 : vector<16x1xf32>
    %319 = vector.broadcast %311 : vector<16x1xf32> to vector<16x32xf32>
    %320 = arith.subf %303, %319 : vector<16x32xf32>
    %cst_162 = arith.constant 9.99999996E-13 : f32
    %321 = vector.broadcast %cst_162 : f32 to vector<16x1xf32>
    %322 = arith.addf %318, %321 : vector<16x1xf32>
    %323 = math.rsqrt %322 : vector<16x1xf32>
    %324 = vector.broadcast %323 : vector<16x1xf32> to vector<16x32xf32>
    %325 = arith.mulf %320, %324 : vector<16x32xf32>
    %326 = vector.broadcast %305 : vector<1x32xf32> to vector<16x32xf32>
    %327 = arith.mulf %325, %326 : vector<16x32xf32>
    %328 = vector.broadcast %307 : vector<1x32xf32> to vector<16x32xf32>
    %329 = arith.addf %327, %328 : vector<16x32xf32>
    %330 = vector.shape_cast %329 : vector<16x32xf32> to vector<2x8x32xf32>
    %c0_163 = arith.constant 0 : index
    %c0_164 = arith.constant 0 : index
    %c0_165 = arith.constant 0 : index
    %331 = vector.load %arg23[%c0_163, %c0_164, %c0_165] : memref<2x8x32xf32, #tpu.memory_space<vmem>>, vector<2x8x32xf32>
    tpu.vector_store %arg23[%c0_163, %c0_164, %c0_165], %330 {strides = array<i32>} : memref<2x8x32xf32, #tpu.memory_space<vmem>>, vector<2x8x32xf32>,
    %c0_166 = arith.constant 0 : index
    %c0_167 = arith.constant 0 : index
    %c0_168 = arith.constant 0 : index
    %332 = vector.load %arg23[%c0_166, %c0_167, %c0_168] : memref<2x8x32xf32, #tpu.memory_space<vmem>>, vector<2x1x32xf32>
    %333 = vector.shape_cast %332 : vector<2x1x32xf32> to vector<2x32xf32>
    %c0_169 = arith.constant 0 : index
    %c0_170 = arith.constant 0 : index
    %334 = vector.load %arg19[%c0_169, %c0_170] : memref<32x32xf32, #tpu.memory_space<vmem>>, vector<32x32xf32>
    %cst_171 = arith.constant dense<0.000000e+00> : vector<2x32xf32>
    %335 = tpu.matmul %333, %334, %cst_171 {dimension_numbers = #tpu.dot_dimension_numbers<[1], [0], [0], [1], [0, 0, 1, 1], [], []>} : vector<2x32xf32>, vector<32x32xf32>, vector<2x32xf32> -> vector<2x32xf32>
    %c0_172 = arith.constant 0 : index
    %c0_173 = arith.constant 0 : index
    %336 = vector.load %arg20[%c0_172, %c0_173] : memref<1x32xf32, #tpu.memory_space<vmem>>, vector<1x32xf32>
    %337 = vector.broadcast %336 : vector<1x32xf32> to vector<2x32xf32>
    %338 = arith.addf %335, %337 : vector<2x32xf32>
    %339 = math.tanh %338 : vector<2x32xf32>
    %c0_174 = arith.constant 0 : index
    %c0_175 = arith.constant 0 : index
    %340 = vector.load %arg24[%c0_174, %c0_175] : memref<2x32xf32, #tpu.memory_space<vmem>>, vector<2x32xf32>
    tpu.vector_store %arg24[%c0_174, %c0_175], %339 {strides = array<i32>} : memref<2x32xf32, #tpu.memory_space<vmem>>, vector<2x32xf32>,
    %c0_176 = arith.constant 0 : index
    %c0_177 = arith.constant 0 : index
    %341 = vector.load %arg21[%c0_176, %c0_177] : memref<32x3xf32, #tpu.memory_space<vmem>>, vector<32x3xf32>
    %cst_178 = arith.constant dense<0.000000e+00> : vector<2x3xf32>
    %342 = tpu.matmul %339, %341, %cst_178 {dimension_numbers = #tpu.dot_dimension_numbers<[1], [0], [0], [1], [0, 0, 1, 1], [], []>} : vector<2x32xf32>, vector<32x3xf32>, vector<2x3xf32> -> vector<2x3xf32>
    %c0_179 = arith.constant 0 : index
    %c0_180 = arith.constant 0 : index
    %343 = vector.load %arg22[%c0_179, %c0_180] : memref<1x3xf32, #tpu.memory_space<vmem>>, vector<1x3xf32>
    %344 = vector.broadcast %343 : vector<1x3xf32> to vector<2x3xf32>
    %345 = arith.addf %342, %344 : vector<2x3xf32>
    %c0_181 = arith.constant 0 : index
    %c0_182 = arith.constant 0 : index
    %346 = vector.load %arg25[%c0_181, %c0_182] : memref<2x3xf32, #tpu.memory_space<vmem>>, vector<2x3xf32>
    tpu.vector_store %arg25[%c0_181, %c0_182], %345 {strides = array<i32>} : memref<2x3xf32, #tpu.memory_space<vmem>>, vector<2x3xf32>,
    return
  }
}

</mosaic_0001>

<bundles_post_ra>
// kernel: tpu_custom_call.1
= control target key start
LH: loop header
LB: loop body
LE: loop exit
PB: predicated region body
PF: predicated region fallthrough
CT: control target
= control target key end

     0   :  { %s7115_s0 = inlined_call_operand.hbm [shape: f32[16,32], index: 0, kind: input, shape index: {}]   ;;  %s7116_s1 = inlined_call_operand.vmem [shape: f32[8,8], index: 1, kind: input, shape index: {}]   ;;  %s7117_s2 = inlined_call_operand.vmem [shape: f32[2,8,1,1], index: 2, kind: input, shape index: {}]   ;;  %s7118_s3 = inlined_call_operand.vmem [shape: f32[2,32,32], index: 3, kind: input, shape index: {}]   ;;  %s7119_s4 = inlined_call_operand.vmem [shape: f32[2,1,32], index: 4, kind: input, shape index: {}]   ;;  %s7120_s5 = inlined_call_operand.vmem [shape: f32[2,32,32], index: 5, kind: input, shape index: {}]   ;;  %s7121_s6 = inlined_call_operand.hbm [shape: f32[2,1,32], index: 6, kind: input, shape index: {}]   ;;  %s7122_s7 = inlined_call_operand.vmem [shape: f32[2,32,32], index: 7, kind: input, shape index: {}]   ;;  %s7123_s8 = inlined_call_operand.hbm [shape: f32[2,1,32], index: 8, kind: input, shape index: {}]   ;;  %s7124_s9 = inlined_call_operand.hbm [shape: f32[2,32,32], index: 9, kind: input, shape index: {}]   ;;  %s7125_s10 = inlined_call_operand.hbm [shape: f32[2,1,32], index: 10, kind: input, shape index: {}]   ;;  %s7126_s11 = inlined_call_operand.hbm [shape: f32[2,1,32], index: 11, kind: input, shape index: {}]   ;;  %s7127_s12 = inlined_call_operand.hbm [shape: f32[2,1,32], index: 12, kind: input, shape index: {}]   ;;  %s7128_s13 = inlined_call_operand.hbm [shape: f32[2,32,64], index: 13, kind: input, shape index: {}]   ;;  %s7129_s14 = inlined_call_operand.hbm [shape: f32[2,1,64], index: 14, kind: input, shape index: {}]   ;;  %s7130_s15 = inlined_call_operand.vmem [shape: f32[2,64,32], index: 15, kind: input, shape index: {}]   ;;  %s7131_s16 = inlined_call_operand.vmem [shape: f32[2,1,32], index: 16, kind: input, shape index: {}]   ;;  %s7132_s17 = inlined_call_operand.vmem [shape: f32[2,1,32], index: 17, kind: input, shape index: {}]   ;;  %s7133_s18 = inlined_call_operand.vmem [shape: f32[2,1,32], index: 18, kind: input, shape index: {}]   ;;  %s7134_s19 = inlined_call_operand.vmem [shape: f32[32,32], index: 19, kind: input, shape index: {}]   ;;  %s7135_s20 = inlined_call_operand.vmem [shape: f32[1,32], index: 20, kind: input, shape index: {}]   ;;  %s7136_s21 = inlined_call_operand.vmem [shape: f32[32,3], index: 21, kind: input, shape index: {}]   ;;  %s7137_s22 = inlined_call_operand.vmem [shape: f32[1,3], index: 22, kind: input, shape index: {}]   ;;  %s7138_s23 = inlined_call_operand.hbm [shape: f32[2,8,32], index: 23, kind: output, shape index: {0}]   ;;  %s7139_s24 = inlined_call_operand.hbm [shape: f32[2,32], index: 24, kind: output, shape index: {1}]   ;;  %s7140_s25 = inlined_call_operand.hbm [shape: f32[2,3], index: 25, kind: output, shape index: {2}]   ;;  %s7141_s26 = inlined_call_operand.hbm [shape: f32[2,4,8,8], index: 26, kind: output, shape index: {3}]   ;;  %s7142_s27 = inlined_call_operand.hbm [shape: f32[2,4,8,8], index: 27, kind: output, shape index: {4}]  }
   0x1   :  { %7162 = sst [smem:[#allocation32_spill]] %s7115_s0 }
   0x2   :  { %7163 = sst [smem:[#allocation33_spill]] %s7116_s1 }
   0x3   :  { %7164 = sst [smem:[#allocation34_spill]] %s7117_s2 }
   0x4   :  { %7165 = sst [smem:[#allocation35_spill]] %s7118_s3 }
   0x5   :  { %7166 = sst [smem:[#allocation36_spill]] %s7119_s4 }
   0x6   :  { %7167 = sst [smem:[#allocation37_spill]] %s7120_s5 }
   0x7   :  { %7168 = sst [smem:[#allocation38_spill]] %s7121_s6 }
   0x8   :  { %7169 = sst [smem:[#allocation39_spill]] %s7122_s7 }
   0x9   :  { %7170 = sst [smem:[#allocation40_spill]] %s7123_s8 }
   0xa   :  { %7171 = sst [smem:[#allocation41_spill]] %s7124_s9 }
   0xb   :  { %7172 = sst [smem:[#allocation42_spill]] %s7125_s10 }
   0xc   :  { %7173 = sst [smem:[#allocation43_spill]] %s7126_s11 }
   0xd   :  { %7174 = sst [smem:[#allocation44_spill]] %s7137_s22 }
   0xe   :  { %7175 = sst [smem:[#allocation45_spill]] %s7140_s25 }
   0xf   :  { %7176 = sst [smem:[#allocation46_spill]] %s7142_s27 }
  0x10   :  { %33 = vsyncpa [#allocation3], 0 }
  0x11   :  { %34 = vsyncpa [#allocation6], 0 }
  0x12   :  { %35 = vsyncpa [#allocation9], 0 }
  0x13   :  { %36 = vsyncpa [#allocation12], 0 }
  0x14   :  { %37 = vsyncpa [#allocation15], 0 }
  0x15   :  { %38 = vsyncpa [#allocation4], 0 }
  0x16   :  { %39 = vsyncpa [#allocation19], 0 }
  0x17   :  { %40 = vsyncpa [#allocation22], 0  ;;  %s5992_s7 = smov [#allocation5]   ;;  %s7177_s9 = sld [smem:[#allocation38_spill]] }
  0x18   :  { %s68_s4 = sshll.u32 %s5992_s7, 4  ;;  %s69_s4 = int_to_ptr.vmem [resolvable:$true] %s68_s4 }
  0x1d   :  { %s5668_s5 = scalar_lea.hbm %s7177_s9, 32 }
  0x1e   :  { %p5669_p0 = scmp.ne.s32.totalorder %s7177_s9, %s5668_s5  ;;  %p5672_p1 = scmp.lt.u32.totalorder %s5668_s5, %s7177_s9 }
  0x20   :  { %p5674_p2 = pnand %p5672_p1, %p5669_p0 }
  0x22   :  { %5677 = shalt.err (!%p5674_p2)
}
  0x23   :  { %s5678_s1 = scalar_lea.vmem %s69_s4, 32  ;;  %p5683_p4 = scmp.lt.s32.totalorder %s69_s4, %s69_s4 }
  0x24   :  { %p5679_p3 = scmp.ne.s32.totalorder %s69_s4, %s5678_s1  ;;  %p5684_p5 = scmp.lt.s32.totalorder %s5678_s1, %s5678_s1 }
  0x26   :  { %p5685_p6 = por %p5684_p5, %p5683_p4 }
  0x28   :  { %p5686_p7 = pnand %p5685_p6, %p5679_p3 }
  0x2a   :  { %5689 = shalt.err (!%p5686_p7)
}
  0x2b   :  { %s7158_s6 = smov 16   ;;  %s5994_s11 = smov 1  }
  0x2c   :  { %74 = dma.hbm_to_vmem [thread:$0]  %s7177_s9, 32, %s69_s4, [#allocation6], %s7158_s6, %s7158_s6, %s5994_s11  }
  0x2d   :  { %s5995_s7 = smov [#allocation8]   ;;  %s5996_s30 = smov [#allocation11]  }
  0x2e   :  { %s94_s8 = sshll.u32 %s5995_s7, 4  ;;  %s118_s5 = sshll.u32 %s5996_s30, 4  ;;  %s95_s8 = int_to_ptr.vmem [resolvable:$true] %s94_s8  ;;  %s119_s5 = int_to_ptr.vmem [resolvable:$true] %s118_s5 }
  0x2f   :  { %s7178_s10 = sld [smem:[#allocation41_spill]] }
  0x35   :  { %s5690_s29 = scalar_lea.hbm %s7178_s10, 1024 }
  0x36   :  { %p5691_p8 = scmp.ne.s32.totalorder %s7178_s10, %s5690_s29  ;;  %p5694_p9 = scmp.lt.u32.totalorder %s5690_s29, %s7178_s10 }
  0x38   :  { %p5696_p10 = pnand %p5694_p9, %p5691_p8 }
  0x3a   :  { %5699 = shalt.err (!%p5696_p10)
}
  0x3b   :  { %s5700_s4 = scalar_lea.vmem %s95_s8, 1024  ;;  %p5705_p12 = scmp.lt.s32.totalorder %s95_s8, %s95_s8 }
  0x3c   :  { %p5701_p11 = scmp.ne.s32.totalorder %s95_s8, %s5700_s4  ;;  %p5706_p13 = scmp.lt.s32.totalorder %s5700_s4, %s5700_s4 }
  0x3e   :  { %p5707_p0 = por %p5706_p13, %p5705_p12 }
  0x40   :  { %p5708_p1 = pnand %p5707_p0, %p5701_p11 }
  0x42   :  { %5711 = shalt.err (!%p5708_p1)
}
  0x43   :  { %s7156_s9 = smov 128   ;;  %s5998_s2 = smov 8  }
  0x44   :  { %100 = dma.hbm_to_vmem [thread:$0]  %s7178_s10, 1024, %s95_s8, [#allocation9], %s7156_s9, %s7156_s9, %s5998_s2  }
  0x45   :  { %s7179_s7 = sld [smem:[#allocation43_spill]] }
  0x4b   :  { %s5712_s30 = scalar_lea.hbm %s7179_s7, 32 }
  0x4c   :  { %p5713_p2 = scmp.ne.s32.totalorder %s7179_s7, %s5712_s30  ;;  %p5716_p3 = scmp.lt.u32.totalorder %s5712_s30, %s7179_s7 }
  0x4e   :  { %p5718_p4 = pnand %p5716_p3, %p5713_p2 }
  0x50   :  { %5721 = shalt.err (!%p5718_p4)
}
  0x51   :  { %s5722_s4 = scalar_lea.vmem %s119_s5, 32  ;;  %p5727_p6 = scmp.lt.s32.totalorder %s119_s5, %s119_s5 }
  0x52   :  { %p5723_p5 = scmp.ne.s32.totalorder %s119_s5, %s5722_s4  ;;  %p5728_p7 = scmp.lt.s32.totalorder %s5722_s4, %s5722_s4 }
  0x54   :  { %p5729_p8 = por %p5728_p7, %p5727_p6 }
  0x56   :  { %p5730_p9 = pnand %p5729_p8, %p5723_p5 }
  0x58   :  { %5733 = shalt.err (!%p5730_p9)
}
  0x59   :  { %124 = dma.hbm_to_vmem [thread:$0]  %s7179_s7, 32, %s119_s5, [#allocation12], %s7158_s6, %s7158_s6, %s5994_s11  }
  0x5a   :  { %s5999_s25 = smov [#allocation14]   ;;  %s6000_s22 = smov [#allocation2]  }
  0x5b   :  { %s142_s3 = sshll.u32 %s5999_s25, 4  ;;  %s46_s27 = sshll.u32 %s6000_s22, 4  ;;  %s143_s3 = int_to_ptr.vmem [resolvable:$true] %s142_s3  ;;  %s47_s27 = int_to_ptr.vmem [resolvable:$true] %s46_s27 }
  0x5c   :  { %s5734_s0 = scalar_lea.hbm %s7128_s13, 1024 }
  0x5d   :  { %p5735_p10 = scmp.ne.s32.totalorder %s7128_s13, %s5734_s0  ;;  %p5738_p11 = scmp.lt.u32.totalorder %s5734_s0, %s7128_s13 }
  0x5f   :  { %p5740_p12 = pnand %p5738_p11, %p5735_p10 }
  0x61   :  { %5743 = shalt.err (!%p5740_p12)
}
  0x62   :  { %s5744_s5 = scalar_lea.vmem %s143_s3, 1024  ;;  %p5749_p0 = scmp.lt.s32.totalorder %s143_s3, %s143_s3 }
  0x63   :  { %p5745_p13 = scmp.ne.s32.totalorder %s143_s3, %s5744_s5  ;;  %p5750_p1 = scmp.lt.s32.totalorder %s5744_s5, %s5744_s5 }
  0x65   :  { %p5751_p2 = por %p5750_p1, %p5749_p0 }
  0x67   :  { %p5752_p3 = pnand %p5751_p2, %p5745_p13 }
  0x69   :  { %5755 = shalt.err (!%p5752_p3)
}
  0x6a   :  { %s7180_s7 = smov 128   ;;  %s7181_s22 = sld [smem:[#allocation32_spill]] }
  0x6b   :  { %148 = dma.hbm_to_vmem [thread:$0]  %s7128_s13, 1024, %s143_s3, [#allocation15], %s7180_s7, %s7180_s7, %s5998_s2  }
  0x70   :  { %s5756_s30 = scalar_lea.hbm %s7181_s22, 256 }
  0x71   :  { %p5757_p4 = scmp.ne.s32.totalorder %s7181_s22, %s5756_s30  ;;  %p5760_p5 = scmp.lt.u32.totalorder %s5756_s30, %s7181_s22 }
  0x73   :  { %p5762_p6 = pnand %p5760_p5, %p5757_p4 }
  0x75   :  { %5765 = shalt.err (!%p5762_p6)
}
  0x76   :  { %s5766_s4 = scalar_lea.vmem %s47_s27, 256  ;;  %p5771_p8 = scmp.lt.s32.totalorder %s47_s27, %s47_s27 }
  0x77   :  { %p5767_p7 = scmp.ne.s32.totalorder %s47_s27, %s5766_s4  ;;  %p5772_p9 = scmp.lt.s32.totalorder %s5766_s4, %s5766_s4 }
  0x79   :  { %p5773_p10 = por %p5772_p9, %p5771_p8 }
  0x7b   :  { %p5774_p11 = pnand %p5773_p10, %p5767_p7 }
  0x7d   :  { %5777 = shalt.err (!%p5774_p11)
}
  0x7e   :  { %52 = dma.hbm_to_vmem [thread:$0]  %s7181_s22, 256, %s47_s27, [#allocation3], %s7180_s7, %s7180_s7, %s5998_s2  }
  0x7f   :  { %s6001_s5 = smov [#allocation7]   ;;  %s6002_s10 = smov [#allocation10]  }
  0x80   :  { %s82_s8 = sshll.u32 %s6001_s5, 4  ;;  %s106_s25 = sshll.u32 %s6002_s10, 4  ;;  %s83_s8 = int_to_ptr.vmem [resolvable:$true] %s82_s8  ;;  %s107_s25 = int_to_ptr.vmem [resolvable:$true] %s106_s25 }
  0x81   :  { %s7182_s28 = sld [smem:[#allocation40_spill]] }
  0x87   :  { %s5778_s0 = scalar_lea.hbm %s7182_s28, 32 }
  0x88   :  { %p5779_p12 = scmp.ne.s32.totalorder %s7182_s28, %s5778_s0  ;;  %p5782_p13 = scmp.lt.u32.totalorder %s5778_s0, %s7182_s28 }
  0x8a   :  { %p5784_p0 = pnand %p5782_p13, %p5779_p12 }
  0x8c   :  { %5787 = shalt.err (!%p5784_p0)
}
  0x8d   :  { %s5788_s27 = scalar_lea.vmem %s83_s8, 32  ;;  %p5793_p2 = scmp.lt.s32.totalorder %s83_s8, %s83_s8 }
  0x8e   :  { %p5789_p1 = scmp.ne.s32.totalorder %s83_s8, %s5788_s27  ;;  %p5794_p3 = scmp.lt.s32.totalorder %s5788_s27, %s5788_s27 }
  0x90   :  { %p5795_p4 = por %p5794_p3, %p5793_p2 }
  0x92   :  { %p5796_p5 = pnand %p5795_p4, %p5789_p1 }
  0x94   :  { %5799 = shalt.err (!%p5796_p5)
}
  0x95   :  { %s7183_s22 = smov 16   ;;  %s7184_s10 = sld [smem:[#allocation42_spill]] }
  0x96   :  { %88 = dma.hbm_to_vmem [thread:$0]  %s7182_s28, 32, %s83_s8, [#allocation6], %s7183_s22, %s7183_s22, %s5994_s11  }
  0x9b   :  { %s5800_s9 = scalar_lea.hbm %s7184_s10, 32 }
  0x9c   :  { %p5801_p6 = scmp.ne.s32.totalorder %s7184_s10, %s5800_s9  ;;  %p5804_p7 = scmp.lt.u32.totalorder %s5800_s9, %s7184_s10 }
  0x9e   :  { %p5806_p8 = pnand %p5804_p7, %p5801_p6 }
  0xa0   :  { %5809 = shalt.err (!%p5806_p8)
}
  0xa1   :  { %s5810_s4 = scalar_lea.vmem %s107_s25, 32  ;;  %p5815_p10 = scmp.lt.s32.totalorder %s107_s25, %s107_s25 }
  0xa2   :  { %p5811_p9 = scmp.ne.s32.totalorder %s107_s25, %s5810_s4  ;;  %p5816_p11 = scmp.lt.s32.totalorder %s5810_s4, %s5810_s4 }
  0xa4   :  { %p5817_p12 = por %p5816_p11, %p5815_p10 }
  0xa6   :  { %p5818_p13 = pnand %p5817_p12, %p5811_p9 }
  0xa8   :  { %5821 = shalt.err (!%p5818_p13)
}
  0xa9   :  { %112 = dma.hbm_to_vmem [thread:$0]  %s7184_s10, 32, %s107_s25, [#allocation9], %s7183_s22, %s7183_s22, %s5994_s11  }
  0xaa   :  { %s6003_s27 = smov [#allocation13]   ;;  %s6004_s3 = smov [#allocation16]  }
  0xab   :  { %s130_s13 = sshll.u32 %s6003_s27, 4  ;;  %s154_s5 = sshll.u32 %s6004_s3, 4  ;;  %s131_s13 = int_to_ptr.vmem [resolvable:$true] %s130_s13  ;;  %s155_s5 = int_to_ptr.vmem [resolvable:$true] %s154_s5 }
  0xac   :  { %s5822_s30 = scalar_lea.hbm %s7127_s12, 32 }
  0xad   :  { %p5823_p0 = scmp.ne.s32.totalorder %s7127_s12, %s5822_s30  ;;  %p5826_p1 = scmp.lt.u32.totalorder %s5822_s30, %s7127_s12 }
  0xaf   :  { %p5828_p2 = pnand %p5826_p1, %p5823_p0 }
  0xb1   :  { %5831 = shalt.err (!%p5828_p2)
}
  0xb2   :  { %s5832_s25 = scalar_lea.vmem %s131_s13, 32  ;;  %p5837_p4 = scmp.lt.s32.totalorder %s131_s13, %s131_s13 }
  0xb3   :  { %p5833_p3 = scmp.ne.s32.totalorder %s131_s13, %s5832_s25  ;;  %p5838_p5 = scmp.lt.s32.totalorder %s5832_s25, %s5832_s25 }
  0xb5   :  { %p5839_p6 = por %p5838_p5, %p5837_p4 }
  0xb7   :  { %p5840_p7 = pnand %p5839_p6, %p5833_p3 }
  0xb9   :  { %5843 = shalt.err (!%p5840_p7)
}
  0xba   :  { %136 = dma.hbm_to_vmem [thread:$0]  %s7127_s12, 32, %s131_s13, [#allocation12], %s7183_s22, %s7183_s22, %s5994_s11  }
  0xbb   :  { %s5844_s3 = scalar_lea.hbm %s7129_s14, 32 }
  0xbc   :  { %p5845_p8 = scmp.ne.s32.totalorder %s7129_s14, %s5844_s3  ;;  %p5848_p9 = scmp.lt.u32.totalorder %s5844_s3, %s7129_s14 }
  0xbe   :  { %p5850_p10 = pnand %p5848_p9, %p5845_p8 }
  0xc0   :  { %5853 = shalt.err (!%p5850_p10)
}
  0xc1   :  { %s5854_s29 = scalar_lea.vmem %s155_s5, 32  ;;  %p5859_p12 = scmp.lt.s32.totalorder %s155_s5, %s155_s5 }
  0xc2   :  { %p5855_p11 = scmp.ne.s32.totalorder %s155_s5, %s5854_s29  ;;  %p5860_p13 = scmp.lt.s32.totalorder %s5854_s29, %s5854_s29 }
  0xc4   :  { %p5861_p0 = por %p5860_p13, %p5859_p12 }
  0xc6   :  { %p5862_p1 = pnand %p5861_p0, %p5855_p11 }
  0xc8   :  { %5865 = shalt.err (!%p5862_p1)
}
  0xc9   :  { %160 = dma.hbm_to_vmem [thread:$0]  %s7129_s14, 32, %s155_s5, [#allocation15], %s7183_s22, %s7183_s22, %s5994_s11  }
  0xca   :  { %5976 = dma.done.wait [#allocation3], 256  }
  0xcb   :  { %5977 = vsyncadd [#allocation3], 4294967040 }
  0xcc   :  { %5978 = dma.done.wait [#allocation6], 64  }
  0xcd   :  { %5979 = vsyncadd [#allocation6], 4294967232 }
  0xce   :  { %5980 = dma.done.wait [#allocation9], 1056  }
  0xcf   :  { %5981 = vsyncadd [#allocation9], 4294966240 }
  0xd0   :  { %5982 = dma.done.wait [#allocation12], 64  }
  0xd1   :  { %5983 = vsyncadd [#allocation12], 4294967232 }
  0xd2   :  { %5984 = dma.done.wait [#allocation15], 1056  }
  0xd3   :  { %5985 = vsyncadd [#allocation15], 4294966240  ;;  %s7185_s25 = sld [smem:[#allocation35_spill]]  ;;  %s7186_s11 = sld [smem:[#allocation37_spill]]  ;;  %vm226_vm0 = vcmask 261120   ;;  %v6318_v11 = vld [vmem:[#allocation2] sm:$0xff]  ;;  %v1134_v48 = vlaneseq }
  0xd4   :  { %5102 = vmatprep.mubr.msk.f32.mxu0 %vm226_vm0, %v6318_v11  ;;  %5113 = vmatprep.mubr.msk.f32.mxu1 %vm226_vm0, %v6318_v11  ;;  %v6324_v13 = vld [vmem:[#allocation2 + $0x8] sm:$0xff]  ;;  %v6005_v14 = vmov 0.0   ;;  %vm6006_vm1 = vmmov 0   ;;  %s7187_s10 = sld [smem:[#allocation39_spill]]  ;;  %s7188_s30 = sld [smem:[#allocation36_spill]]  ;;  %vm528_vm2 = vcmask 64512  }
  0xd5   :  { %v4799_v22 = vld [vmem:[#allocation5] ss:$0 sm:$0xff]  ;;  %s6007_s0 = smov 120   ;;  %s6008_s29 = smov 112   ;;  %v4802_v40 = vld [vmem:[#allocation7] ss:$0 sm:$0xff] }
  0xd6   :  { %s6009_s12 = smov 104   ;;  %v6010_v46 = vmov 1966171168   ;;  %v1135_v50 = vshrl.u32 %v1134_v48, 7  ;;  %s7189_s4 = sld [smem:[#allocation33_spill]]  ;;  %vm2013_vm3 = vcmask 130048  }
  0xd7   :  { %v1132_v47 = vunpack.c.l.s4 %v6010_v46  ;;  %s7190_s14 = sld [smem:[#allocation34_spill]]  ;;  %s7160_s9 = smov 24   ;;  %vm2016_vm4 = vcmask 195584   ;;  %vm2283_vm5 = vcmask 523264   ;;  %vm4554_vm6 = vcmask 1041409  }
  0xd8   :  { %v6418_v57 = vsub.s32 0, %v1135_v50  ;;  %vm4629_vm7 = vcmask 254976  }
  0xd9   :  { %v215_v0 = vld [vmem:[%s7185_s25] sm:$0xff]  ;;  %v216_v1 = vld [vmem:[%s7185_s25 + $0x8] sm:$0xff]  ;;  %v217_v5 = vld [vmem:[%s7185_s25 + $0x10] sm:$0xff]  ;;  %v1133_v49 = vunpack.c.0.s8 %v1132_v47 }
  0xda   :  { %v308_v2 = vld [vmem:[%s7186_s11] sm:$0xff]  ;;  %v5424_v3 = vpack.c.bf16 %v216_v1, %v215_v0  ;;  %v309_v4 = vld [vmem:[%s7186_s11 + $0x8] sm:$0xff]  ;;  %v218_v6 = vld [vmem:[%s7185_s25 + $0x18] sm:$0xff] }
  0xdb   :  { %v5432_v7 = vpack.c.bf16 %v309_v4, %v308_v2  ;;  %v5428_v8 = vpack.c.bf16 %v218_v6, %v217_v5  ;;  %v310_v9 = vld [vmem:[%s7186_s11 + $0x10] sm:$0xff]  ;;  %v311_v10 = vld [vmem:[%s7186_s11 + $0x18] sm:$0xff]  ;;  %v394_v15 = vld [vmem:[%s7187_s10] sm:$0xff]  ;;  %v1136_v51 = vsub.s32 %v1133_v49, %v1135_v50 }
  0xdc   :  { %5425 = vmatprep.subr.bf16.mxu0 %v5424_v3  ;;  %v5436_v12 = vpack.c.bf16 %v311_v10, %v310_v9  ;;  %v395_v16 = vld [vmem:[%s7187_s10 + $0x8] sm:$0xff]  ;;  %v396_v17 = vld [vmem:[%s7187_s10 + $0x10] sm:$0xff]  ;;  %v397_v19 = vld [vmem:[%s7187_s10 + $0x18] sm:$0xff] }
  0xdd   :  { %5433 = vmatprep.subr.bf16.mxu1 %v5432_v7  ;;  %5427 = vmatpush3.bf16.msra.mxu0 %v5424_v3  ;;  %v5440_v18 = vpack.c.bf16 %v395_v16, %v394_v15  ;;  %v5444_v20 = vpack.c.bf16 %v397_v19, %v396_v17  ;;  %v4796_v21 = vld [vmem:[%s7188_s30] ss:$0 sm:$0xff] }
  0xde   :  { %5435 = vmatpush3.bf16.msra.mxu1 %v5432_v7  ;;  %5429 = vmatprep.subr.bf16.mxu0 %v5428_v8  ;;  %v206_v53 = vld [vmem:[%s7189_s4] sm:$0xff] }
  0xdf   :  { %5437 = vmatprep.subr.bf16.mxu1 %v5436_v12  ;;  %v1137_v55 = vrot.slane %v206_v53, %v1136_v51  ;;  %v1130_v9 = vcombine.high %v206_v53, %v206_v53  ;;  %v4821_v53 = vld [vmem:[%s7190_s14] ss:$0 sm:$0xff] }
  0xe1   :  { %5431 = vmatpush3.bf16.msra.mxu0 %v5428_v8  ;;  %v1153_v56 = vrot.slane %v1137_v55, %v1136_v51  ;;  %v1145_v58 = vcombine.high %v1137_v55, %v1137_v55  ;;  %v6011_v8 = vmov 0   ;;  %v1144_v10 = vrot.slane %v1130_v9, %v1136_v51  ;;  %v4823_v55 = vld [vmem:[%s7190_s14 + $0x2] ss:$0 sm:$0xff] }
  0xe2   :  { %5439 = vmatpush3.bf16.msra.mxu1 %v5436_v12  ;;  %5441 = vmatprep.subr.bf16.mxu0 %v5440_v18 }
  0xe3   :  { %5127 = vmatprep.subr.mxu1 %v6005_v14  ;;  %v6421_v59 = vrot.slane %v1153_v56, %v6418_v57  ;;  %v1167_v60 = vrot.slane %v1145_v58, %v1136_v51  ;;  %5575 = vset.pattern.permute.xlu1 %v6011_v8  ;;  %v1175_v12 = vcombine.high %v1153_v56, %v1153_v56  ;;  %v4824_v56 = vld [vmem:[%s7190_s14 + $0x3] ss:$0 sm:$0xff]  ;;  %v4825_v58 = vld [vmem:[%s7190_s14 + $0x4] ss:$0 sm:$0xff] }
  0xe4   :  { %5103 = vmatmul.mubr.msk.f32.vlgmr.msra.gmra.mrb[0].mxu0 %vm226_vm0, %v6324_v13  ;;  %5576 = vset.pattern.permute.xlu0 %v6011_v8 }
  0xe5   :  { %5114 = vmatmul.mubr.msk.f32.vlgmr.msra.gmra.mrb[0].mxu1 %vm226_vm0, %v6324_v13  ;;  %5124 = vmatprep.mubr.msk.f32.mxu0 %vm226_vm0, %v6318_v11  ;;  %v6427_v1 = vrot.slane %v1167_v60, %v6418_v57  ;;  %v1177_v17 = vcombine.high %v1167_v60, %v1167_v60  ;;  %v6437_v19 = vrot.slane %v1175_v12, %v6418_v57  ;;  %v4822_v60 = vld [vmem:[%s7190_s14 + $0x1] ss:$0 sm:$0xff] }
  0xe6   :  { %5129 = vmatprep.mubr.msk.f32.mxu1 %vm6006_vm1, %v6005_v14  ;;  %5443 = vmatpush3.bf16.msra.mxu0 %v5440_v18  ;;  %v1146_v18 = vcombine.high %v1144_v10, %v1144_v10 }
  0xe7   :  { %5445 = vmatprep.subr.bf16.mxu0 %v5444_v20 }
  0xea   :  { %5447 = vmatpush3.bf16.msra.mxu0 %v5444_v20 }
  0xeb   :  { %5137 = vmatprep.subr.mxu0 %v6005_v14 }
  0xed   :  { %5125 = vmatmul.mubr.msk.f32.vlgmr.msra.gmra.mrb[2].mxu0 %vm226_vm0, %v6324_v13 }
  0xee   :  { %5139 = vmatprep.mubr.msk.f32.mxu0 %vm6006_vm1, %v6005_v14 }
 0x1b7   :  { %v5104_v23 = vpop.f32.mrb[0].mxu0 }
 0x1b8   :  { %v305_v24 = vadd.f32 %v5104_v23, %v4796_v21  ;;  %v5115_v25 = vpop.f32.mrb[0].mxu1  ;;  %v299_v26 = vpop.f32.mrb[1].mxu0 }
 0x1b9   :  { %v391_v27 = vadd.f32 %v5115_v25, %v4799_v22  ;;  %v385_v28 = vpop.f32.mrb[1].mxu1  ;;  %v300_v30 = vadd.f32 %v4796_v21, %v299_v26  ;;  %v1160_v21 = vrot.slane %v1144_v10, %v1136_v51  ;;  %v6440_v25 = vrot.slane %v1177_v17, %v6418_v57 }
 0x1ba   :  { %v386_v29 = vadd.f32 %v4799_v22, %v385_v28  ;;  %484 = vrot.lane.b32.xlu1 %v305_v24, %s6007_s0  ;;  %v1174_v26 = vrot.slane %v1146_v18, %v1136_v51 }
 0x1bb   :  { %498 = vrot.lane.b32.xlu0 %v391_v27, %s6007_s0 }
 0x1bc   :  { %5128 = vmatpush3.xpose.msk.msra.mxu1 %vm528_vm2, %v386_v29 }
 0x1bd   :  { %5132 = vmatprep.subr.mxu1 %v6005_v14 }
 0x1be   :  { %502 = vrot.lane.b32.xlu1 %v391_v27, %s6008_s29 }
 0x1bf   :  { %496 = vrot.lane.b32.xlu0 %v386_v29, %s6007_s0  ;;  %5130 = vmatmul.mubr.msk.f32.vlgmr.msra.gmra.mrb[2].mxu1 %vm528_vm2, %v300_v30 }
 0x1c0   :  { %5133 = vmatpush3.xpose.msk.msra.mxu1 %vm528_vm2, %v391_v27  ;;  %5134 = vmatprep.mubr.msk.f32.mxu1 %vm6006_vm1, %v6005_v14  ;;  %v5126_v33 = vpop.f32.mrb[2].mxu0 }
 0x1c1   :  { %5142 = vmatprep.subr.mxu1 %v6005_v14  ;;  %v6399_v43 = vadd.f32 %v5126_v33, %v4802_v40  ;;  %v471_v52 = vpop.f32.mrb[3].mxu0 }
 0x1c2   :  { %482 = vrot.lane.b32.xlu1 %v300_v30, %s6007_s0  ;;  %v6414_v54 = vadd.f32 %v4802_v40, %v471_v52 }
 0x1c3   :  { %500 = vrot.lane.b32.xlu0 %v386_v29, %s6008_s29  ;;  %5135 = vmatmul.mubr.msk.f32.vlgmr.msra.gmra.mrb[4].mxu1 %vm528_vm2, %v305_v24 }
 0x1c4   :  { %5144 = vmatprep.mubr.msk.f32.mxu1 %vm6006_vm1, %v6005_v14 }
 0x1c6   :  { %488 = vrot.lane.b32.xlu1 %v305_v24, %s6008_s29 }
 0x1c7   :  { %486 = vrot.lane.b32.xlu0 %v300_v30, %s6008_s29 }
 0x1ca   :  { %506 = vrot.lane.b32.xlu1 %v391_v27, %s6009_s12 }
 0x1cb   :  { %504 = vrot.lane.b32.xlu0 %v386_v29, %s6009_s12  ;;  %v6446_v29 = vrot.slane %v1160_v21, %v6418_v57 }
 0x1ce   :  { %492 = vrot.lane.b32.xlu1 %v305_v24, %s6009_s12 }
 0x1cf   :  { %490 = vrot.lane.b32.xlu0 %v300_v30, %s6009_s12 }
 0x22c   :  { %v485_v31 = vpop.permute.xlu1 %484 }
 0x22d   :  { %v499_v32 = vpop.permute.xlu0 %498 }
 0x22e   :  { %5143 = vmatpush3.xpose.msk.msra.mxu1 %vm528_vm2, %v499_v32 }
 0x22f   :  { %5152 = vmatprep.subr.mxu1 %v6005_v14 }
 0x230   :  { %v503_v34 = vpop.permute.xlu1 %502 }
 0x231   :  { %v497_v35 = vpop.permute.xlu0 %496  ;;  %5145 = vmatmul.mubr.msk.f32.vlgmr.msra.gmra.mrb[6].mxu1 %vm528_vm2, %v485_v31 }
 0x232   :  { %5138 = vmatpush3.xpose.msk.msra.mxu0 %vm528_vm2, %v497_v35  ;;  %5153 = vmatpush3.xpose.msk.msra.mxu1 %vm528_vm2, %v503_v34  ;;  %v6454_v35 = vrot.slane %v1174_v26, %v6418_v57 }
 0x233   :  { %5147 = vmatprep.subr.mxu0 %v6005_v14  ;;  %5154 = vmatprep.mubr.msk.f32.mxu1 %vm6006_vm1, %v6005_v14 }
 0x234   :  { %v483_v36 = vpop.permute.xlu1 %482  ;;  %5162 = vmatprep.subr.mxu1 %v6005_v14 }
 0x235   :  { %v501_v37 = vpop.permute.xlu0 %500  ;;  %5140 = vmatmul.mubr.msk.f32.vlgmr.msra.gmra.mrb[4].mxu0 %vm528_vm2, %v483_v36 }
 0x236   :  { %5148 = vmatpush3.xpose.msk.msra.mxu0 %vm528_vm2, %v501_v37  ;;  %5149 = vmatprep.mubr.msk.f32.mxu0 %vm6006_vm1, %v6005_v14 }
 0x237   :  { %5157 = vmatprep.subr.mxu0 %v6005_v14 }
 0x238   :  { %v489_v38 = vpop.permute.xlu1 %488 }
 0x239   :  { %v487_v39 = vpop.permute.xlu0 %486  ;;  %5155 = vmatmul.mubr.msk.f32.vlgmr.msra.gmra.mrb[8].mxu1 %vm528_vm2, %v489_v38  ;;  %v1178_v38 = vcombine.high %v1174_v26, %v1174_v26 }
 0x23a   :  { %5150 = vmatmul.mubr.msk.f32.vlgmr.msra.gmra.mrb[6].mxu0 %vm528_vm2, %v487_v39  ;;  %5164 = vmatprep.mubr.msk.f32.mxu1 %vm6006_vm1, %v6005_v14 }
 0x23b   :  { %5159 = vmatprep.mubr.msk.f32.mxu0 %vm6006_vm1, %v6005_v14 }
 0x23c   :  { %v507_v41 = vpop.permute.xlu1 %506 }
 0x23d   :  { %v505_v42 = vpop.permute.xlu0 %504  ;;  %5163 = vmatpush3.xpose.msk.msra.mxu1 %vm528_vm2, %v507_v41 }
 0x23e   :  { %5158 = vmatpush3.xpose.msk.msra.mxu0 %vm528_vm2, %v505_v42  ;;  %5172 = vmatprep.subr.mxu1 %v6005_v14 }
 0x23f   :  { %5167 = vmatprep.subr.mxu0 %v6005_v14 }
 0x240   :  { %v493_v44 = vpop.permute.xlu1 %492 }
 0x241   :  { %v491_v45 = vpop.permute.xlu0 %490  ;;  %5165 = vmatmul.mubr.msk.f32.vlgmr.msra.gmra.mrb[10].mxu1 %vm528_vm2, %v493_v44  ;;  %v6467_v44 = vrot.slane %v1178_v38, %v6418_v57 }
 0x242   :  { %5160 = vmatmul.mubr.msk.f32.vlgmr.msra.gmra.mrb[8].mxu0 %vm528_vm2, %v491_v45  ;;  %5173 = vmatpush3.msra.mxu1 %v6399_v43 }
 0x243   :  { %5174 = vmatprep.mubr.msk.f32.mxu1 %vm6006_vm1, %v6005_v14  ;;  %5182 = vmatprep.subr.mxu1 %v6005_v14 }
 0x244   :  { %5169 = vmatprep.mubr.msk.f32.mxu0 %vm6006_vm1, %v6005_v14  ;;  %5168 = vmatpush3.msra.mxu0 %v6414_v54 }
 0x245   :  { %5177 = vmatprep.subr.mxu0 %v6005_v14 }
 0x292   :  { %v599_v61 = vpop.f32.mrb[2].mxu1 }
 0x293   :  { %v1121_v62 = vmul.f32 0.35355338, %v599_v61  ;;  %v5131_v63 = vpop.f32.mrb[3].mxu1  ;;  %v4826_v61 = vld [vmem:[%s7190_s14 + $0x5] ss:$0 sm:$0xff] }
 0x295   :  { %v6424_v0 = vadd.f32 %v6421_v59, %v1121_v62 }
 0x296   :  { %v673_v2 = vpop.f32.mrb[4].mxu1 }
 0x297   :  { %v1122_v3 = vmul.f32 0.35355338, %v673_v2  ;;  %v5136_v4 = vpop.f32.mrb[5].mxu1  ;;  %v1227_v5 = vsel %vm528_vm2, %v6424_v0, -inf }
 0x298   :  { %1228 = vmax.xlane.f32.xlu0 %v1227_v5 }
 0x299   :  { %v6432_v6 = vadd.f32 %v6427_v1, %v1122_v3  ;;  %v1176_v3 = vcombine.high %v1160_v21, %v1160_v21 }
 0x29b   :  { %v1230_v7 = vsel %vm528_vm2, %v6432_v6, -inf }
 0x29c   :  { %1231 = vmax.xlane.f32.xlu1 %v1230_v7  ;;  %v6497_v7 = vrot.slane %v1176_v3, %v6418_v57  ;;  %v4828_v57 = vld [vmem:[%s7190_s14 + $0x7] ss:$0 sm:$0xff] }
 0x304   :  { %v821_v15 = vpop.f32.mrb[6].mxu1 }
 0x305   :  { %v5146_v16 = vpop.f32.mrb[7].mxu1  ;;  %v1124_v22 = vmul.f32 0.35355338, %v821_v15 }
 0x307   :  { %v6451_v34 = vadd.f32 %v6440_v25, %v1124_v22 }
 0x308   :  { %v747_v20 = vpop.f32.mrb[4].mxu0 }
 0x309   :  { %v1123_v23 = vmul.f32 0.35355338, %v747_v20  ;;  %v5141_v24 = vpop.f32.mrb[5].mxu0  ;;  %v1236_v40 = vsel %vm528_vm2, %v6451_v34, -inf }
 0x30b   :  { %v6443_v27 = vadd.f32 %v6437_v19, %v1123_v23 }
 0x30c   :  { %v969_v28 = vpop.f32.mrb[8].mxu1 }
 0x30d   :  { %v895_v30 = vpop.f32.mrb[6].mxu0  ;;  %v1126_v31 = vmul.f32 0.35355338, %v969_v28  ;;  %v5156_v32 = vpop.f32.mrb[9].mxu1  ;;  %v1233_v33 = vsel %vm528_vm2, %v6443_v27, -inf }
 0x30e   :  { %v1125_v36 = vmul.f32 0.35355338, %v895_v30  ;;  %v5151_v37 = vpop.f32.mrb[7].mxu0  ;;  %1234 = vmax.xlane.f32.xlu0 %v1233_v33 }
 0x30f   :  { %v6462_v41 = vadd.f32 %v6454_v35, %v1126_v31 }
 0x310   :  { %v6457_v39 = vadd.f32 %v6446_v29, %v1125_v36 }
 0x311   :  { %v1242_v49 = vsel %vm528_vm2, %v6462_v41, -inf }
 0x312   :  { %v1239_v42 = vsel %vm528_vm2, %v6457_v39, -inf  ;;  %1237 = vmax.xlane.f32.xlu0 %v1236_v40 }
 0x313   :  { %1240 = vmax.xlane.f32.xlu1 %v1239_v42 }
 0x314   :  { %v1117_v45 = vpop.f32.mrb[10].mxu1 }
 0x315   :  { %v1043_v46 = vpop.f32.mrb[8].mxu0  ;;  %v1128_v47 = vmul.f32 0.35355338, %v1117_v45  ;;  %v5166_v48 = vpop.f32.mrb[11].mxu1 }
 0x316   :  { %v5161_v50 = vpop.f32.mrb[9].mxu0  ;;  %1243 = vmax.xlane.f32.xlu0 %v1242_v49  ;;  %v1127_v5 = vmul.f32 0.35355338, %v1043_v46 }
 0x317   :  { %v1226_v51 = vadd.f32 %v6467_v44, %v1128_v47 }
 0x318   :  { %v6502_v9 = vadd.f32 %v6497_v7, %v1127_v5 }
 0x319   :  { %v1248_v52 = vsel %vm528_vm2, %v1226_v51, -inf }
 0x31a   :  { %1249 = vmax.xlane.f32.xlu0 %v1248_v52  ;;  %v1245_v10 = vsel %vm528_vm2, %v6502_v9, -inf }
 0x324   :  { %1356 = vperm.xlu1 %5575, %v4821_v53  }
 0x325   :  { %v1229_v12 = vpop.xlane.xlu0 %1228 }
 0x326   :  { %v1251_v15 = vsub.f32 %v6424_v0, %v1229_v12 }
 0x328   :  { %1364 = vperm.xlu1 %5575, %v4823_v55   ;;  %v1259_v16 = vmul.f32 1.442695, %v1251_v15 }
 0x329   :  { %v1232_v62 = vpop.xlane.xlu1 %1231 }
 0x32a   :  { %v1252_v63 = vsub.f32 %v6432_v6, %v1232_v62  ;;  %v4827_v6 = vld [vmem:[%s7190_s14 + $0x6] ss:$0 sm:$0xff] }
 0x32c   :  { %1368 = vperm.xlu1 %5575, %v4824_v56   ;;  %v1261_v2 = vmul.f32 1.442695, %v1252_v63 }
 0x32e   :  { %5578 = vpow2.f32 %v1261_v2 }
 0x32f   :  { %5580 = vpow2.f32 %v1259_v16 }
 0x330   :  { %1372 = vperm.xlu1 %5575, %v4825_v58   ;;  %1360 = vperm.xlu0 %5576, %v4822_v60  }
 0x334   :  { %1376 = vperm.xlu1 %5575, %v4826_v61   ;;  %516 = vrot.lane.b32.xlu0 %v6414_v54, %s6008_s29 }
 0x338   :  { %v6494_v4 = vpop.eup %5578 }
 0x339   :  { %v1278_v8 = vsel %vm528_vm2, %v6494_v4, 0.0  ;;  %v6519_v17 = vpop.eup %5580 }
 0x33a   :  { %v1275_v21 = vsel %vm528_vm2, %v6519_v17, 0.0 }
 0x353   :  { %1279 = vadd.xlane.f32.xlu0 %v1278_v8 }
 0x358   :  { %1246 = vmax.xlane.f32.xlu1 %v1245_v10 }
 0x369   :  { %510 = vrot.lane.b32.xlu1 %v6414_v54, %s6007_s0 }
 0x36d   :  { %1380 = vperm.xlu1 %5575, %v4827_v6  }
 0x371   :  { %512 = vrot.lane.b32.xlu1 %v6399_v43, %s6007_s0 }
 0x375   :  { %1384 = vperm.xlu1 %5575, %v4828_v57  }
 0x379   :  { %518 = vrot.lane.b32.xlu1 %v6399_v43, %s6008_s29 }
 0x39b   :  { %v1235_v18 = vpop.xlane.xlu0 %1234 }
 0x39c   :  { %v1253_v20 = vsub.f32 %v6443_v27, %v1235_v18 }
 0x39d   :  { %1276 = vadd.xlane.f32.xlu1 %v1275_v21 }
 0x39e   :  { %v1263_v22 = vmul.f32 1.442695, %v1253_v20 }
 0x39f   :  { %v1238_v23 = vpop.xlane.xlu0 %1237 }
 0x3a0   :  { %5582 = vpow2.f32 %v1263_v22  ;;  %v1241_v24 = vpop.xlane.xlu1 %1240  ;;  %v1254_v26 = vsub.f32 %v6451_v34, %v1238_v23 }
 0x3a1   :  { %v1255_v28 = vsub.f32 %v6457_v39, %v1241_v24 }
 0x3a2   :  { %v1265_v0 = vmul.f32 1.442695, %v1254_v26 }
 0x3a3   :  { %v1267_v30 = vmul.f32 1.442695, %v1255_v28  ;;  %v1244_v31 = vpop.xlane.xlu0 %1243 }
 0x3a4   :  { %5584 = vpow2.f32 %v1265_v0  ;;  %v1256_v32 = vsub.f32 %v6462_v41, %v1244_v31  ;;  %v1357_v49 = vpop.permute.xlu1 %1356 }
 0x3a5   :  { %5586 = vpow2.f32 %v1267_v30 }
 0x3a6   :  { %v1269_v27 = vmul.f32 1.442695, %v1256_v32 }
 0x3a7   :  { %v1250_v33 = vpop.xlane.xlu0 %1249 }
 0x3a8   :  { %5588 = vpow2.f32 %v1269_v27  ;;  %v1258_v36 = vsub.f32 %v1226_v51, %v1250_v33  ;;  %v1365_v50 = vpop.permute.xlu1 %1364 }
 0x3aa   :  { %v6527_v37 = vpop.eup %5582  ;;  %v1273_v38 = vmul.f32 1.442695, %v1258_v36 }
 0x3ab   :  { %v1281_v40 = vsel %vm528_vm2, %v6527_v37, 0.0 }
 0x3ac   :  { %5590 = vpow2.f32 %v1273_v38  ;;  %1282 = vadd.xlane.f32.xlu1 %v1281_v40  ;;  %v1369_v51 = vpop.permute.xlu1 %1368 }
 0x3ae   :  { %v6531_v34 = vpop.eup %5584 }
 0x3af   :  { %v6533_v39 = vpop.eup %5586  ;;  %v1284_v41 = vsel %vm528_vm2, %v6531_v34, 0.0  ;;  %v1361_v52 = vpop.permute.xlu0 %1360 }
 0x3b0   :  { %v1287_v42 = vsel %vm528_vm2, %v6533_v39, 0.0  ;;  %1285 = vadd.xlane.f32.xlu0 %v1284_v41  ;;  %v1373_v53 = vpop.permute.xlu1 %1372 }
 0x3b1   :  { %1288 = vadd.xlane.f32.xlu1 %v1287_v42 }
 0x3b2   :  { %v6539_v45 = vpop.eup %5588 }
 0x3b3   :  { %v1290_v46 = vsel %vm528_vm2, %v6539_v45, 0.0  ;;  %v517_v55 = vpop.permute.xlu0 %516 }
 0x3b4   :  { %1291 = vadd.xlane.f32.xlu0 %v1290_v46  ;;  %v6549_v58 = vpop.permute.xlu1 %1376 }
 0x3b6   :  { %v6543_v47 = vpop.eup %5590 }
 0x3b7   :  { %v1296_v48 = vsel %vm528_vm2, %v6543_v47, 0.0 }
 0x3b8   :  { %1297 = vadd.xlane.f32.xlu0 %v1296_v48 }
 0x3ce   :  { %522 = vrot.lane.b32.xlu0 %v6414_v54, %s6009_s12 }
 0x3e0   :  { %v1280_v56 = vpop.xlane.xlu0 %1279 }
 0x3e1   :  { %5592 = vrcp.f32 %v1280_v56 }
 0x3e5   :  { %v1247_v60 = vpop.xlane.xlu1 %1246 }
 0x3e6   :  { %v1257_v61 = vsub.f32 %v6502_v9, %v1247_v60 }
 0x3e8   :  { %v1271_v62 = vmul.f32 1.442695, %v1257_v61 }
 0x3e9   :  { %v511_v63 = vpop.permute.xlu1 %510 }
 0x3ea   :  { %5594 = vpow2.f32 %v1271_v62  ;;  %v2019_v62 = vld [vmem:[#allocation8] sm:$0xff] }
 0x3eb   :  { %v5593_v2 = vpop.eup %5592 }
 0x3ec   :  { %v1308_v3 = vmul.f32 %v5593_v2, %v6494_v4  ;;  %v2021_v2 = vld [vmem:[#allocation8 + $0x10] sm:$0xff] }
 0x3ed   :  { %v6553_v5 = vpop.permute.xlu1 %1380 }
 0x3ee   :  { %v1388_v54 = vmul.f32 %v1361_v52, %v1308_v3 }
 0x3f0   :  { %1399 = vst.msk [vmem:[#allocation21 + $0x20] sm:$0xff] %vm528_vm2, %v1388_v54  ;;  %5175 = vmatmul.mubr.msk.f32.vlgmr.msra.gmra.mrb[12].mxu1 %vm528_vm2, %v1388_v54 }
 0x3f1   :  { %v513_v8 = vpop.permute.xlu1 %512  ;;  %5184 = vmatprep.mubr.msk.f32.mxu1 %vm6006_vm1, %v6005_v14 }
 0x3f2   :  { %5183 = vmatpush3.msra.mxu1 %v513_v8 }
 0x3f3   :  { %5192 = vmatprep.subr.mxu1 %v6005_v14 }
 0x3f4   :  { %v6560_v9 = vpop.eup %5594 }
 0x3f5   :  { %v1293_v10 = vsel %vm528_vm2, %v6560_v9, 0.0  ;;  %v1385_v4 = vpop.permute.xlu1 %1384 }
 0x3f6   :  { %1294 = vadd.xlane.f32.xlu1 %v1293_v10 }
 0x3f9   :  { %v519_v6 = vpop.permute.xlu1 %518 }
 0x407   :  { %524 = vrot.lane.b32.xlu1 %v6399_v43, %s6009_s12 }
 0x42a   :  { %v1277_v57 = vpop.xlane.xlu1 %1276 }
 0x42b   :  { %5596 = vrcp.f32 %v1277_v57 }
 0x435   :  { %v5597_v12 = vpop.eup %5596 }
 0x436   :  { %v1307_v15 = vmul.f32 %v5597_v12, %v6519_v17 }
 0x438   :  { %v1387_v16 = vmul.f32 %v1357_v49, %v1307_v15 }
 0x439   :  { %v1283_v18 = vpop.xlane.xlu1 %1282 }
 0x43a   :  { %1395 = vst.msk [vmem:[#allocation21] sm:$0xff] %vm528_vm2, %v1387_v16  ;;  %5170 = vmatmul.mubr.msk.f32.vlgmr.msra.gmra.mrb[10].mxu0 %vm528_vm2, %v1387_v16  ;;  %5598 = vrcp.f32 %v1283_v18 }
 0x43b   :  { %5178 = vmatpush3.msra.mxu0 %v511_v63  ;;  %5179 = vmatprep.mubr.msk.f32.mxu0 %vm6006_vm1, %v6005_v14  ;;  %v2020_v63 = vld [vmem:[#allocation8 + $0x8] sm:$0xff] }
 0x43c   :  { %5187 = vmatprep.subr.mxu0 %v6005_v14  ;;  %v5448_v3 = vpack.c.bf16 %v2020_v63, %v2019_v62  ;;  %v4841_v63 = vld [vmem:[#allocation13] ss:$0 sm:$0xff] }
 0x43d   :  { %v1286_v43 = vpop.xlane.xlu0 %1285 }
 0x43e   :  { %v1289_v20 = vpop.xlane.xlu1 %1288  ;;  %5600 = vrcp.f32 %v1286_v43 }
 0x43f   :  { %5602 = vrcp.f32 %v1289_v20 }
 0x441   :  { %v1292_v21 = vpop.xlane.xlu0 %1291 }
 0x442   :  { %5604 = vrcp.f32 %v1292_v21 }
 0x444   :  { %v5599_v17 = vpop.eup %5598 }
 0x445   :  { %v1309_v22 = vmul.f32 %v5599_v17, %v6527_v37  ;;  %v1298_v23 = vpop.xlane.xlu0 %1297 }
 0x446   :  { %5606 = vrcp.f32 %v1298_v23 }
 0x447   :  { %v1389_v24 = vmul.f32 %v1365_v50, %v1309_v22 }
 0x448   :  { %v5601_v26 = vpop.eup %5600 }
 0x449   :  { %v5603_v28 = vpop.eup %5602  ;;  %v1310_v0 = vmul.f32 %v5601_v26, %v6531_v34  ;;  %1396 = vst.msk [vmem:[#allocation21 + $0x8] sm:$0xff] %vm528_vm2, %v1389_v24  ;;  %5180 = vmatmul.mubr.msk.f32.vlgmr.msra.gmra.mrb[12].mxu0 %vm528_vm2, %v1389_v24  ;;  %v523_v36 = vpop.permute.xlu0 %522  ;;  %v4837_v24 = vld [vmem:[#allocation10] ss:$0 sm:$0xff] }
 0x44a   :  { %v1311_v30 = vmul.f32 %v5603_v28, %v6533_v39  ;;  %5188 = vmatpush3.msra.mxu0 %v517_v55  ;;  %5189 = vmatprep.mubr.msk.f32.mxu0 %vm6006_vm1, %v6005_v14 }
 0x44b   :  { %5197 = vmatprep.subr.mxu0 %v6005_v14  ;;  %v1390_v31 = vmul.f32 %v1369_v51, %v1310_v0 }
 0x44c   :  { %v5605_v32 = vpop.eup %5604  ;;  %v1391_v27 = vmul.f32 %v1373_v53, %v1311_v30 }
 0x44d   :  { %v1312_v33 = vmul.f32 %v5605_v32, %v6539_v45  ;;  %1400 = vst.msk [vmem:[#allocation21 + $0x28] sm:$0xff] %vm528_vm2, %v1390_v31  ;;  %5185 = vmatmul.mubr.msk.f32.vlgmr.msra.gmra.mrb[14].mxu1 %vm528_vm2, %v1390_v31 }
 0x44e   :  { %1397 = vst.msk [vmem:[#allocation21 + $0x10] sm:$0xff] %vm528_vm2, %v1391_v27  ;;  %5190 = vmatmul.mubr.msk.f32.vlgmr.msra.gmra.mrb[14].mxu0 %vm528_vm2, %v1391_v27  ;;  %5193 = vmatpush3.msra.mxu1 %v519_v6 }
 0x44f   :  { %5198 = vmatpush3.msra.mxu0 %v523_v36  ;;  %5194 = vmatprep.mubr.msk.f32.mxu1 %vm6006_vm1, %v6005_v14  ;;  %v1392_v37 = vmul.f32 %v6549_v58, %v1312_v33 }
 0x450   :  { %v5607_v38 = vpop.eup %5606  ;;  %5202 = vmatprep.subr.mxu1 %v6005_v14  ;;  %5199 = vmatprep.mubr.msk.f32.mxu0 %vm6006_vm1, %v6005_v14 }
 0x451   :  { %v1314_v40 = vmul.f32 %v5607_v38, %v6543_v47  ;;  %1401 = vst.msk [vmem:[#allocation21 + $0x30] sm:$0xff] %vm528_vm2, %v1392_v37  ;;  %5195 = vmatmul.mubr.msk.f32.vlgmr.msra.gmra.mrb[16].mxu1 %vm528_vm2, %v1392_v37  ;;  %5449 = vmatprep.subr.bf16.mxu0 %v5448_v3 }
 0x452   :  { %5204 = vmatprep.mubr.msk.f32.mxu1 %vm6006_vm1, %v6005_v14 }
 0x453   :  { %v1394_v34 = vmul.f32 %v1385_v4, %v1314_v40 }
 0x455   :  { %1402 = vst.msk [vmem:[#allocation21 + $0x38] sm:$0xff] %vm528_vm2, %v1394_v34 }
 0x483   :  { %v1295_v39 = vpop.xlane.xlu1 %1294 }
 0x484   :  { %5608 = vrcp.f32 %v1295_v39 }
 0x487   :  { %v525_v41 = vpop.permute.xlu1 %524 }
 0x488   :  { %5203 = vmatpush3.msra.mxu1 %v525_v41 }
 0x489   :  { %5205 = vmatmul.mubr.msk.f32.vlgmr.msra.gmra.mrb[18].mxu1 %vm528_vm2, %v1394_v34 }
 0x48e   :  { %v5609_v42 = vpop.eup %5608 }
 0x48f   :  { %v1313_v45 = vmul.f32 %v5609_v42, %v6560_v9 }
 0x491   :  { %v1393_v46 = vmul.f32 %v6553_v5, %v1313_v45  ;;  %v2022_v5 = vld [vmem:[#allocation8 + $0x18] sm:$0xff] }
 0x492   :  { %v5452_v54 = vpack.c.bf16 %v2022_v5, %v2021_v2 }
 0x493   :  { %1398 = vst.msk [vmem:[#allocation21 + $0x18] sm:$0xff] %vm528_vm2, %v1393_v46  ;;  %5200 = vmatmul.mubr.msk.f32.vlgmr.msra.gmra.mrb[16].mxu0 %vm528_vm2, %v1393_v46  ;;  %v2159_v46 = vld [vmem:[#allocation14 + $0x8] sm:$0xff] }
 0x494   :  { %5451 = vmatpush3.bf16.msra.mxu0 %v5448_v3 }
 0x495   :  { %5453 = vmatprep.subr.bf16.mxu0 %v5452_v54 }
 0x498   :  { %5455 = vmatpush3.bf16.msra.mxu0 %v5452_v54 }
 0x4c3   :  { %v1545_v47 = vpop.f32.mrb[12].mxu1 }
 0x4c4   :  { %v5176_v48 = vpop.f32.mrb[13].mxu1 }
 0x4c5   :  { %v2160_v48 = vld [vmem:[#allocation14 + $0x10] sm:$0xff] }
 0x50d   :  { %v1472_v49 = vpop.f32.mrb[10].mxu0 }
 0x50e   :  { %v5171_v50 = vpop.f32.mrb[11].mxu0 }
 0x51c   :  { %v1618_v51 = vpop.f32.mrb[12].mxu0 }
 0x51d   :  { %v5181_v52 = vpop.f32.mrb[13].mxu0  ;;  %1989 = vrot.lane.b32.xlu0 %v1618_v51, %s5998_s2 }
 0x520   :  { %v1691_v53 = vpop.f32.mrb[14].mxu1 }
 0x521   :  { %v1764_v55 = vpop.f32.mrb[14].mxu0  ;;  %1991 = vrot.lane.b32.xlu1 %v1691_v53, %s5998_s2  ;;  %v5186_v56 = vpop.f32.mrb[15].mxu1 }
 0x522   :  { %1997 = vrot.lane.b32.xlu0 %v1764_v55, %s7183_s22  ;;  %v5191_v58 = vpop.f32.mrb[15].mxu0 }
 0x524   :  { %v1837_v60 = vpop.f32.mrb[16].mxu1 }
 0x525   :  { %1999 = vrot.lane.b32.xlu1 %v1837_v60, %s7183_s22  ;;  %v5196_v61 = vpop.f32.mrb[17].mxu1 }
 0x526   :  { %v4840_v61 = vld [vmem:[#allocation11] ss:$0 sm:$0xff] }
 0x55c   :  { %v1983_v8 = vpop.f32.mrb[18].mxu1 }
 0x55d   :  { %2007 = vrot.lane.b32.xlu1 %v1983_v8, %s7160_s9  ;;  %v5206_v9 = vpop.f32.mrb[19].mxu1 }
 0x566   :  { %v1910_v10 = vpop.f32.mrb[16].mxu0 }
 0x567   :  { %2005 = vrot.lane.b32.xlu0 %v1910_v10, %s7160_s9  ;;  %v5201_v4 = vpop.f32.mrb[17].mxu0  ;;  %v2268_v10 = vld [vmem:[%s7130_s15] sm:$0xff] }
 0x568   :  { %v2269_v4 = vld [vmem:[%s7130_s15 + $0x8] sm:$0xff] }
 0x58f   :  { %v1990_v57 = vpop.permute.xlu0 %1989 }
 0x590   :  { %v2011_v16 = vsel %vm528_vm2, %v1472_v49, %v1990_v57  ;;  %v2161_v49 = vld [vmem:[#allocation14 + $0x18] sm:$0xff] }
 0x591   :  { %v5460_v50 = vpack.c.bf16 %v2161_v49, %v2160_v48  ;;  %v2270_v57 = vld [vmem:[%s7130_s15 + $0x10] sm:$0xff] }
 0x593   :  { %v1992_v6 = vpop.permute.xlu1 %1991 }
 0x594   :  { %v1998_v15 = vpop.permute.xlu0 %1997  ;;  %v2012_v20 = vsel %vm528_vm2, %v1545_v47, %v1992_v6  ;;  %v5464_v6 = vpack.c.bf16 %v2269_v4, %v2268_v10  ;;  %v4859_v10 = vld [vmem:[%s7185_s25 + $0x28] sm:$0xff] }
 0x595   :  { %v2014_v43 = vsel %vm2013_vm3, %v2011_v16, %v1998_v15  ;;  %v2272_v16 = vld [vmem:[%s7130_s15 + $0x20] sm:$0xff] }
 0x596   :  { %5465 = vmatprep.subr.bf16.mxu0 %v5464_v6 }
 0x597   :  { %v2000_v12 = vpop.permute.xlu1 %1999 }
 0x598   :  { %v2015_v17 = vsel %vm2013_vm3, %v2012_v20, %v2000_v12  ;;  %v2271_v12 = vld [vmem:[%s7130_s15 + $0x18] sm:$0xff]  ;;  %v2274_v20 = vld [vmem:[%s7130_s15 + $0x30] sm:$0xff] }
 0x599   :  { %v5468_v15 = vpack.c.bf16 %v2271_v12, %v2270_v57  ;;  %v4874_v57 = vld [vmem:[%s7187_s10 + $0x28] sm:$0xff] }
 0x5cf   :  { %v2008_v18 = vpop.permute.xlu1 %2007 }
 0x5d0   :  { %v2018_v23 = vsel %vm2016_vm4, %v2015_v17, %v2008_v18  ;;  %v2273_v18 = vld [vmem:[%s7130_s15 + $0x28] sm:$0xff] }
 0x5d9   :  { %v2006_v21 = vpop.permute.xlu0 %2005 }
 0x5da   :  { %v2017_v22 = vsel %vm2016_vm4, %v2014_v43, %v2006_v21  ;;  %v5472_v43 = vpack.c.bf16 %v2273_v18, %v2272_v16  ;;  %v2275_v21 = vld [vmem:[%s7130_s15 + $0x38] sm:$0xff]  ;;  %v4875_v18 = vld [vmem:[%s7187_s10 + $0x30] sm:$0xff] }
 0x5db   :  { %5215 = vmatprep.mubr.msk.f32.mxu0 %vm226_vm0, %v2017_v22  ;;  %v5476_v17 = vpack.c.bf16 %v2275_v21, %v2274_v20  ;;  %v4842_v22 = vld [vmem:[#allocation16] ss:$0 sm:$0xff] }
 0x5dc   :  { %5216 = vmatmul.mubr.msk.f32.vlgmr.msra.gmra.mrb[18].mxu0 %vm226_vm0, %v2018_v23  ;;  %v4861_v16 = vld [vmem:[%s7185_s25 + $0x38] sm:$0xff] }
 0x5dd   :  { %5467 = vmatpush3.bf16.msra.mxu0 %v5464_v6  ;;  %v4873_v6 = vld [vmem:[%s7187_s10 + $0x20] sm:$0xff]  ;;  %v4876_v20 = vld [vmem:[%s7187_s10 + $0x38] sm:$0xff] }
 0x5de   :  { %5469 = vmatprep.subr.bf16.mxu0 %v5468_v15  ;;  %v5496_v12 = vpack.c.bf16 %v4874_v57, %v4873_v6  ;;  %v5500_v21 = vpack.c.bf16 %v4876_v20, %v4875_v18 }
 0x5e1   :  { %5471 = vmatpush3.bf16.msra.mxu0 %v5468_v15  ;;  %v4860_v15 = vld [vmem:[%s7185_s25 + $0x30] sm:$0xff] }
 0x5e2   :  { %5473 = vmatprep.subr.bf16.mxu0 %v5472_v43 }
 0x5e5   :  { %5475 = vmatpush3.bf16.msra.mxu0 %v5472_v43  ;;  %v5484_v43 = vpack.c.bf16 %v4861_v16, %v4860_v15 }
 0x5e6   :  { %5477 = vmatprep.subr.bf16.mxu0 %v5476_v17 }
 0x5e9   :  { %5479 = vmatpush3.bf16.msra.mxu0 %v5476_v17  ;;  %v4866_v17 = vld [vmem:[%s7186_s11 + $0x20] sm:$0xff] }
 0x5ea   :  { %5497 = vmatprep.subr.bf16.mxu0 %v5496_v12 }
 0x6af   :  { %v5217_v26 = vpop.f32.mrb[18].mxu0 }
 0x6b0   :  { %v2108_v28 = vadd.f32 %v5217_v26, %v4837_v24  ;;  %v2102_v0 = vpop.f32.mrb[19].mxu0 }
 0x6b1   :  { %v2103_v30 = vadd.f32 %v4837_v24, %v2102_v0 }
 0x6b2   :  { %v2112_v31 = vadd.f32 %v2108_v28, %v6324_v13 }
 0x6b3   :  { %v2111_v32 = vadd.f32 %v2103_v30, %v6318_v11  ;;  %v2158_v11 = vld [vmem:[#allocation14] sm:$0xff] }
 0x6b4   :  { %v2118_v27 = vsel %vm226_vm0, %v2112_v31, 0.0  ;;  %v5456_v47 = vpack.c.bf16 %v2159_v46, %v2158_v11 }
 0x6b5   :  { %2119 = vadd.xlane.f32.xlu1 %v2118_v27  ;;  %v2115_v33 = vsel %vm226_vm0, %v2111_v32, 0.0 }
 0x6b6   :  { %2116 = vadd.xlane.f32.xlu0 %v2115_v33  ;;  %5457 = vmatprep.subr.bf16.mxu1 %v5456_v47 }
 0x6b7   :  { %5459 = vmatpush3.bf16.msra.mxu1 %v5456_v47  ;;  %v4845_v47 = vld [vmem:[%s7131_s16] ss:$0 sm:$0xff] }
 0x6b8   :  { %5461 = vmatprep.subr.bf16.mxu1 %v5460_v50 }
 0x6bb   :  { %5463 = vmatpush3.bf16.msra.mxu1 %v5460_v50 }
 0x742   :  { %v2120_v36 = vpop.xlane.xlu1 %2119 }
 0x743   :  { %v2123_v37 = vmul.f32 0.03125, %v2120_v36  ;;  %v2117_v38 = vpop.xlane.xlu0 %2116 }
 0x744   :  { %v2122_v40 = vmul.f32 0.03125, %v2117_v38 }
 0x745   :  { %v2125_v34 = vsub.f32 %v2112_v31, %v2123_v37 }
 0x746   :  { %v2124_v39 = vsub.f32 %v2111_v32, %v2122_v40 }
 0x747   :  { %v2127_v45 = vmul.f32 %v2125_v34, %v2125_v34 }
 0x748   :  { %v2126_v41 = vmul.f32 %v2124_v39, %v2124_v39 }
 0x749   :  { %v2131_v13 = vsel %vm226_vm0, %v2127_v45, 0.0 }
 0x74a   :  { %v2128_v42 = vsel %vm226_vm0, %v2126_v41, 0.0 }
 0x74b   :  { %2129 = vadd.xlane.f32.xlu0 %v2128_v42 }
 0x74f   :  { %2132 = vadd.xlane.f32.xlu0 %v2131_v13 }
 0x7d8   :  { %v2130_v51 = vpop.xlane.xlu0 %2129 }
 0x7d9   :  { %v2134_v52 = vmul.f32 0.03125, %v2130_v51 }
 0x7db   :  { %v2136_v53 = vadd.f32 1e-12, %v2134_v52 }
 0x7dc   :  { %v2133_v55 = vpop.xlane.xlu0 %2132 }
 0x7dd   :  { %5610 = vrsqrt.f32 %v2136_v53  ;;  %v2135_v56 = vmul.f32 0.03125, %v2133_v55 }
 0x7df   :  { %v2137_v58 = vadd.f32 1e-12, %v2135_v56 }
 0x7e1   :  { %5612 = vrsqrt.f32 %v2137_v58 }
 0x7e7   :  { %v5611_v60 = vpop.eup %5610 }
 0x7e8   :  { %v2140_v62 = vmul.f32 %v5611_v60, %v2124_v39 }
 0x7ea   :  { %v2148_v2 = vmul.f32 %v4840_v61, %v2140_v62 }
 0x7eb   :  { %v5613_v3 = vpop.eup %5612 }
 0x7ec   :  { %v2141_v5 = vmul.f32 %v5613_v3, %v2125_v34  ;;  %v2156_v54 = vadd.f32 %v4841_v63, %v2148_v2 }
 0x7ee   :  { %v2149_v8 = vmul.f32 %v4840_v61, %v2141_v5  ;;  %5226 = vmatprep.mubr.msk.f32.mxu1 %vm226_vm0, %v2156_v54 }
 0x7f0   :  { %v2157_v9 = vadd.f32 %v4841_v63, %v2149_v8 }
 0x7f2   :  { %5227 = vmatmul.mubr.msk.f32.vlgmr.msra.gmra.mrb[20].mxu1 %vm226_vm0, %v2157_v9 }
 0x8c5   :  { %v5228_v23 = vpop.f32.mrb[20].mxu1 }
 0x8c6   :  { %v2247_v24 = vadd.f32 %v5228_v23, %v4842_v22  ;;  %v2241_v26 = vpop.f32.mrb[21].mxu1 }
 0x8c7   :  { %v2242_v28 = vadd.f32 %v4842_v22, %v2241_v26  ;;  %v4867_v22 = vld [vmem:[%s7186_s11 + $0x28] sm:$0xff] }
 0x8c8   :  { %v2253_v0 = vmul.f32 0.044715, %v2247_v24  ;;  %v2251_v13 = vmul.f32 0.5, %v2247_v24  ;;  %v5488_v23 = vpack.c.bf16 %v4867_v22, %v4866_v17 }
 0x8c9   :  { %v2252_v30 = vmul.f32 0.044715, %v2242_v28  ;;  %v2250_v42 = vmul.f32 0.5, %v2242_v28 }
 0x8ca   :  { %v2255_v31 = vmul.f32 %v2253_v0, %v2247_v24 }
 0x8cb   :  { %v2254_v32 = vmul.f32 %v2252_v30, %v2242_v28 }
 0x8cc   :  { %v2257_v27 = vmul.f32 %v2255_v31, %v2247_v24 }
 0x8cd   :  { %v2256_v33 = vmul.f32 %v2254_v32, %v2242_v28 }
 0x8ce   :  { %v2259_v36 = vadd.f32 %v2257_v27, %v2247_v24  ;;  %v4848_v27 = vld [vmem:[%s7132_s17] ss:$0 sm:$0xff] }
 0x8cf   :  { %v2258_v37 = vadd.f32 %v2256_v33, %v2242_v28 }
 0x8d0   :  { %v2261_v38 = vmul.f32 0.7978846, %v2259_v36 }
 0x8d1   :  { %v2260_v40 = vmul.f32 0.7978846, %v2258_v37 }
 0x8d2   :  { %5614 = vtanh.f32 %v2261_v38  ;;  %v4849_v38 = vld [vmem:[%s7133_s18] ss:$0 sm:$0xff] }
 0x8d3   :  { %5616 = vtanh.f32 %v2260_v40 }
 0x8dc   :  { %v5615_v34 = vpop.eup %5614 }
 0x8dd   :  { %v5617_v39 = vpop.eup %5616  ;;  %v2265_v41 = vadd.f32 1.0, %v5615_v34 }
 0x8de   :  { %v2264_v45 = vadd.f32 1.0, %v5617_v39  ;;  %v4868_v39 = vld [vmem:[%s7186_s11 + $0x30] sm:$0xff] }
 0x8df   :  { %v2267_v46 = vmul.f32 %v2265_v41, %v2251_v13  ;;  %v4869_v41 = vld [vmem:[%s7186_s11 + $0x38] sm:$0xff] }
 0x8e0   :  { %v2266_v11 = vmul.f32 %v2264_v45, %v2250_v42  ;;  %v5492_v13 = vpack.c.bf16 %v4869_v41, %v4868_v39 }
 0x8e2   :  { %5245 = vmatprep.mubr.msk.f32.mxu0 %vm2283_vm5, %v2266_v11  ;;  %v4863_v11 = vld [vmem:[%s7188_s30 + $0x1] ss:$0 sm:$0xff] }
 0x8e3   :  { %5246 = vmatmul.mubr.msk.f32.vlgmr.msra.gmra.mrb[20].mxu0 %vm2283_vm5, %v2267_v46 }
 0x8e4   :  { %5499 = vmatpush3.bf16.msra.mxu0 %v5496_v12 }
 0x8e5   :  { %5501 = vmatprep.subr.bf16.mxu0 %v5500_v21 }
 0x8e8   :  { %5503 = vmatpush3.bf16.msra.mxu0 %v5500_v21 }
 0x8e9   :  { %5291 = vmatprep.subr.mxu0 %v6005_v14 }
 0x9b6   :  { %v5247_v48 = vpop.f32.mrb[20].mxu0 }
 0x9b7   :  { %v2362_v49 = vadd.f32 %v5247_v48, %v4845_v47  ;;  %v2356_v50 = vpop.f32.mrb[21].mxu0 }
 0x9b8   :  { %v2357_v51 = vadd.f32 %v4845_v47, %v2356_v50 }
 0x9b9   :  { %v2366_v52 = vadd.f32 %v2362_v49, %v2157_v9 }
 0x9ba   :  { %v2365_v53 = vadd.f32 %v2357_v51, %v2156_v54  ;;  %v4858_v54 = vld [vmem:[%s7185_s25 + $0x20] sm:$0xff] }
 0x9bb   :  { %v2372_v55 = vsel %vm226_vm0, %v2366_v52, 0.0  ;;  %v5480_v4 = vpack.c.bf16 %v4859_v10, %v4858_v54  ;;  %v4877_v10 = vld [vmem:[#allocation7 + $0x1] ss:$0 sm:$0xff] }
 0x9bc   :  { %2373 = vadd.xlane.f32.xlu0 %v2372_v55  ;;  %v2369_v56 = vsel %vm226_vm0, %v2365_v53, 0.0 }
 0x9bd   :  { %2370 = vadd.xlane.f32.xlu1 %v2369_v56  ;;  %5481 = vmatprep.subr.bf16.mxu1 %v5480_v4 }
 0x9be   :  { %5483 = vmatpush3.bf16.msra.mxu1 %v5480_v4 }
 0x9bf   :  { %5485 = vmatprep.subr.bf16.mxu1 %v5484_v43 }
 0x9c2   :  { %5487 = vmatpush3.bf16.msra.mxu1 %v5484_v43 }
 0x9c3   :  { %5489 = vmatprep.subr.bf16.mxu1 %v5488_v23 }
 0xa49   :  { %v2374_v58 = vpop.xlane.xlu0 %2373 }
 0xa4a   :  { %v2376_v60 = vmul.f32 0.03125, %v2374_v58  ;;  %v2371_v61 = vpop.xlane.xlu1 %2370 }
 0xa4b   :  { %v2375_v62 = vmul.f32 0.03125, %v2371_v61 }
 0xa4c   :  { %v2378_v63 = vsub.f32 %v2366_v52, %v2376_v60  ;;  %v4870_v52 = vld [vmem:[#allocation5 + $0x1] ss:$0 sm:$0xff]  ;;  %v4896_v60 = vld [vmem:[%s7190_s14 + $0x8] ss:$0 sm:$0xff] }
 0xa4d   :  { %v2377_v2 = vsub.f32 %v2365_v53, %v2375_v62 }
 0xa4e   :  { %v2380_v3 = vmul.f32 %v2378_v63, %v2378_v63 }
 0xa4f   :  { %v2379_v5 = vmul.f32 %v2377_v2, %v2377_v2 }
 0xa50   :  { %v2384_v8 = vsel %vm226_vm0, %v2380_v3, 0.0 }
 0xa51   :  { %2385 = vadd.xlane.f32.xlu0 %v2384_v8  ;;  %v2381_v9 = vsel %vm226_vm0, %v2379_v5, 0.0 }
 0xa52   :  { %2382 = vadd.xlane.f32.xlu1 %v2381_v9 }
 0xade   :  { %v2386_v24 = vpop.xlane.xlu0 %2385 }
 0xadf   :  { %v2388_v26 = vmul.f32 0.03125, %v2386_v24  ;;  %v2383_v28 = vpop.xlane.xlu1 %2382 }
 0xae0   :  { %v2387_v0 = vmul.f32 0.03125, %v2383_v28 }
 0xae1   :  { %v2390_v30 = vadd.f32 1e-12, %v2388_v26 }
 0xae2   :  { %v2389_v31 = vadd.f32 1e-12, %v2387_v0 }
 0xae3   :  { %5618 = vrsqrt.f32 %v2390_v30 }
 0xae4   :  { %5620 = vrsqrt.f32 %v2389_v31 }
 0xaed   :  { %v5619_v32 = vpop.eup %5618 }
 0xaee   :  { %v5621_v33 = vpop.eup %5620  ;;  %v2394_v36 = vmul.f32 %v5619_v32, %v2378_v63 }
 0xaef   :  { %v2393_v37 = vmul.f32 %v5621_v33, %v2377_v2 }
 0xaf0   :  { %v2402_v40 = vmul.f32 %v4848_v27, %v2394_v36 }
 0xaf1   :  { %v2401_v34 = vmul.f32 %v4848_v27, %v2393_v37 }
 0xaf2   :  { %v6702_v45 = vadd.f32 %v4849_v38, %v2402_v40 }
 0xaf3   :  { %v6700_v42 = vadd.f32 %v4849_v38, %v2401_v34 }
 0xaf5   :  { %5256 = vmatprep.mubr.msk.f32.mxu1 %vm226_vm0, %v6700_v42  ;;  %5278 = vmatprep.mubr.msk.f32.mxu0 %vm226_vm0, %v6700_v42 }
 0xaf6   :  { %5257 = vmatmul.mubr.msk.f32.vlgmr.msra.gmra.mrb[22].mxu1 %vm226_vm0, %v6702_v45  ;;  %5279 = vmatmul.mubr.msk.f32.vlgmr.msra.gmra.mrb[22].mxu0 %vm226_vm0, %v6702_v45 }
 0xaf7   :  { %5491 = vmatpush3.bf16.msra.mxu1 %v5488_v23  ;;  %5267 = vmatprep.mubr.msk.f32.mxu1 %vm226_vm0, %v6700_v42 }
 0xaf8   :  { %5493 = vmatprep.subr.bf16.mxu1 %v5492_v13  ;;  %5293 = vmatprep.mubr.msk.f32.mxu0 %vm6006_vm1, %v6005_v14 }
 0xafb   :  { %5495 = vmatpush3.bf16.msra.mxu1 %v5492_v13 }
 0xafc   :  { %5281 = vmatprep.subr.mxu1 %v6005_v14 }
 0xafe   :  { %5268 = vmatmul.mubr.msk.f32.vlgmr.msra.gmra.mrb[24].mxu1 %vm226_vm0, %v6702_v45 }
 0xaff   :  { %5283 = vmatprep.mubr.msk.f32.mxu1 %vm6006_vm1, %v6005_v14 }
 0xbc9   :  { %v5258_v46 = vpop.f32.mrb[22].mxu1  ;;  %v6724_v47 = vpop.f32.mrb[22].mxu0 }
 0xbca   :  { %v2511_v48 = vadd.f32 %v5258_v46, %v4863_v11  ;;  %v2505_v49 = vpop.f32.mrb[23].mxu1  ;;  %v2681_v50 = vpop.f32.mrb[23].mxu0  ;;  %v6778_v12 = vadd.f32 %v6724_v47, %v4877_v10 }
 0xbcb   :  { %v2506_v51 = vadd.f32 %v4863_v11, %v2505_v49  ;;  %v6774_v6 = vadd.f32 %v4877_v10, %v2681_v50 }
 0xbcc   :  { %2694 = vrot.lane.b32.xlu1 %v2511_v48, %s6007_s0 }
 0xbcd   :  { %2696 = vrot.lane.b32.xlu0 %v2506_v51, %s6008_s29 }
 0xbd0   :  { %2692 = vrot.lane.b32.xlu1 %v2506_v51, %s6007_s0 }
 0xbd1   :  { %v5269_v53 = vpop.f32.mrb[24].mxu1 }
 0xbd2   :  { %v2599_v55 = vadd.f32 %v5269_v53, %v4870_v52  ;;  %v2593_v56 = vpop.f32.mrb[25].mxu1  ;;  %v4900_v53 = vld [vmem:[%s7190_s14 + $0xc] ss:$0 sm:$0xff] }
 0xbd3   :  { %v2594_v58 = vadd.f32 %v4870_v52, %v2593_v56  ;;  %v4897_v52 = vld [vmem:[%s7190_s14 + $0x9] ss:$0 sm:$0xff] }
 0xbd4   :  { %2708 = vrot.lane.b32.xlu0 %v2599_v55, %s6007_s0  ;;  %2712 = vrot.lane.b32.xlu1 %v2599_v55, %s6008_s29 }
 0xbd5   :  { %5282 = vmatpush3.xpose.msk.msra.mxu1 %vm528_vm2, %v2594_v58 }
 0xbd6   :  { %5286 = vmatprep.subr.mxu1 %v6005_v14 }
 0xbd8   :  { %2710 = vrot.lane.b32.xlu0 %v2594_v58, %s6008_s29  ;;  %5284 = vmatmul.mubr.msk.f32.vlgmr.msra.gmra.mrb[26].mxu1 %vm528_vm2, %v2506_v51 }
 0xbd9   :  { %2706 = vrot.lane.b32.xlu1 %v2594_v58, %s6007_s0  ;;  %5287 = vmatpush3.xpose.msk.msra.mxu1 %vm528_vm2, %v2599_v55 }
 0xbda   :  { %5288 = vmatprep.mubr.msk.f32.mxu1 %vm6006_vm1, %v6005_v14  ;;  %5296 = vmatprep.subr.mxu1 %v6005_v14 }
 0xbdc   :  { %2714 = vrot.lane.b32.xlu0 %v2594_v58, %s6009_s12  ;;  %5289 = vmatmul.mubr.msk.f32.vlgmr.msra.gmra.mrb[28].mxu1 %vm528_vm2, %v2511_v48 }
 0xbdd   :  { %2698 = vrot.lane.b32.xlu1 %v2511_v48, %s6008_s29  ;;  %5298 = vmatprep.mubr.msk.f32.mxu1 %vm6006_vm1, %v6005_v14 }
 0xbe0   :  { %2700 = vrot.lane.b32.xlu0 %v2506_v51, %s6009_s12 }
 0xbe1   :  { %2716 = vrot.lane.b32.xlu1 %v2599_v55, %s6009_s12 }
 0xbe5   :  { %2702 = vrot.lane.b32.xlu1 %v2511_v48, %s6009_s12 }
 0xbe9   :  { %3475 = vperm.xlu1 %5575, %v4896_v60  }
 0xc3e   :  { %v2695_v61 = vpop.permute.xlu1 %2694 }
 0xc3f   :  { %v2697_v62 = vpop.permute.xlu0 %2696 }
 0xc42   :  { %v2693_v63 = vpop.permute.xlu1 %2692 }
 0xc46   :  { %v2709_v2 = vpop.permute.xlu0 %2708  ;;  %v2713_v3 = vpop.permute.xlu1 %2712 }
 0xc47   :  { %5297 = vmatpush3.xpose.msk.msra.mxu1 %vm528_vm2, %v2709_v2 }
 0xc48   :  { %5306 = vmatprep.subr.mxu1 %v6005_v14 }
 0xc4a   :  { %v2711_v5 = vpop.permute.xlu0 %2710  ;;  %5299 = vmatmul.mubr.msk.f32.vlgmr.msra.gmra.mrb[30].mxu1 %vm528_vm2, %v2695_v61 }
 0xc4b   :  { %v2707_v8 = vpop.permute.xlu1 %2706  ;;  %5307 = vmatpush3.xpose.msk.msra.mxu1 %vm528_vm2, %v2713_v3  ;;  %5308 = vmatprep.mubr.msk.f32.mxu1 %vm6006_vm1, %v6005_v14 }
 0xc4c   :  { %5292 = vmatpush3.xpose.msk.msra.mxu0 %vm528_vm2, %v2707_v8  ;;  %5316 = vmatprep.subr.mxu1 %v6005_v14  ;;  %v4903_v8 = vld [vmem:[%s7190_s14 + $0xf] ss:$0 sm:$0xff] }
 0xc4d   :  { %5301 = vmatprep.subr.mxu0 %v6005_v14 }
 0xc4e   :  { %v2715_v54 = vpop.permute.xlu0 %2714 }
 0xc4f   :  { %5294 = vmatmul.mubr.msk.f32.vlgmr.msra.gmra.mrb[24].mxu0 %vm528_vm2, %v2693_v63  ;;  %v2699_v9 = vpop.permute.xlu1 %2698  ;;  %v4899_v63 = vld [vmem:[%s7190_s14 + $0xb] ss:$0 sm:$0xff] }
 0xc50   :  { %5302 = vmatpush3.xpose.msk.msra.mxu0 %vm528_vm2, %v2711_v5  ;;  %5309 = vmatmul.mubr.msk.f32.vlgmr.msra.gmra.mrb[32].mxu1 %vm528_vm2, %v2699_v9  ;;  %v4902_v5 = vld [vmem:[%s7190_s14 + $0xe] ss:$0 sm:$0xff] }
 0xc51   :  { %5303 = vmatprep.mubr.msk.f32.mxu0 %vm6006_vm1, %v6005_v14  ;;  %5311 = vmatprep.subr.mxu0 %v6005_v14 }
 0xc52   :  { %5318 = vmatprep.mubr.msk.f32.mxu1 %vm6006_vm1, %v6005_v14  ;;  %v2701_v57 = vpop.permute.xlu0 %2700 }
 0xc53   :  { %5304 = vmatmul.mubr.msk.f32.vlgmr.msra.gmra.mrb[26].mxu0 %vm528_vm2, %v2697_v62  ;;  %v2717_v4 = vpop.permute.xlu1 %2716 }
 0xc54   :  { %5312 = vmatpush3.xpose.msk.msra.mxu0 %vm528_vm2, %v2715_v54  ;;  %5317 = vmatpush3.xpose.msk.msra.mxu1 %vm528_vm2, %v2717_v4 }
 0xc55   :  { %5313 = vmatprep.mubr.msk.f32.mxu0 %vm6006_vm1, %v6005_v14  ;;  %5321 = vmatprep.subr.mxu0 %v6005_v14 }
 0xc56   :  { %5326 = vmatprep.subr.mxu1 %v6005_v14 }
 0xc57   :  { %5314 = vmatmul.mubr.msk.f32.vlgmr.msra.gmra.mrb[28].mxu0 %vm528_vm2, %v2701_v57  ;;  %v2703_v15 = vpop.permute.xlu1 %2702 }
 0xc58   :  { %5319 = vmatmul.mubr.msk.f32.vlgmr.msra.gmra.mrb[34].mxu1 %vm528_vm2, %v2703_v15  ;;  %5322 = vmatpush3.msra.mxu0 %v6774_v6 }
 0xc59   :  { %5327 = vmatpush3.msra.mxu1 %v6778_v12  ;;  %5328 = vmatprep.mubr.msk.f32.mxu1 %vm6006_vm1, %v6005_v14 }
 0xc5a   :  { %5336 = vmatprep.subr.mxu1 %v6005_v14  ;;  %5323 = vmatprep.mubr.msk.f32.mxu0 %vm6006_vm1, %v6005_v14 }
 0xc5b   :  { %5331 = vmatprep.subr.mxu0 %v6005_v14 }
 0xc68   :  { %v6831_v55 = vpop.permute.xlu1 %3475 }
 0xcab   :  { %v2808_v16 = vpop.f32.mrb[26].mxu1 }
 0xcac   :  { %v3330_v18 = vmul.f32 0.35355338, %v2808_v16  ;;  %v5285_v43 = vpop.f32.mrb[27].mxu1 }
 0xcae   :  { %v6791_v20 = vadd.f32 %v3330_v18, %v6421_v59 }
 0xcaf   :  { %v2882_v21 = vpop.f32.mrb[28].mxu1 }
 0xcb0   :  { %v3331_v17 = vmul.f32 0.35355338, %v2882_v21  ;;  %v5290_v22 = vpop.f32.mrb[29].mxu1  ;;  %v3346_v23 = vsel %vm528_vm2, %v6791_v20, -inf }
 0xcb1   :  { %3347 = vmax.xlane.f32.xlu0 %v3346_v23 }
 0xcb2   :  { %v3339_v24 = vadd.f32 %v3331_v17, %v6427_v1 }
 0xcb4   :  { %v3349_v26 = vsel %vm528_vm2, %v3339_v24, -inf }
 0xcb5   :  { %3350 = vmax.xlane.f32.xlu1 %v3349_v26 }
 0xd1d   :  { %v3030_v28 = vpop.f32.mrb[30].mxu1 }
 0xd1e   :  { %v3333_v0 = vmul.f32 0.35355338, %v3030_v28  ;;  %v5300_v30 = vpop.f32.mrb[31].mxu1 }
 0xd20   :  { %v6798_v31 = vadd.f32 %v3333_v0, %v6440_v25 }
 0xd22   :  { %v2956_v59 = vpop.f32.mrb[24].mxu0  ;;  %v3355_v32 = vsel %vm528_vm2, %v6798_v31, -inf }
 0xd23   :  { %v3332_v27 = vmul.f32 0.35355338, %v2956_v59  ;;  %v5295_v33 = vpop.f32.mrb[25].mxu0  ;;  %3356 = vmax.xlane.f32.xlu0 %v3355_v32  ;;  %v3178_v36 = vpop.f32.mrb[32].mxu1 }
 0xd24   :  { %v3335_v37 = vmul.f32 0.35355338, %v3178_v36  ;;  %v5310_v38 = vpop.f32.mrb[33].mxu1 }
 0xd25   :  { %v6803_v1 = vadd.f32 %v3332_v27, %v6437_v19 }
 0xd26   :  { %v3104_v40 = vpop.f32.mrb[26].mxu0  ;;  %v6808_v41 = vadd.f32 %v3335_v37, %v6454_v35 }
 0xd27   :  { %v3334_v34 = vmul.f32 0.35355338, %v3104_v40  ;;  %v5305_v39 = vpop.f32.mrb[27].mxu0  ;;  %v3352_v25 = vsel %vm528_vm2, %v6803_v1, -inf }
 0xd28   :  { %3353 = vmax.xlane.f32.xlu0 %v3352_v25  ;;  %v3361_v19 = vsel %vm528_vm2, %v6808_v41, -inf }
 0xd29   :  { %v3342_v13 = vadd.f32 %v3334_v34, %v6446_v29  ;;  %v4898_v29 = vld [vmem:[%s7190_s14 + $0xa] ss:$0 sm:$0xff] }
 0xd2a   :  { %v3252_v11 = vpop.f32.mrb[28].mxu0 }
 0xd2b   :  { %v5315_v46 = vpop.f32.mrb[29].mxu0  ;;  %v3326_v47 = vpop.f32.mrb[34].mxu1  ;;  %v3358_v48 = vsel %vm528_vm2, %v3342_v13, -inf }
 0xd2c   :  { %v3337_v49 = vmul.f32 0.35355338, %v3326_v47  ;;  %3359 = vmax.xlane.f32.xlu1 %v3358_v48  ;;  %3362 = vmax.xlane.f32.xlu0 %v3361_v19  ;;  %v5320_v50 = vpop.f32.mrb[35].mxu1 }
 0xd2e   :  { %v3345_v51 = vadd.f32 %v3337_v49, %v6467_v44  ;;  %v3336_v44 = vmul.f32 0.35355338, %v3252_v11 }
 0xd30   :  { %v3367_v35 = vsel %vm528_vm2, %v3345_v51, -inf  ;;  %v6834_v56 = vadd.f32 %v3336_v44, %v6497_v7  ;;  %v4901_v7 = vld [vmem:[%s7190_s14 + $0xd] ss:$0 sm:$0xff] }
 0xd31   :  { %3368 = vmax.xlane.f32.xlu0 %v3367_v35 }
 0xd32   :  { %v3364_v61 = vsel %vm528_vm2, %v6834_v56, -inf }
 0xd3d   :  { %3483 = vperm.xlu1 %5575, %v4898_v29  }
 0xd3e   :  { %v3348_v9 = vpop.xlane.xlu0 %3347 }
 0xd3f   :  { %v3370_v54 = vsub.f32 %v6791_v20, %v3348_v9 }
 0xd41   :  { %v3378_v10 = vmul.f32 1.442695, %v3370_v54 }
 0xd42   :  { %v3351_v58 = vpop.xlane.xlu1 %3350 }
 0xd43   :  { %v3371_v60 = vsub.f32 %v3339_v24, %v3351_v58 }
 0xd45   :  { %v3380_v62 = vmul.f32 1.442695, %v3371_v60 }
 0xd47   :  { %3479 = vperm.xlu0 %5576, %v4897_v52   ;;  %5622 = vpow2.f32 %v3380_v62 }
 0xd48   :  { %5624 = vpow2.f32 %v3378_v10 }
 0xd4b   :  { %3491 = vperm.xlu0 %5576, %v4900_v53  }
 0xd4f   :  { %2720 = vrot.lane.b32.xlu0 %v6774_v6, %s6007_s0 }
 0xd51   :  { %v6841_v2 = vpop.eup %5622 }
 0xd52   :  { %v3397_v3 = vsel %vm528_vm2, %v6841_v2, 0.0  ;;  %v6857_v4 = vpop.eup %5624 }
 0xd53   :  { %2722 = vrot.lane.b32.xlu0 %v6778_v12, %s6007_s0  ;;  %v3394_v57 = vsel %vm528_vm2, %v6857_v4, 0.0 }
 0xd57   :  { %2726 = vrot.lane.b32.xlu0 %v6774_v6, %s6008_s29 }
 0xd61   :  { %3365 = vmax.xlane.f32.xlu1 %v3364_v61 }
 0xd72   :  { %3487 = vperm.xlu1 %5575, %v4899_v63  }
 0xd76   :  { %3495 = vperm.xlu1 %5575, %v4901_v7   ;;  %3398 = vadd.xlane.f32.xlu0 %v3397_v3 }
 0xd7a   :  { %3499 = vperm.xlu1 %5575, %v4902_v5  }
 0xd7e   :  { %3503 = vperm.xlu1 %5575, %v4903_v8  }
 0xd82   :  { %2728 = vrot.lane.b32.xlu1 %v6778_v12, %s6008_s29  ;;  %s7191_s29 = smov 24  }
 0xda6   :  { %3395 = vadd.xlane.f32.xlu1 %v3394_v57 }
 0xdb0   :  { %v3357_v15 = vpop.xlane.xlu0 %3356 }
 0xdb1   :  { %v3373_v16 = vsub.f32 %v6798_v31, %v3357_v15 }
 0xdb3   :  { %v3384_v18 = vmul.f32 1.442695, %v3373_v16 }
 0xdb5   :  { %5626 = vpow2.f32 %v3384_v18  ;;  %v3354_v43 = vpop.xlane.xlu0 %3353 }
 0xdb6   :  { %v3372_v21 = vsub.f32 %v6803_v1, %v3354_v43 }
 0xdb8   :  { %v3382_v17 = vmul.f32 1.442695, %v3372_v21 }
 0xdb9   :  { %v3360_v22 = vpop.xlane.xlu1 %3359  ;;  %v3363_v23 = vpop.xlane.xlu0 %3362 }
 0xdba   :  { %5628 = vpow2.f32 %v3382_v17  ;;  %v3374_v20 = vsub.f32 %v3342_v13, %v3360_v22  ;;  %v3375_v24 = vsub.f32 %v6808_v41, %v3363_v23 }
 0xdbc   :  { %v3386_v26 = vmul.f32 1.442695, %v3374_v20  ;;  %v3388_v28 = vmul.f32 1.442695, %v3375_v24 }
 0xdbd   :  { %v3484_v25 = vpop.permute.xlu1 %3483 }
 0xdbe   :  { %5630 = vpow2.f32 %v3386_v26  ;;  %v3369_v0 = vpop.xlane.xlu0 %3368 }
 0xdbf   :  { %v6864_v30 = vpop.eup %5626  ;;  %5632 = vpow2.f32 %v3388_v28  ;;  %v3377_v31 = vsub.f32 %v3345_v51, %v3369_v0 }
 0xdc0   :  { %v3403_v59 = vsel %vm528_vm2, %v6864_v30, 0.0 }
 0xdc1   :  { %v3392_v32 = vmul.f32 1.442695, %v3377_v31  ;;  %3404 = vadd.xlane.f32.xlu0 %v3403_v59 }
 0xdc3   :  { %5634 = vpow2.f32 %v3392_v32 }
 0xdc4   :  { %v6868_v27 = vpop.eup %5628 }
 0xdc5   :  { %v3400_v33 = vsel %vm528_vm2, %v6868_v27, 0.0 }
 0xdc6   :  { %3401 = vadd.xlane.f32.xlu1 %v3400_v33  ;;  %v3480_v39 = vpop.permute.xlu0 %3479 }
 0xdc8   :  { %v6872_v36 = vpop.eup %5630 }
 0xdc9   :  { %v6874_v37 = vpop.eup %5632  ;;  %v3406_v38 = vsel %vm528_vm2, %v6872_v36, 0.0 }
 0xdca   :  { %3407 = vadd.xlane.f32.xlu1 %v3406_v38  ;;  %v3409_v1 = vsel %vm528_vm2, %v6874_v37, 0.0  ;;  %v6886_v41 = vpop.permute.xlu0 %3491 }
 0xdcb   :  { %3410 = vadd.xlane.f32.xlu0 %v3409_v1 }
 0xdcd   :  { %v6880_v40 = vpop.eup %5634 }
 0xdce   :  { %v3415_v34 = vsel %vm528_vm2, %v6880_v40, 0.0  ;;  %v2721_v47 = vpop.permute.xlu0 %2720 }
 0xdcf   :  { %3416 = vadd.xlane.f32.xlu0 %v3415_v34 }
 0xdd2   :  { %v2723_v48 = vpop.permute.xlu0 %2722 }
 0xdd6   :  { %v2727_v50 = vpop.permute.xlu0 %2726 }
 0xde5   :  { %2732 = vrot.lane.b32.xlu0 %v6774_v6, %s6009_s12 }
 0xdee   :  { %v3366_v13 = vpop.xlane.xlu1 %3365 }
 0xdef   :  { %v3376_v11 = vsub.f32 %v6834_v56, %v3366_v13  ;;  %v4139_v13 = vld [vmem:[#allocation8 + $0x30] sm:$0xff] }
 0xdf1   :  { %v3390_v46 = vmul.f32 1.442695, %v3376_v11 }
 0xdf2   :  { %v3488_v52 = vpop.permute.xlu1 %3487 }
 0xdf3   :  { %5636 = vpow2.f32 %v3390_v46  ;;  %v4140_v46 = vld [vmem:[#allocation8 + $0x38] sm:$0xff] }
 0xdf6   :  { %v3496_v53 = vpop.permute.xlu1 %3495 }
 0xdfa   :  { %v6901_v44 = vpop.permute.xlu1 %3499 }
 0xdfd   :  { %v6889_v19 = vpop.eup %5636 }
 0xdfe   :  { %v3412_v49 = vsel %vm528_vm2, %v6889_v19, 0.0  ;;  %v3504_v56 = vpop.permute.xlu1 %3503 }
 0xdff   :  { %3413 = vadd.xlane.f32.xlu1 %v3412_v49 }
 0xe02   :  { %v2729_v58 = vpop.permute.xlu1 %2728 }
 0xe03   :  { %v3399_v51 = vpop.xlane.xlu0 %3398 }
 0xe04   :  { %5638 = vrcp.f32 %v3399_v51 }
 0xe0e   :  { %v5639_v6 = vpop.eup %5638 }
 0xe0f   :  { %v3427_v35 = vmul.f32 %v5639_v6, %v6841_v2 }
 0xe10   :  { %2734 = vrot.lane.b32.xlu1 %v6778_v12, %s6009_s12 }
 0xe11   :  { %v3507_v29 = vmul.f32 %v3480_v39, %v3427_v35 }
 0xe13   :  { %3518 = vst.msk [vmem:[#allocation23 + $0x20] sm:$0xff] %vm528_vm2, %v3507_v29  ;;  %5329 = vmatmul.mubr.msk.f32.vlgmr.msra.gmra.mrb[36].mxu1 %vm528_vm2, %v3507_v29 }
 0xe14   :  { %5337 = vmatpush3.msra.mxu1 %v2723_v48  ;;  %5338 = vmatprep.mubr.msk.f32.mxu1 %vm6006_vm1, %v6005_v14 }
 0xe15   :  { %5346 = vmatprep.subr.mxu1 %v6005_v14 }
 0xe33   :  { %v3396_v60 = vpop.xlane.xlu1 %3395 }
 0xe34   :  { %5640 = vrcp.f32 %v3396_v60 }
 0xe3e   :  { %v5641_v12 = vpop.eup %5640 }
 0xe3f   :  { %v3426_v61 = vmul.f32 %v5641_v12, %v6857_v4 }
 0xe41   :  { %v3506_v62 = vmul.f32 %v6831_v55, %v3426_v61 }
 0xe43   :  { %3514 = vst.msk [vmem:[#allocation23] sm:$0xff] %vm528_vm2, %v3506_v62  ;;  %5324 = vmatmul.mubr.msk.f32.vlgmr.msra.gmra.mrb[30].mxu0 %vm528_vm2, %v3506_v62  ;;  %v4912_v62 = vld [vmem:[#allocation10 + $0x1] ss:$0 sm:$0xff] }
 0xe44   :  { %5332 = vmatpush3.msra.mxu0 %v2721_v47  ;;  %5333 = vmatprep.mubr.msk.f32.mxu0 %vm6006_vm1, %v6005_v14  ;;  %v5508_v47 = vpack.c.bf16 %v4140_v46, %v4139_v13  ;;  %v4923_v46 = vld [vmem:[%s7130_s15 + $0x58] sm:$0xff] }
 0xe45   :  { %5341 = vmatprep.subr.mxu0 %v6005_v14 }
 0xe4e   :  { %v3405_v63 = vpop.xlane.xlu0 %3404 }
 0xe4f   :  { %5642 = vrcp.f32 %v3405_v63 }
 0xe53   :  { %v3402_v2 = vpop.xlane.xlu1 %3401 }
 0xe54   :  { %5644 = vrcp.f32 %v3402_v2 }
 0xe57   :  { %v3408_v7 = vpop.xlane.xlu1 %3407 }
 0xe58   :  { %5646 = vrcp.f32 %v3408_v7  ;;  %v3411_v3 = vpop.xlane.xlu0 %3410 }
 0xe59   :  { %v5643_v5 = vpop.eup %5642  ;;  %5648 = vrcp.f32 %v3411_v3 }
 0xe5a   :  { %v3429_v55 = vmul.f32 %v5643_v5, %v6864_v30 }
 0xe5c   :  { %v3417_v8 = vpop.xlane.xlu0 %3416  ;;  %v3509_v9 = vmul.f32 %v3488_v52, %v3429_v55 }
 0xe5d   :  { %5650 = vrcp.f32 %v3417_v8 }
 0xe5e   :  { %v5645_v54 = vpop.eup %5644  ;;  %3519 = vst.msk [vmem:[#allocation23 + $0x28] sm:$0xff] %vm528_vm2, %v3509_v9  ;;  %5339 = vmatmul.mubr.msk.f32.vlgmr.msra.gmra.mrb[38].mxu1 %vm528_vm2, %v3509_v9 }
 0xe5f   :  { %v3428_v10 = vmul.f32 %v5645_v54, %v6868_v27  ;;  %5347 = vmatpush3.msra.mxu1 %v2729_v58  ;;  %5348 = vmatprep.mubr.msk.f32.mxu1 %vm6006_vm1, %v6005_v14 }
 0xe60   :  { %5356 = vmatprep.subr.mxu1 %v6005_v14  ;;  %v2733_v22 = vpop.permute.xlu0 %2732 }
 0xe61   :  { %v3508_v4 = vmul.f32 %v3484_v25, %v3428_v10  ;;  %v4137_v25 = vld [vmem:[#allocation8 + $0x20] sm:$0xff] }
 0xe62   :  { %v5647_v57 = vpop.eup %5646 }
 0xe63   :  { %v5649_v15 = vpop.eup %5648  ;;  %v3430_v16 = vmul.f32 %v5647_v57, %v6872_v36  ;;  %3515 = vst.msk [vmem:[#allocation23 + $0x8] sm:$0xff] %vm528_vm2, %v3508_v4  ;;  %5334 = vmatmul.mubr.msk.f32.vlgmr.msra.gmra.mrb[32].mxu0 %vm528_vm2, %v3508_v4 }
 0xe64   :  { %v3431_v18 = vmul.f32 %v5649_v15, %v6874_v37  ;;  %5342 = vmatpush3.msra.mxu0 %v2727_v50  ;;  %5343 = vmatprep.mubr.msk.f32.mxu0 %vm6006_vm1, %v6005_v14 }
 0xe65   :  { %5351 = vmatprep.subr.mxu0 %v6005_v14  ;;  %v3510_v43 = vmul.f32 %v6886_v41, %v3430_v16  ;;  %v4138_v41 = vld [vmem:[#allocation8 + $0x28] sm:$0xff] }
 0xe66   :  { %v3511_v21 = vmul.f32 %v3496_v53, %v3431_v18  ;;  %v5504_v11 = vpack.c.bf16 %v4138_v41, %v4137_v25  ;;  %v4920_v25 = vld [vmem:[%s7130_s15 + $0x40] sm:$0xff]  ;;  %v4921_v41 = vld [vmem:[%s7130_s15 + $0x48] sm:$0xff] }
 0xe67   :  { %v5651_v17 = vpop.eup %5650  ;;  %3516 = vst.msk [vmem:[#allocation23 + $0x10] sm:$0xff] %vm528_vm2, %v3510_v43  ;;  %5344 = vmatmul.mubr.msk.f32.vlgmr.msra.gmra.mrb[34].mxu0 %vm528_vm2, %v3510_v43  ;;  %v5520_v13 = vpack.c.bf16 %v4921_v41, %v4920_v25 }
 0xe68   :  { %v3433_v23 = vmul.f32 %v5651_v17, %v6880_v40  ;;  %3520 = vst.msk [vmem:[#allocation23 + $0x30] sm:$0xff] %vm528_vm2, %v3511_v21  ;;  %5349 = vmatmul.mubr.msk.f32.vlgmr.msra.gmra.mrb[40].mxu1 %vm528_vm2, %v3511_v21  ;;  %5352 = vmatpush3.msra.mxu0 %v2733_v22  ;;  %v4280_v17 = vld [vmem:[#allocation14 + $0x28] sm:$0xff] }
 0xe69   :  { %5358 = vmatprep.mubr.msk.f32.mxu1 %vm6006_vm1, %v6005_v14  ;;  %5353 = vmatprep.mubr.msk.f32.mxu0 %vm6006_vm1, %v6005_v14 }
 0xe6a   :  { %v3513_v20 = vmul.f32 %v3504_v56, %v3433_v23  ;;  %5505 = vmatprep.subr.bf16.mxu0 %v5504_v11  ;;  %v4281_v23 = vld [vmem:[#allocation14 + $0x30] sm:$0xff] }
 0xe6c   :  { %3521 = vst.msk [vmem:[#allocation23 + $0x38] sm:$0xff] %vm528_vm2, %v3513_v20 }
 0xe8c   :  { %v3414_v24 = vpop.xlane.xlu1 %3413 }
 0xe8d   :  { %5652 = vrcp.f32 %v3414_v24 }
 0xe90   :  { %v2735_v26 = vpop.permute.xlu1 %2734 }
 0xe91   :  { %5357 = vmatpush3.msra.mxu1 %v2735_v26 }
 0xe92   :  { %5359 = vmatmul.mubr.msk.f32.vlgmr.msra.gmra.mrb[42].mxu1 %vm528_vm2, %v3513_v20  ;;  %v4282_v20 = vld [vmem:[#allocation14 + $0x38] sm:$0xff] }
 0xe93   :  { %v5516_v24 = vpack.c.bf16 %v4282_v20, %v4281_v23 }
 0xe97   :  { %v5653_v28 = vpop.eup %5652 }
 0xe98   :  { %v3432_v0 = vmul.f32 %v5653_v28, %v6889_v19 }
 0xe9a   :  { %v3512_v30 = vmul.f32 %v6901_v44, %v3432_v0 }
 0xe9c   :  { %3517 = vst.msk [vmem:[#allocation23 + $0x18] sm:$0xff] %vm528_vm2, %v3512_v30  ;;  %5354 = vmatmul.mubr.msk.f32.vlgmr.msra.gmra.mrb[36].mxu0 %vm528_vm2, %v3512_v30 }
 0xe9d   :  { %5507 = vmatpush3.bf16.msra.mxu0 %v5504_v11  ;;  %v4922_v11 = vld [vmem:[%s7130_s15 + $0x50] sm:$0xff] }
 0xe9e   :  { %5509 = vmatprep.subr.bf16.mxu0 %v5508_v47 }
 0xea1   :  { %5511 = vmatpush3.bf16.msra.mxu0 %v5508_v47  ;;  %v5524_v47 = vpack.c.bf16 %v4923_v46, %v4922_v11 }
 0xea2   :  { %5521 = vmatprep.subr.bf16.mxu0 %v5520_v13 }
 0xee6   :  { %v3664_v31 = vpop.f32.mrb[36].mxu1 }
 0xee7   :  { %v5330_v59 = vpop.f32.mrb[37].mxu1 }
 0xf16   :  { %v3591_v32 = vpop.f32.mrb[30].mxu0 }
 0xf17   :  { %v5325_v27 = vpop.f32.mrb[31].mxu0 }
 0xf18   :  { %v4915_v27 = vld [vmem:[#allocation11 + $0x1] ss:$0 sm:$0xff] }
 0xf31   :  { %v3810_v33 = vpop.f32.mrb[38].mxu1 }
 0xf32   :  { %4110 = vrot.lane.b32.xlu1 %v3810_v33, %s5998_s2  ;;  %v5340_v36 = vpop.f32.mrb[39].mxu1 }
 0xf33   :  { %v4916_v36 = vld [vmem:[#allocation13 + $0x1] ss:$0 sm:$0xff] }
 0xf36   :  { %v3737_v37 = vpop.f32.mrb[32].mxu0 }
 0xf37   :  { %4108 = vrot.lane.b32.xlu0 %v3737_v37, %s5998_s2  ;;  %v5335_v38 = vpop.f32.mrb[33].mxu0 }
 0xf3a   :  { %v3883_v1 = vpop.f32.mrb[34].mxu0 }
 0xf3b   :  { %v3956_v40 = vpop.f32.mrb[40].mxu1  ;;  %4116 = vrot.lane.b32.xlu0 %v3883_v1, %s7183_s22  ;;  %v5345_v34 = vpop.f32.mrb[35].mxu0 }
 0xf3c   :  { %4118 = vrot.lane.b32.xlu1 %v3956_v40, %s7183_s22  ;;  %v5350_v39 = vpop.f32.mrb[41].mxu1 }
 0xf65   :  { %v4102_v48 = vpop.f32.mrb[42].mxu1 }
 0xf66   :  { %4126 = vrot.lane.b32.xlu1 %v4102_v48, %s7191_s29  ;;  %v5360_v19 = vpop.f32.mrb[43].mxu1  ;;  %v4924_v48 = vld [vmem:[%s7130_s15 + $0x60] sm:$0xff] }
 0xf67   :  { %v4925_v19 = vld [vmem:[%s7130_s15 + $0x68] sm:$0xff] }
 0xf6f   :  { %v4029_v49 = vpop.f32.mrb[36].mxu0 }
 0xf70   :  { %4124 = vrot.lane.b32.xlu0 %v4029_v49, %s7191_s29  ;;  %v5355_v50 = vpop.f32.mrb[37].mxu0  ;;  %v5528_v49 = vpack.c.bf16 %v4925_v19, %v4924_v48 }
 0xf71   :  { %v4926_v50 = vld [vmem:[%s7130_s15 + $0x70] sm:$0xff] }
 0xfa4   :  { %v4111_v6 = vpop.permute.xlu1 %4110 }
 0xfa5   :  { %v4131_v44 = vsel %vm528_vm2, %v3664_v31, %v4111_v6 }
 0xfa9   :  { %v4109_v51 = vpop.permute.xlu0 %4108 }
 0xfaa   :  { %v4130_v52 = vsel %vm528_vm2, %v3591_v32, %v4109_v51  ;;  %v4927_v51 = vld [vmem:[%s7130_s15 + $0x78] sm:$0xff]  ;;  %s6014_s15 = smov [#allocation18]  }
 0xfab   :  { %v5532_v6 = vpack.c.bf16 %v4927_v51, %v4926_v50  ;;  %s4735_s28 = sshll.u32 %s6014_s15, 4  ;;  %s4736_s28 = int_to_ptr.vmem [resolvable:$true] %s4735_s28 }
 0xfac   :  { %s5866_s30 = scalar_lea.vmem %s4736_s28, 32  ;;  %p5871_p3 = scmp.lt.s32.totalorder %s4736_s28, %s4736_s28 }
 0xfad   :  { %v4117_v29 = vpop.permute.xlu0 %4116  ;;  %p5867_p2 = scmp.ne.s32.totalorder %s4736_s28, %s5866_s30  ;;  %p5872_p4 = scmp.lt.s32.totalorder %s5866_s30, %s5866_s30 }
 0xfae   :  { %v4119_v35 = vpop.permute.xlu1 %4118  ;;  %v4132_v56 = vsel %vm2013_vm3, %v4130_v52, %v4117_v29 }
 0xfaf   :  { %v4133_v60 = vsel %vm2013_vm3, %v4131_v44, %v4119_v35  ;;  %v4917_v35 = vld [vmem:[#allocation16 + $0x1] ss:$0 sm:$0xff]  ;;  %p5873_p5 = por %p5872_p4, %p5871_p3 }
 0xfb1   :  { %p5874_p6 = pnand %p5873_p5, %p5867_p2 }
 0xfd8   :  { %v4127_v53 = vpop.permute.xlu1 %4126 }
 0xfd9   :  { %v4135_v61 = vsel %vm2016_vm4, %v4133_v60, %v4127_v53 }
 0xfe2   :  { %v4125_v58 = vpop.permute.xlu0 %4124 }
 0xfe3   :  { %v4134_v12 = vsel %vm2016_vm4, %v4132_v56, %v4125_v58 }
 0xfe4   :  { %5369 = vmatprep.mubr.msk.f32.mxu0 %vm226_vm0, %v4134_v12 }
 0xfe5   :  { %5370 = vmatmul.mubr.msk.f32.vlgmr.msra.gmra.mrb[38].mxu0 %vm226_vm0, %v4135_v61 }
 0xfe6   :  { %5523 = vmatpush3.bf16.msra.mxu0 %v5520_v13 }
 0xfe7   :  { %5525 = vmatprep.subr.bf16.mxu0 %v5524_v47 }
 0xfea   :  { %5527 = vmatpush3.bf16.msra.mxu0 %v5524_v47  ;;  %v4934_v47 = vld [vmem:[%s7132_s17 + $0x1] ss:$0 sm:$0xff] }
 0xfeb   :  { %5529 = vmatprep.subr.bf16.mxu0 %v5528_v49 }
 0xfee   :  { %5531 = vmatpush3.bf16.msra.mxu0 %v5528_v49  ;;  %v4935_v49 = vld [vmem:[%s7133_s18 + $0x1] ss:$0 sm:$0xff] }
 0xfef   :  { %5533 = vmatprep.subr.bf16.mxu0 %v5532_v6 }
 0xff2   :  { %5535 = vmatpush3.bf16.msra.mxu0 %v5532_v6 }
0x10b8   :  { %v5371_v63 = vpop.f32.mrb[38].mxu0 }
0x10b9   :  { %v4227_v2 = vadd.f32 %v5371_v63, %v4912_v62  ;;  %v4221_v7 = vpop.f32.mrb[39].mxu0 }
0x10ba   :  { %v4222_v3 = vadd.f32 %v4912_v62, %v4221_v7 }
0x10bb   :  { %v4231_v5 = vadd.f32 %v4227_v2, %v6702_v45 }
0x10bc   :  { %v4230_v55 = vadd.f32 %v4222_v3, %v6700_v42  ;;  %v4279_v42 = vld [vmem:[#allocation14 + $0x20] sm:$0xff] }
0x10bd   :  { %v4239_v8 = vsel %vm226_vm0, %v4231_v5, 0.0  ;;  %v5512_v22 = vpack.c.bf16 %v4280_v17, %v4279_v42 }
0x10be   :  { %4240 = vadd.xlane.f32.xlu1 %v4239_v8  ;;  %v4236_v9 = vsel %vm226_vm0, %v4230_v55, 0.0 }
0x10bf   :  { %4237 = vadd.xlane.f32.xlu0 %v4236_v9  ;;  %5513 = vmatprep.subr.bf16.mxu1 %v5512_v22 }
0x10c0   :  { %5515 = vmatpush3.bf16.msra.mxu1 %v5512_v22 }
0x10c1   :  { %5517 = vmatprep.subr.bf16.mxu1 %v5516_v24 }
0x10c4   :  { %5519 = vmatpush3.bf16.msra.mxu1 %v5516_v24 }
0x114b   :  { %v4241_v54 = vpop.xlane.xlu1 %4240 }
0x114c   :  { %v4243_v10 = vmul.f32 0.03125, %v4241_v54  ;;  %v4238_v4 = vpop.xlane.xlu0 %4237 }
0x114d   :  { %v4242_v57 = vmul.f32 0.03125, %v4238_v4 }
0x114e   :  { %v4245_v15 = vsub.f32 %v4231_v5, %v4243_v10 }
0x114f   :  { %v4244_v16 = vsub.f32 %v4230_v55, %v4242_v57 }
0x1150   :  { %v4247_v21 = vmul.f32 %v4245_v15, %v4245_v15 }
0x1151   :  { %v4246_v18 = vmul.f32 %v4244_v16, %v4244_v16 }
0x1152   :  { %v4251_v45 = vsel %vm226_vm0, %v4247_v21, 0.0 }
0x1153   :  { %v4248_v43 = vsel %vm226_vm0, %v4246_v18, 0.0 }
0x1154   :  { %4249 = vadd.xlane.f32.xlu0 %v4248_v43 }
0x1158   :  { %4252 = vadd.xlane.f32.xlu0 %v4251_v45 }
0x11e1   :  { %v4250_v26 = vpop.xlane.xlu0 %4249 }
0x11e2   :  { %v4254_v28 = vmul.f32 0.03125, %v4250_v26 }
0x11e4   :  { %v4256_v0 = vadd.f32 1e-12, %v4254_v28 }
0x11e5   :  { %v4253_v30 = vpop.xlane.xlu0 %4252 }
0x11e6   :  { %5654 = vrsqrt.f32 %v4256_v0  ;;  %v4255_v31 = vmul.f32 0.03125, %v4253_v30 }
0x11e8   :  { %v4257_v59 = vadd.f32 1e-12, %v4255_v31 }
0x11ea   :  { %5656 = vrsqrt.f32 %v4257_v59 }
0x11f0   :  { %v5655_v32 = vpop.eup %5654 }
0x11f1   :  { %v4260_v33 = vmul.f32 %v5655_v32, %v4244_v16 }
0x11f3   :  { %v4268_v37 = vmul.f32 %v4915_v27, %v4260_v33  ;;  %v4541_v33 = vld [vmem:[%s7134_s19 + $0x8] sm:$0xff] }
0x11f4   :  { %v5657_v38 = vpop.eup %5656 }
0x11f5   :  { %v4261_v1 = vmul.f32 %v5657_v38, %v4245_v15  ;;  %v4276_v40 = vadd.f32 %v4916_v36, %v4268_v37  ;;  %v4929_v15 = vld [vmem:[%s7131_s16 + $0x1] ss:$0 sm:$0xff]  ;;  %v6013_v37 = vmov 0.0|0.0  }
0x11f6   :  { %5536 = vmatprep.subr.bf16.mxu1 %v6013_v37 }
0x11f7   :  { %v4269_v34 = vmul.f32 %v4915_v27, %v4261_v1  ;;  %5380 = vmatprep.mubr.msk.f32.mxu1 %vm226_vm0, %v4276_v40  ;;  %v4540_v27 = vld [vmem:[%s7134_s19] sm:$0xff]  ;;  %v4543_v1 = vld [vmem:[%s7134_s19 + $0x18] sm:$0xff] }
0x11f8   :  { %v5537_v38 = vpack.c.bf16 %v4541_v33, %v4540_v27 }
0x11f9   :  { %v4277_v39 = vadd.f32 %v4916_v36, %v4269_v34  ;;  %v4542_v36 = vld [vmem:[%s7134_s19 + $0x10] sm:$0xff] }
0x11fb   :  { %5381 = vmatmul.mubr.msk.f32.vlgmr.msra.gmra.mrb[44].mxu1 %vm226_vm0, %v4277_v39 }
0x11fc   :  { %5410 = vmatprep.mubr.msk.f32.mxu1 %vm6006_vm1, %v6005_v14  ;;  %5538 = vmatpush3.bf16.msra.mxu1 %v5537_v38 }
0x11fd   :  { %5539 = vmatprep.subr.bf16.mxu1 %v6013_v37 }
0x12ce   :  { %v5382_v29 = vpop.f32.mrb[44].mxu1 }
0x12cf   :  { %v4369_v52 = vadd.f32 %v5382_v29, %v4917_v35  ;;  %v4363_v53 = vpop.f32.mrb[45].mxu1 }
0x12d0   :  { %v4364_v44 = vadd.f32 %v4917_v35, %v4363_v53 }
0x12d1   :  { %v4375_v56 = vmul.f32 0.044715, %v4369_v52  ;;  %v4373_v10 = vmul.f32 0.5, %v4369_v52 }
0x12d2   :  { %v4374_v58 = vmul.f32 0.044715, %v4364_v44  ;;  %v4372_v9 = vmul.f32 0.5, %v4364_v44 }
0x12d3   :  { %v4377_v60 = vmul.f32 %v4375_v56, %v4369_v52 }
0x12d4   :  { %v4376_v12 = vmul.f32 %v4374_v58, %v4364_v44  ;;  %v4631_v58 = vld [vmem:[%s7136_s21] sm:$0xff] }
0x12d5   :  { %v4379_v61 = vmul.f32 %v4377_v60, %v4369_v52  ;;  %v4632_v60 = vld [vmem:[%s7136_s21 + $0x8] sm:$0xff] }
0x12d6   :  { %v4378_v62 = vmul.f32 %v4376_v12, %v4364_v44  ;;  %v4633_v12 = vld [vmem:[%s7136_s21 + $0x10] sm:$0xff] }
0x12d7   :  { %v4381_v63 = vadd.f32 %v4379_v61, %v4369_v52  ;;  %v5543_v61 = vpack.c.bf16 %v4632_v60, %v4631_v58 }
0x12d8   :  { %v4380_v2 = vadd.f32 %v4378_v62, %v4364_v44  ;;  %v4634_v62 = vld [vmem:[%s7136_s21 + $0x18] sm:$0xff]  ;;  %s6015_s21 = smov [#allocation21]  }
0x12d9   :  { %v4383_v7 = vmul.f32 0.7978846, %v4381_v63  ;;  %v5546_v63 = vpack.c.bf16 %v4634_v62, %v4633_v12  ;;  %s4754_s16 = sshll.u32 %s6015_s21, 4  ;;  %s7036_s16 = int_to_ptr.vmem [resolvable:$true] %s4754_s16 }
0x12da   :  { %v4382_v3 = vmul.f32 0.7978846, %v4380_v2 }
0x12db   :  { %5658 = vtanh.f32 %v4383_v7 }
0x12dc   :  { %5660 = vtanh.f32 %v4382_v3 }
0x12e5   :  { %v5659_v5 = vpop.eup %5658 }
0x12e6   :  { %v5661_v55 = vpop.eup %5660  ;;  %v4387_v8 = vadd.f32 1.0, %v5659_v5 }
0x12e7   :  { %v4386_v54 = vadd.f32 1.0, %v5661_v55 }
0x12e8   :  { %v4389_v57 = vmul.f32 %v4387_v8, %v4373_v10 }
0x12e9   :  { %v4388_v4 = vmul.f32 %v4386_v54, %v4372_v9 }
0x12eb   :  { %5399 = vmatprep.mubr.msk.f32.mxu0 %vm2283_vm5, %v4388_v4 }
0x12ec   :  { %5400 = vmatmul.mubr.msk.f32.vlgmr.msra.gmra.mrb[40].mxu0 %vm2283_vm5, %v4389_v57 }
0x13bf   :  { %v5401_v16 = vpop.f32.mrb[40].mxu0 }
0x13c0   :  { %v4485_v18 = vadd.f32 %v5401_v16, %v4929_v15  ;;  %v4479_v43 = vpop.f32.mrb[41].mxu0 }
0x13c1   :  { %v4480_v21 = vadd.f32 %v4929_v15, %v4479_v43 }
0x13c2   :  { %v4489_v45 = vadd.f32 %v4485_v18, %v4277_v39 }
0x13c3   :  { %v4488_v42 = vadd.f32 %v4480_v21, %v4276_v40  ;;  %v5540_v40 = vpack.c.bf16 %v4543_v1, %v4542_v36 }
0x13c4   :  { %v4497_v17 = vsel %vm226_vm0, %v4489_v45, 0.0 }
0x13c5   :  { %4498 = vadd.xlane.f32.xlu1 %v4497_v17  ;;  %v4494_v22 = vsel %vm226_vm0, %v4488_v42, 0.0  ;;  %5541 = vmatpush3.bf16.msra.mxu1 %v5540_v40 }
0x13c6   :  { %4495 = vadd.xlane.f32.xlu0 %v4494_v22  ;;  %5542 = vmatprep.subr.bf16.mxu1 %v6013_v37 }
0x1452   :  { %v4499_v23 = vpop.xlane.xlu1 %4498 }
0x1453   :  { %v4501_v20 = vmul.f32 0.03125, %v4499_v23  ;;  %v4496_v24 = vpop.xlane.xlu0 %4495 }
0x1454   :  { %v4500_v26 = vmul.f32 0.03125, %v4496_v24 }
0x1455   :  { %v4503_v28 = vsub.f32 %v4489_v45, %v4501_v20 }
0x1456   :  { %v4502_v0 = vsub.f32 %v4488_v42, %v4500_v26 }
0x1457   :  { %v4505_v30 = vmul.f32 %v4503_v28, %v4503_v28 }
0x1458   :  { %v4504_v31 = vmul.f32 %v4502_v0, %v4502_v0 }
0x1459   :  { %v4509_v59 = vsel %vm226_vm0, %v4505_v30, 0.0 }
0x145a   :  { %4510 = vadd.xlane.f32.xlu1 %v4509_v59  ;;  %v4506_v32 = vsel %vm226_vm0, %v4504_v31, 0.0 }
0x145b   :  { %4507 = vadd.xlane.f32.xlu0 %v4506_v32 }
0x14e7   :  { %v4511_v34 = vpop.xlane.xlu1 %4510 }
0x14e8   :  { %v4513_v39 = vmul.f32 0.03125, %v4511_v34  ;;  %v4508_v25 = vpop.xlane.xlu0 %4507 }
0x14e9   :  { %v4512_v41 = vmul.f32 0.03125, %v4508_v25 }
0x14ea   :  { %v4515_v13 = vadd.f32 1e-12, %v4513_v39 }
0x14eb   :  { %v4514_v11 = vadd.f32 1e-12, %v4512_v41 }
0x14ec   :  { %5662 = vrsqrt.f32 %v4515_v13 }
0x14ed   :  { %5664 = vrsqrt.f32 %v4514_v11 }
0x14f6   :  { %v5663_v46 = vpop.eup %5662 }
0x14f7   :  { %v5665_v48 = vpop.eup %5664  ;;  %v4519_v19 = vmul.f32 %v5663_v46, %v4503_v28 }
0x14f8   :  { %v4518_v50 = vmul.f32 %v5665_v48, %v4502_v0 }
0x14f9   :  { %v4527_v51 = vmul.f32 %v4934_v47, %v4519_v19 }
0x14fa   :  { %v4526_v6 = vmul.f32 %v4934_v47, %v4518_v50 }
0x14fb   :  { %v4535_v35 = vadd.f32 %v4935_v49, %v4527_v51 }
0x14fc   :  { %v4534_v29 = vadd.f32 %v4935_v49, %v4526_v6 }
0x14fd   :  { %4537 = vst.msk [vmem:[#allocation17 + $0x8] sm:$0xff] %vm226_vm0, %v4535_v35 }
0x14fe   :  { %4536 = vst.msk [vmem:[#allocation17] sm:$0xff] %vm226_vm0, %v4534_v29 }
0x1504   :  { %v4539_v52 = vld [vmem:[#allocation17 + $0x8] sm:$0x1] }
0x1505   :  { %v4538_v53 = vld [vmem:[#allocation17] sm:$0x1]  ;;  %v4553_v44 = vrot.slane %v4539_v52, 7 }
0x1507   :  { %v4555_v56 = vsel %vm4554_vm6, %v4553_v44, %v4538_v53 }
0x1508   :  { %5411 = vmatmul.mubr.msk.f32.vlgmr.msra.gmra.mrb[46].mxu1 %vm226_vm0, %v4555_v56 }
0x1509   :  { %5421 = vmatprep.mubr.msk.f32.mxu1 %vm6006_vm1, %v6005_v14  ;;  %5544 = vmatpush3.bf16.msra.mxu1 %v5543_v61  ;;  %v4936_v14 = vld [vmem:[%s7135_s20] ss:$0 sm:$0xff] }
0x150a   :  { %5545 = vmatprep.subr.bf16.mxu1 %v6013_v37 }
0x150d   :  { %5547 = vmatpush3.bf16.msra.mxu1 %v5546_v63 }
0x15db   :  { %v4624_v2 = vpop.f32.mrb[46].mxu1 }
0x15dc   :  { %v4625_v7 = vadd.f32 %v4936_v14, %v4624_v2  ;;  %v5412_v3 = vpop.f32.mrb[47].mxu1 }
0x15de   :  { %5666 = vtanh.f32 %v4625_v7 }
0x15e8   :  { %v5667_v5 = vpop.eup %5666 }
0x15e9   :  { %5422 = vmatmul.mubr.msk.f32.vlgmr.msra.gmra.mrb[48].mxu1 %vm226_vm0, %v5667_v5  ;;  %4630 = vst.msk [vmem:[#allocation18] sm:$0x3] %vm4629_vm7, %v5667_v5 }
0x15ea   :  { %5877 = shalt.err (!%p5874_p6)
}
0x15eb   :  { %s5878_s22 = scalar_lea.hbm %s7139_s24, 32 }
0x15ec   :  { %p5879_p7 = scmp.ne.s32.totalorder %s7139_s24, %s5878_s22  ;;  %p5882_p8 = scmp.lt.u32.totalorder %s5878_s22, %s7139_s24 }
0x15ee   :  { %p5884_p9 = pnand %p5882_p8, %p5879_p7 }
0x15f0   :  { %5887 = shalt.err (!%p5884_p9)
}
0x15f1   :  { %4738 = dma.vmem_to_hbm [thread:$0]  %s4736_s28, 32, %s7139_s24, [#allocation19]  }
0x15f2   :  { %s5888_s19 = scalar_lea.vmem %s7036_s16, 1024  ;;  %p5893_p11 = scmp.lt.s32.totalorder %s7036_s16, %s7036_s16 }
0x15f3   :  { %p5889_p10 = scmp.ne.s32.totalorder %s7036_s16, %s5888_s19  ;;  %p5894_p12 = scmp.lt.s32.totalorder %s5888_s19, %s5888_s19 }
0x15f5   :  { %p5895_p13 = por %p5894_p12, %p5893_p11 }
0x15f7   :  { %p5896_p0 = pnand %p5895_p13, %p5889_p10 }
0x15f9   :  { %5899 = shalt.err (!%p5896_p0)
}
0x15fa   :  { %s5900_s18 = scalar_lea.hbm %s7141_s26, 1024 }
0x15fb   :  { %p5901_p1 = scmp.ne.s32.totalorder %s7141_s26, %s5900_s18  ;;  %p5904_p2 = scmp.lt.u32.totalorder %s5900_s18, %s7141_s26 }
0x15fd   :  { %p5906_p3 = pnand %p5904_p2, %p5901_p1 }
0x15ff   :  { %5909 = shalt.err (!%p5906_p3)
}
0x1600   :  { %4760 = dma.vmem_to_hbm [thread:$0]  %s7036_s16, 1024, %s7141_s26, [#allocation22], %s7180_s7, %s7180_s7, %s5998_s2  }
0x1601   :  { %s6016_s4 = smov [#allocation17]  }
0x1602   :  { %s4722_s8 = sshll.u32 %s6016_s4, 4  ;;  %s4723_s8 = int_to_ptr.vmem [resolvable:$true] %s4722_s8 }
0x1603   :  { %s5910_s11 = scalar_lea.vmem %s4723_s8, 256  ;;  %p5915_p5 = scmp.lt.s32.totalorder %s4723_s8, %s4723_s8 }
0x1604   :  { %p5911_p4 = scmp.ne.s32.totalorder %s4723_s8, %s5910_s11  ;;  %p5916_p6 = scmp.lt.s32.totalorder %s5910_s11, %s5910_s11 }
0x1606   :  { %p5917_p7 = por %p5916_p6, %p5915_p5 }
0x1608   :  { %p5918_p8 = pnand %p5917_p7, %p5911_p4 }
0x160a   :  { %5921 = shalt.err (!%p5918_p8)
}
0x160b   :  { %s5922_s21 = scalar_lea.hbm %s7138_s23, 256 }
0x160c   :  { %p5923_p9 = scmp.ne.s32.totalorder %s7138_s23, %s5922_s21  ;;  %p5926_p10 = scmp.lt.u32.totalorder %s5922_s21, %s7138_s23 }
0x160e   :  { %p5928_p11 = pnand %p5926_p10, %p5923_p9 }
0x1610   :  { %5931 = shalt.err (!%p5928_p11)
}
0x1611   :  { %4728 = dma.vmem_to_hbm [thread:$0]  %s4723_s8, 256, %s7138_s23, [#allocation4], %s7180_s7, %s7180_s7, %s5998_s2  }
0x1612   :  { %s6017_s12 = smov [#allocation23]  }
0x1613   :  { %s4766_s14 = sshll.u32 %s6017_s12, 4  ;;  %s4767_s14 = int_to_ptr.vmem [resolvable:$true] %s4766_s14 }
0x1614   :  { %s5932_s5 = scalar_lea.vmem %s4767_s14, 1024  ;;  %p5937_p13 = scmp.lt.s32.totalorder %s4767_s14, %s4767_s14 }
0x1615   :  { %p5933_p12 = scmp.ne.s32.totalorder %s4767_s14, %s5932_s5  ;;  %p5938_p0 = scmp.lt.s32.totalorder %s5932_s5, %s5932_s5 }
0x1617   :  { %p5939_p1 = por %p5938_p0, %p5937_p13 }
0x1619   :  { %p5940_p2 = pnand %p5939_p1, %p5933_p12 }
0x161b   :  { %5943 = shalt.err (!%p5940_p2)
}
0x161c   :  { %s7192_s10 = sld [smem:[#allocation46_spill]] }
0x1622   :  { %s5944_s19 = scalar_lea.hbm %s7192_s10, 1024 }
0x1623   :  { %p5945_p3 = scmp.ne.s32.totalorder %s7192_s10, %s5944_s19  ;;  %p5948_p4 = scmp.lt.u32.totalorder %s5944_s19, %s7192_s10 }
0x1625   :  { %p5950_p5 = pnand %p5948_p4, %p5945_p3 }
0x1627   :  { %5953 = shalt.err (!%p5950_p5)
}
0x1628   :  { %4772 = dma.vmem_to_hbm [thread:$0]  %s4767_s14, 1024, %s7192_s10, [#allocation22], %s7180_s7, %s7180_s7, %s5998_s2   ;;  %vm4715_vm8 = vcmask 17408  }
0x1629   :  { %s7193_s24 = sld [smem:[#allocation44_spill]]  ;;  %s6018_s0 = smov [#allocation20]  }
0x162a   :  { %s4745_s4 = sshll.u32 %s6018_s0, 4  ;;  %s4746_s4 = int_to_ptr.vmem [resolvable:$true] %s4745_s4 }
0x162b   :  { %s5954_s8 = scalar_lea.vmem %s4746_s4, 32  ;;  %p5959_p7 = scmp.lt.s32.totalorder %s4746_s4, %s4746_s4 }
0x162c   :  { %p5955_p6 = scmp.ne.s32.totalorder %s4746_s4, %s5954_s8  ;;  %p5960_p8 = scmp.lt.s32.totalorder %s5954_s8, %s5954_s8 }
0x162e   :  { %p5961_p9 = por %p5960_p8, %p5959_p7 }
0x162f   :  { %v4938_v55 = vld [vmem:[%s7193_s24] ss:$0 sm:$0xff] }
0x1630   :  { %p5962_p10 = pnand %p5961_p9, %p5955_p6 }
0x16bc   :  { %v4711_v8 = vpop.f32.mrb[48].mxu1 }
0x16bd   :  { %v4712_v9 = vadd.f32 %v4938_v55, %v4711_v8  ;;  %v5423_v54 = vpop.f32.mrb[49].mxu1 }
0x16bf   :  { %4716 = vst.msk [vmem:[#allocation20] sm:$0x3] %vm4715_vm8, %v4712_v9 }
0x16c0   :  { %5965 = shalt.err (!%p5962_p10)
}
0x16c1   :  { %s7194_s11 = sld [smem:[#allocation45_spill]] }
0x16c7   :  { %s5966_s15 = scalar_lea.hbm %s7194_s11, 32 }
0x16c8   :  { %p5967_p11 = scmp.ne.s32.totalorder %s7194_s11, %s5966_s15  ;;  %p5970_p12 = scmp.lt.u32.totalorder %s5966_s15, %s7194_s11 }
0x16ca   :  { %p5972_p13 = pnand %p5970_p12, %p5967_p11 }
0x16cc   :  { %5975 = shalt.err (!%p5972_p13)
}
0x16cd   :  { %4748 = dma.vmem_to_hbm [thread:$0]  %s4746_s4, 32, %s7194_s11, [#allocation19]  }
0x16ce   :  { %5986 = dma.done.wait [#allocation4], 256  }
0x16cf   :  { %5987 = vsyncadd [#allocation4], 4294967040 }
0x16d0   :  { %5988 = dma.done.wait [#allocation19], 64  }
0x16d1   :  { %5989 = vsyncadd [#allocation19], 4294967232 }
0x16d2   :  { %5990 = dma.done.wait [#allocation22], 2048  }
0x16d3   :  { %5991 = vsyncadd [#allocation22], 4294965248 }
0x16d4   :  { %4788 = vsyncpa [#allocation3], 1 }
0x16d5   :  { %4789 = vsyncpa [#allocation6], 1 }
0x16d6   :  { %4790 = vsyncpa [#allocation9], 1 }
0x16d7   :  { %4791 = vsyncpa [#allocation12], 1 }
0x16d8   :  { %4792 = vsyncpa [#allocation15], 1 }
0x16d9   :  { %4793 = vsyncpa [#allocation4], 1 }
0x16da   :  { %4794 = vsyncpa [#allocation19], 1 }
0x16db   :  { %4795 = vsyncpa [#allocation22], 1 }

</bundles_post_ra>
